<compile_context>
chip_gen: v6e
topology: v6e:2x2x1
jax: 0.10.0
libtpu: 0.0.40
codegen_flags: <defaults>
</compile_context>

<pallas_src>
import jax
import jax.numpy as jnp
from jax.experimental import pallas as pl
from jax.experimental.pallas import tpu as pltpu

IN_DIM = 32 * 32 * 5 + 1          # 5121 (PyTorch module input features)
K_MAIN = 5120                     # 40 * 128: MXU-aligned bulk of the K dim
H1, H2 = 256, 128
N_ACT, N_ARG = 3, 4
HEAD_PAD = 128                    # fused head output, lane-dense


def dqn_kernel(x_ref, w1q_ref, s1_ref, w1l_ref, b1_ref, w2_ref, b2_ref,
               wh_ref, bh_ref, head_ref):
    x = x_ref[...]                                     # (B, 5121) f32
    xa = x[:, :K_MAIN].astype(jnp.bfloat16)            # aligned bulk, bf16 for MXU
    xl = x[:, K_MAIN:K_MAIN + 1]                       # (B, 1) last feature, f32

    # dense_1: int8 weights -> bf16 (exact cast, |q| <= 127), f32 accumulate,
    # then apply the per-output-channel scale to the small accumulator and add
    # the exact rank-1 contribution of the 5121st feature.
    w1 = w1q_ref[...].astype(jnp.bfloat16)             # (5120, 256)
    acc = jnp.dot(xa, w1, preferred_element_type=jnp.float32)   # (B, 256) f32
    h1 = acc * s1_ref[...] + xl * w1l_ref[...] + b1_ref[...]
    h1 = jnp.maximum(h1, 0.0).astype(jnp.bfloat16)     # relu(dense_1)

    # dense_2
    h2 = jnp.dot(h1, w2_ref[...], preferred_element_type=jnp.float32) + b2_ref[...]
    h2 = jnp.maximum(h2, 0.0).astype(jnp.bfloat16)     # relu(dense_2)

    # Fused heads: columns [0:3] = dense_act, [3:7] = dense_arg, rest zero.
    head = jnp.dot(h2, wh_ref[...], preferred_element_type=jnp.float32) + bh_ref[...]
    head_ref[...] = jnp.maximum(head, 0.0)             # relu on both heads


def prepare_kernel_params(params):
    """One-time layout/dtype prep:
       - W1 transposed to (in, out); first 5120 rows quantized to int8 with a
         per-output-channel symmetric scale; last row kept exact in f32.
       - W2 and the fused head weight transposed and cast to bf16.
       - Biases stay f32 as (1, out) broadcast rows."""
    w1, b1, w2, b2, wa, ba, wg, bg = params

    w1t = w1.T                                         # (5121, 256)
    w1_main = w1t[:K_MAIN, :]                          # (5120, 256)
    w1_last = w1t[K_MAIN:, :]                          # (1, 256) f32, kept exact

    s1 = jnp.max(jnp.abs(w1_main), axis=0, keepdims=True) / 127.0   # (1, 256)
    s1 = jnp.maximum(s1, jnp.float32(1e-12))
    w1q = jnp.clip(jnp.round(w1_main / s1), -127.0, 127.0).astype(jnp.int8)

    w2p = w2.T.astype(jnp.bfloat16)                    # (256, 128)

    wh = jnp.zeros((H2, HEAD_PAD), jnp.float32)
    wh = wh.at[:, :N_ACT].set(wa.T).at[:, N_ACT:N_ACT + N_ARG].set(wg.T)
    wh = wh.astype(jnp.bfloat16)
    bh = jnp.zeros((HEAD_PAD,), jnp.float32)
    bh = bh.at[:N_ACT].set(ba).at[N_ACT:N_ACT + N_ARG].set(bg)

    return (w1q, s1, w1_last, b1[None, :], w2p, b2[None, :], wh, bh[None, :])


def dqn_forward(x, kparams):
    """x: (B, 5121) float32 -> (act (B, 3), arg (B, 4))."""
    w1q, s1, w1l, b1, w2p, b2, wh, bh = kparams
    B = x.shape[0]

    vmem = pl.BlockSpec(memory_space=pltpu.MemorySpace.VMEM)
    head = pl.pallas_call(
        dqn_kernel,
        out_shape=jax.ShapeDtypeStruct((B, HEAD_PAD), jnp.float32),
        in_specs=[vmem] * 9,
        out_specs=vmem,
    )(x, w1q, s1, w1l, b1, w2p, b2, wh, bh)

    return head[:, :N_ACT], head[:, N_ACT:N_ACT + N_ARG]


def init_params(key):
    """PyTorch nn.Linear default init: U(-1/sqrt(fan_in), 1/sqrt(fan_in))."""
    def linear(key, out_f, in_f):
        kw, kb = jax.random.split(key)
        bound = 1.0 / jnp.sqrt(jnp.float32(in_f))
        w = jax.random.uniform(kw, (out_f, in_f), jnp.float32, -bound, bound)
        b = jax.random.uniform(kb, (out_f,), jnp.float32, -bound, bound)
        return w, b

    k1, k2, k3, k4 = jax.random.split(key, 4)
    w1, b1 = linear(k1, H1, IN_DIM)
    w2, b2 = linear(k2, H2, H1)
    wa, ba = linear(k3, N_ACT, H2)
    wg, bg = linear(k4, N_ARG, H2)
    return (w1, b1, w2, b2, wa, ba, wg, bg)


def dqn_reference_f32(x, params):
    """Pure f32 reference of the original PyTorch forward."""
    w1, b1, w2, b2, wa, ba, wg, bg = params
    h1 = jnp.maximum(x @ w1.T + b1, 0.0)
    h2 = jnp.maximum(h1 @ w2.T + b2, 0.0)
    act = jnp.maximum(h2 @ wa.T + ba, 0.0)
    arg = jnp.maximum(h2 @ wg.T + bg, 0.0)
    return act, arg


def dqn_reference_quant(x, kparams):
    """Reference mirroring the kernel's int8/bf16 quantization and f32
    accumulation exactly (for a tight numerical check)."""
    w1q, s1, w1l, b1, w2p, b2, wh, bh = kparams
    xa = x[:, :K_MAIN].astype(jnp.bfloat16)
    xl = x[:, K_MAIN:K_MAIN + 1]
    acc = jnp.dot(xa, w1q.astype(jnp.bfloat16), preferred_element_type=jnp.float32)
    h1 = jnp.maximum(acc * s1 + xl * w1l + b1, 0.0)
    h2 = jnp.maximum(
        jnp.dot(h1.astype(jnp.bfloat16), w2p, preferred_element_type=jnp.float32) + b2, 0.0)
    head = jnp.maximum(
        jnp.dot(h2.astype(jnp.bfloat16), wh, preferred_element_type=jnp.float32) + bh, 0.0)
    return head[:, :N_ACT], head[:, N_ACT:N_ACT + N_ARG]


if __name__ == "__main__":
    key = jax.random.PRNGKey(0)
    kp, kx = jax.random.split(key)

    params = init_params(kp)
    kparams = prepare_kernel_params(params)   # one-time layout/dtype/quant prep

    batch = 2
    x = jax.random.normal(kx, (batch, IN_DIM), jnp.float32)

    act, arg = dqn_forward(x, kparams)
    jax.block_until_ready((act, arg))

    assert act.shape == (batch, N_ACT) and arg.shape == (batch, N_ARG)

    # Tight check against a reference with identical quantization/accumulation.
    act_q, arg_q = dqn_reference_quant(x, kparams)
    assert jnp.allclose(act, act_q, atol=1e-3, rtol=1e-3)
    assert jnp.allclose(arg, arg_q, atol=1e-3, rtol=1e-3)

    # Loose sanity check against the pure-f32 PyTorch-equivalent forward
    # (int8 W1 + bf16 activations introduce ~1% relative error).
    act_f, arg_f = dqn_reference_f32(x, params)
    assert jnp.allclose(act, act_f, atol=5e-2, rtol=5e-2)
    assert jnp.allclose(arg, arg_f, atol=5e-2, rtol=5e-2)

    print("KERNEL_OK")
</pallas_src>

<mosaic_0001>
module attributes {stable_mosaic.version = 11 : i64} {
  func.func @dqn_kernel(%arg0: memref<2x5121xf32, #tpu.memory_space<vmem>>, %arg1: memref<5120x256xi8, #tpu.memory_space<vmem>>, %arg2: memref<1x256xf32, #tpu.memory_space<vmem>>, %arg3: memref<1x256xf32, #tpu.memory_space<vmem>>, %arg4: memref<1x256xf32, #tpu.memory_space<vmem>>, %arg5: memref<256x128xbf16, #tpu.memory_space<vmem>>, %arg6: memref<1x128xf32, #tpu.memory_space<vmem>>, %arg7: memref<128x128xbf16, #tpu.memory_space<vmem>>, %arg8: memref<1x128xf32, #tpu.memory_space<vmem>>, %arg9: memref<2x128xf32, #tpu.memory_space<vmem>>) attributes {dimension_semantics = [], scalar_prefetch = 0 : i64, scratch_operands = 0 : i64, tpu.core_type = #tpu.core_type<tc>} {
    %c0 = arith.constant 0 : index
    %c0_0 = arith.constant 0 : index
    %0 = vector.load %arg0[%c0, %c0_0] : memref<2x5121xf32, #tpu.memory_space<vmem>>, vector<2x5121xf32>
    %1 = vector.extract_strided_slice %0 {offsets = [0, 0], sizes = [2, 5120], strides = [1, 1]} : vector<2x5121xf32> to vector<2x5120xf32>
    %2 = arith.truncf %1 : vector<2x5120xf32> to vector<2x5120xbf16>
    %3 = vector.extract_strided_slice %0 {offsets = [0, 5120], sizes = [2, 1], strides = [1, 1]} : vector<2x5121xf32> to vector<2x1xf32>
    %c0_1 = arith.constant 0 : index
    %c0_2 = arith.constant 0 : index
    %4 = vector.load %arg1[%c0_1, %c0_2] : memref<5120x256xi8, #tpu.memory_space<vmem>>, vector<5120x256xi8>
    %5 = arith.sitofp %4 : vector<5120x256xi8> to vector<5120x256xbf16>
    %cst = arith.constant dense<0.000000e+00> : vector<2x256xf32>
    %6 = tpu.matmul %2, %5, %cst {dimension_numbers = #tpu.dot_dimension_numbers<[1], [0], [0], [1], [0, 0, 1, 1], [], []>} : vector<2x5120xbf16>, vector<5120x256xbf16>, vector<2x256xf32> -> vector<2x256xf32>
    %c0_3 = arith.constant 0 : index
    %c0_4 = arith.constant 0 : index
    %7 = vector.load %arg2[%c0_3, %c0_4] : memref<1x256xf32, #tpu.memory_space<vmem>>, vector<1x256xf32>
    %8 = vector.broadcast %7 : vector<1x256xf32> to vector<2x256xf32>
    %9 = arith.mulf %6, %8 : vector<2x256xf32>
    %c0_5 = arith.constant 0 : index
    %c0_6 = arith.constant 0 : index
    %10 = vector.load %arg3[%c0_5, %c0_6] : memref<1x256xf32, #tpu.memory_space<vmem>>, vector<1x256xf32>
    %11 = vector.broadcast %3 : vector<2x1xf32> to vector<2x256xf32>
    %12 = vector.broadcast %10 : vector<1x256xf32> to vector<2x256xf32>
    %13 = arith.mulf %11, %12 : vector<2x256xf32>
    %14 = arith.addf %9, %13 : vector<2x256xf32>
    %c0_7 = arith.constant 0 : index
    %c0_8 = arith.constant 0 : index
    %15 = vector.load %arg4[%c0_7, %c0_8] : memref<1x256xf32, #tpu.memory_space<vmem>>, vector<1x256xf32>
    %16 = vector.broadcast %15 : vector<1x256xf32> to vector<2x256xf32>
    %17 = arith.addf %14, %16 : vector<2x256xf32>
    %cst_9 = arith.constant 0.000000e+00 : f32
    %18 = vector.broadcast %cst_9 : f32 to vector<2x256xf32>
    %19 = arith.maximumf %17, %18 : vector<2x256xf32>
    %20 = arith.truncf %19 : vector<2x256xf32> to vector<2x256xbf16>
    %c0_10 = arith.constant 0 : index
    %c0_11 = arith.constant 0 : index
    %21 = vector.load %arg5[%c0_10, %c0_11] : memref<256x128xbf16, #tpu.memory_space<vmem>>, vector<256x128xbf16>
    %cst_12 = arith.constant dense<0.000000e+00> : vector<2x128xf32>
    %22 = tpu.matmul %20, %21, %cst_12 {dimension_numbers = #tpu.dot_dimension_numbers<[1], [0], [0], [1], [0, 0, 1, 1], [], []>} : vector<2x256xbf16>, vector<256x128xbf16>, vector<2x128xf32> -> vector<2x128xf32>
    %c0_13 = arith.constant 0 : index
    %c0_14 = arith.constant 0 : index
    %23 = vector.load %arg6[%c0_13, %c0_14] : memref<1x128xf32, #tpu.memory_space<vmem>>, vector<1x128xf32>
    %24 = vector.broadcast %23 : vector<1x128xf32> to vector<2x128xf32>
    %25 = arith.addf %22, %24 : vector<2x128xf32>
    %cst_15 = arith.constant 0.000000e+00 : f32
    %26 = vector.broadcast %cst_15 : f32 to vector<2x128xf32>
    %27 = arith.maximumf %25, %26 : vector<2x128xf32>
    %28 = arith.truncf %27 : vector<2x128xf32> to vector<2x128xbf16>
    %c0_16 = arith.constant 0 : index
    %c0_17 = arith.constant 0 : index
    %29 = vector.load %arg7[%c0_16, %c0_17] : memref<128x128xbf16, #tpu.memory_space<vmem>>, vector<128x128xbf16>
    %cst_18 = arith.constant dense<0.000000e+00> : vector<2x128xf32>
    %30 = tpu.matmul %28, %29, %cst_18 {dimension_numbers = #tpu.dot_dimension_numbers<[1], [0], [0], [1], [0, 0, 1, 1], [], []>} : vector<2x128xbf16>, vector<128x128xbf16>, vector<2x128xf32> -> vector<2x128xf32>
    %c0_19 = arith.constant 0 : index
    %c0_20 = arith.constant 0 : index
    %31 = vector.load %arg8[%c0_19, %c0_20] : memref<1x128xf32, #tpu.memory_space<vmem>>, vector<1x128xf32>
    %32 = vector.broadcast %31 : vector<1x128xf32> to vector<2x128xf32>
    %33 = arith.addf %30, %32 : vector<2x128xf32>
    %cst_21 = arith.constant 0.000000e+00 : f32
    %34 = vector.broadcast %cst_21 : f32 to vector<2x128xf32>
    %35 = arith.maximumf %33, %34 : vector<2x128xf32>
    %c0_22 = arith.constant 0 : index
    %c0_23 = arith.constant 0 : index
    %36 = vector.load %arg9[%c0_22, %c0_23] : memref<2x128xf32, #tpu.memory_space<vmem>>, vector<2x128xf32>
    tpu.vector_store %arg9[%c0_22, %c0_23], %35 {strides = array<i32>} : memref<2x128xf32, #tpu.memory_space<vmem>>, vector<2x128xf32>,
    return
  }
}

</mosaic_0001>

<bundles_post_ra>
// kernel: tpu_custom_call.1
= control target key start
LH: loop header
LB: loop body
LE: loop exit
PB: predicated region body
PF: predicated region fallthrough
CT: control target
= control target key end

     0   :  { %14 = vsyncpa [#allocation3], 0  ;;  %s3218_s0 = inlined_call_operand.hbm [shape: f32[2,5121], index: 0, kind: input, shape index: {}]   ;;  %s3219_s1 = inlined_call_operand.hbm [shape: s8[5120,256], index: 1, kind: input, shape index: {}]   ;;  %s3220_s2 = inlined_call_operand.hbm [shape: f32[1,256], index: 2, kind: input, shape index: {}]   ;;  %s3221_s3 = inlined_call_operand.hbm [shape: f32[1,256], index: 3, kind: input, shape index: {}]   ;;  %s3222_s4 = inlined_call_operand.hbm [shape: f32[1,256], index: 4, kind: input, shape index: {}]   ;;  %s3223_s5 = inlined_call_operand.hbm [shape: bf16[256,128], index: 5, kind: input, shape index: {}]   ;;  %s3224_s6 = inlined_call_operand.hbm [shape: f32[1,128], index: 6, kind: input, shape index: {}]   ;;  %s3225_s7 = inlined_call_operand.hbm [shape: bf16[128,128], index: 7, kind: input, shape index: {}]   ;;  %s3226_s8 = inlined_call_operand.hbm [shape: f32[1,128], index: 8, kind: input, shape index: {}]   ;;  %s3227_s9 = inlined_call_operand.hbm [shape: f32[2,128], index: 9, kind: output, shape index: {}]  }
   0x1   :  { %15 = vsyncpa [#allocation6], 0 }
   0x2   :  { %16 = vsyncpa [#allocation9], 0 }
   0x3   :  { %17 = vsyncpa [#allocation12], 0 }
   0x4   :  { %18 = vsyncpa [#allocation15], 0 }
   0x5   :  { %19 = vsyncpa [#allocation4], 0  ;;  %s2924_s30 = smov [#allocation5]  }
   0x6   :  { %s35_s10 = sshll.u32 %s2924_s30, 4  ;;  %s36_s10 = int_to_ptr.vmem [resolvable:$true] %s35_s10 }
   0x7   :  { %s2720_s11 = scalar_lea.vmem %s36_s10, 40960  ;;  %p2725_p1 = scmp.lt.s32.totalorder %s36_s10, %s36_s10 }
   0x8   :  { %p2721_p0 = scmp.ne.s32.totalorder %s36_s10, %s2720_s11  ;;  %p2726_p2 = scmp.lt.s32.totalorder %s2720_s11, %s2720_s11 }
   0xa   :  { %p2727_p3 = por %p2726_p2, %p2725_p1 }
   0xc   :  { %p2728_p4 = pnand %p2727_p3, %p2721_p0 }
   0xe   :  { %2731 = shalt.err (!%p2728_p4)
}
   0xf   :  { %s2925_s12 = smov 256   ;;  %s2926_s13 = smov 16  }
  0x10   :  { %41 = dma.hbm_to_vmem [thread:$0]  %s3219_s1, 40960, %s36_s10, [#allocation6], %s2925_s12, %s2925_s12, %s2926_s13  }
  0x11   :  { %s2927_s16 = smov [#allocation8]   ;;  %s2928_s18 = smov [#allocation11]  }
  0x12   :  { %s58_s17 = sshll.u32 %s2927_s16, 4  ;;  %s77_s19 = sshll.u32 %s2928_s18, 4  ;;  %s59_s17 = int_to_ptr.vmem [resolvable:$true] %s58_s17  ;;  %s78_s19 = int_to_ptr.vmem [resolvable:$true] %s77_s19 }
  0x13   :  { %s2740_s20 = scalar_lea.vmem %s59_s17, 32  ;;  %p2745_p6 = scmp.lt.s32.totalorder %s59_s17, %s59_s17 }
  0x14   :  { %p2741_p5 = scmp.ne.s32.totalorder %s59_s17, %s2740_s20  ;;  %p2746_p7 = scmp.lt.s32.totalorder %s2740_s20, %s2740_s20 }
  0x16   :  { %p2747_p8 = por %p2746_p7, %p2745_p6 }
  0x18   :  { %p2748_p9 = pnand %p2747_p8, %p2741_p5 }
  0x1a   :  { %2751 = shalt.err (!%p2748_p9)
}
  0x1b   :  { %61 = dma.hbm_to_vmem [thread:$0]  %s3221_s3, 32, %s59_s17, [#allocation9]  }
  0x1c   :  { %s2760_s23 = scalar_lea.vmem %s78_s19, 2048  ;;  %p2765_p11 = scmp.lt.s32.totalorder %s78_s19, %s78_s19 }
  0x1d   :  { %p2761_p10 = scmp.ne.s32.totalorder %s78_s19, %s2760_s23  ;;  %p2766_p12 = scmp.lt.s32.totalorder %s2760_s23, %s2760_s23 }
  0x1f   :  { %p2767_p13 = por %p2766_p12, %p2765_p11 }
  0x21   :  { %p2768_p0 = pnand %p2767_p13, %p2761_p10 }
  0x23   :  { %2771 = shalt.err (!%p2768_p0)
}
  0x24   :  { %s2929_s1 = smov 64   ;;  %s2930_s24 = smov 4  }
  0x25   :  { %83 = dma.hbm_to_vmem [thread:$0]  %s3223_s5, 2048, %s78_s19, [#allocation12], %s2929_s1, %s2929_s1, %s2930_s24  }
  0x26   :  { %s2931_s27 = smov [#allocation14]   ;;  %s2932_s29 = smov [#allocation2]  }
  0x27   :  { %s99_s28 = sshll.u32 %s2931_s27, 4  ;;  %s26_s30 = sshll.u32 %s2932_s29, 4  ;;  %s100_s28 = int_to_ptr.vmem [resolvable:$true] %s99_s28  ;;  %s27_s30 = int_to_ptr.vmem [resolvable:$true] %s26_s30 }
  0x28   :  { %s2780_s3 = scalar_lea.vmem %s100_s28, 1024  ;;  %p2785_p2 = scmp.lt.s32.totalorder %s100_s28, %s100_s28 }
  0x29   :  { %p2781_p1 = scmp.ne.s32.totalorder %s100_s28, %s2780_s3  ;;  %p2786_p3 = scmp.lt.s32.totalorder %s2780_s3, %s2780_s3 }
  0x2b   :  { %p2787_p4 = por %p2786_p3, %p2785_p2 }
  0x2d   :  { %p2788_p5 = pnand %p2787_p4, %p2781_p1 }
  0x2f   :  { %2791 = shalt.err (!%p2788_p5)
}
  0x30   :  { %105 = dma.hbm_to_vmem [thread:$0]  %s3225_s7, 1024, %s100_s28, [#allocation15], %s2929_s1, %s2929_s1, %s2930_s24  }
  0x31   :  { %s2800_s12 = scalar_lea.vmem %s27_s30, 1312  ;;  %p2805_p7 = scmp.lt.s32.totalorder %s27_s30, %s27_s30 }
  0x32   :  { %p2801_p6 = scmp.ne.s32.totalorder %s27_s30, %s2800_s12  ;;  %p2806_p8 = scmp.lt.s32.totalorder %s2800_s12, %s2800_s12 }
  0x34   :  { %p2807_p9 = por %p2806_p8, %p2805_p7 }
  0x36   :  { %p2808_p10 = pnand %p2807_p9, %p2801_p6 }
  0x38   :  { %2811 = shalt.err (!%p2808_p10)
}
  0x39   :  { %29 = dma.hbm_to_vmem [thread:$0]  %s3218_s0, 1312, %s27_s30, [#allocation3]  }
  0x3a   :  { %s2933_s14 = smov [#allocation7]   ;;  %s2934_s16 = smov [#allocation10]  }
  0x3b   :  { %s48_s15 = sshll.u32 %s2933_s14, 4  ;;  %s68_s17 = sshll.u32 %s2934_s16, 4  ;;  %s49_s15 = int_to_ptr.vmem [resolvable:$true] %s48_s15  ;;  %s69_s17 = int_to_ptr.vmem [resolvable:$true] %s68_s17 }
  0x3c   :  { %s2820_s18 = scalar_lea.vmem %s49_s15, 32  ;;  %p2825_p12 = scmp.lt.s32.totalorder %s49_s15, %s49_s15 }
  0x3d   :  { %p2821_p11 = scmp.ne.s32.totalorder %s49_s15, %s2820_s18  ;;  %p2826_p13 = scmp.lt.s32.totalorder %s2820_s18, %s2820_s18 }
  0x3f   :  { %p2827_p0 = por %p2826_p13, %p2825_p12 }
  0x41   :  { %p2828_p1 = pnand %p2827_p0, %p2821_p11 }
  0x43   :  { %2831 = shalt.err (!%p2828_p1)
}
  0x44   :  { %51 = dma.hbm_to_vmem [thread:$0]  %s3220_s2, 32, %s49_s15, [#allocation6]  }
  0x45   :  { %s2840_s20 = scalar_lea.vmem %s69_s17, 32  ;;  %p2845_p3 = scmp.lt.s32.totalorder %s69_s17, %s69_s17 }
  0x46   :  { %p2841_p2 = scmp.ne.s32.totalorder %s69_s17, %s2840_s20  ;;  %p2846_p4 = scmp.lt.s32.totalorder %s2840_s20, %s2840_s20 }
  0x48   :  { %p2847_p5 = por %p2846_p4, %p2845_p3 }
  0x4a   :  { %p2848_p6 = pnand %p2847_p5, %p2841_p2 }
  0x4c   :  { %2851 = shalt.err (!%p2848_p6)
}
  0x4d   :  { %71 = dma.hbm_to_vmem [thread:$0]  %s3222_s4, 32, %s69_s17, [#allocation9]  }
  0x4e   :  { %s2935_s22 = smov [#allocation13]   ;;  %s2936_s1 = smov [#allocation16]  }
  0x4f   :  { %s90_s23 = sshll.u32 %s2935_s22, 4  ;;  %s112_s24 = sshll.u32 %s2936_s1, 4  ;;  %s91_s23 = int_to_ptr.vmem [resolvable:$true] %s90_s23  ;;  %s113_s24 = int_to_ptr.vmem [resolvable:$true] %s112_s24 }
  0x50   :  { %s2860_s25 = scalar_lea.vmem %s91_s23, 16  ;;  %s2864_s2 = scalar_lea.vmem %s91_s23, 32 }
  0x51   :  { %p2861_p7 = scmp.ne.s32.totalorder %s91_s23, %s2860_s25  ;;  %p2865_p8 = scmp.lt.s32.totalorder %s91_s23, %s91_s23 }
  0x52   :  { %p2866_p9 = scmp.lt.s32.totalorder %s2864_s2, %s2860_s25 }
  0x54   :  { %p2867_p10 = por %p2866_p9, %p2865_p8 }
  0x56   :  { %p2868_p11 = pnand %p2867_p10, %p2861_p7 }
  0x58   :  { %2871 = shalt.err (!%p2868_p11)
}
  0x59   :  { %93 = dma.hbm_to_vmem [thread:$0]  %s3224_s6, 16, %s91_s23, [#allocation12]  }
  0x5a   :  { %s2880_s28 = scalar_lea.vmem %s113_s24, 16  ;;  %s2884_s4 = scalar_lea.vmem %s113_s24, 32 }
  0x5b   :  { %p2881_p12 = scmp.ne.s32.totalorder %s113_s24, %s2880_s28  ;;  %p2885_p13 = scmp.lt.s32.totalorder %s113_s24, %s113_s24 }
  0x5c   :  { %p2886_p0 = scmp.lt.s32.totalorder %s2884_s4, %s2880_s28 }
  0x5e   :  { %p2887_p1 = por %p2886_p0, %p2885_p13 }
  0x60   :  { %p2888_p2 = pnand %p2887_p1, %p2881_p12 }
  0x62   :  { %2891 = shalt.err (!%p2888_p2)
}
  0x63   :  { %115 = dma.hbm_to_vmem [thread:$0]  %s3226_s8, 16, %s113_s24, [#allocation15]  }
  0x64   :  { %2912 = dma.done.wait [#allocation3], 1312  }
  0x65   :  { %2913 = vsyncadd [#allocation3], 4294965984 }
  0x66   :  { %2914 = dma.done.wait [#allocation6], 40992  }
  0x67   :  { %2915 = vsyncadd [#allocation6], 4294926304 }
  0x68   :  { %2916 = dma.done.wait [#allocation9], 64  }
  0x69   :  { %2917 = vsyncadd [#allocation9], 4294967232 }
  0x6a   :  { %2918 = dma.done.wait [#allocation12], 2064  }
  0x6b   :  { %2919 = vsyncadd [#allocation12], 4294965232 }
  0x6c   :  { %2920 = dma.done.wait [#allocation15], 1040  }
  0x6d   :  { %2921 = vsyncadd [#allocation15], 4294966256  ;;  %v422_v0 = vld [vmem:[#allocation5 + $0x38] sm:$0xff]  ;;  %v421_v2 = vld [vmem:[#allocation5 + $0x30] sm:$0xff]  ;;  %v2937_v18 = vmov 1983009808   ;;  %v169_v20 = vlaneseq }
  0x6e   :  { %v438_v1 = vld [vmem:[#allocation5 + $0xb8] sm:$0xff]  ;;  %v748_v3 = vunpack.c.l.s8.bf16 %v422_v0  ;;  %v750_v4 = vunpack.c.h.s8.bf16 %v422_v0  ;;  %v437_v7 = vld [vmem:[#allocation5 + $0xb0] sm:$0xff]  ;;  %v749_v8 = vunpack.c.h.s8.bf16 %v421_v2  ;;  %v420_v10 = vld [vmem:[#allocation5 + $0x28] sm:$0xff]  ;;  %v747_v12 = vunpack.c.l.s8.bf16 %v421_v2  ;;  %s2942_s6 = smov [#allocation17]  }
  0x6f   :  { %v780_v5 = vunpack.c.l.s8.bf16 %v438_v1  ;;  %v782_v6 = vunpack.c.h.s8.bf16 %v438_v1  ;;  %v781_v9 = vunpack.c.h.s8.bf16 %v437_v7  ;;  %v436_v11 = vld [vmem:[#allocation5 + $0xa8] sm:$0xff]  ;;  %v779_v13 = vunpack.c.l.s8.bf16 %v437_v7  ;;  %v419_v16 = vld [vmem:[#allocation5 + $0x20] sm:$0xff]  ;;  %v418_v27 = vld [vmem:[#allocation5 + $0x18] sm:$0xff]  ;;  %s2568_s8 = sshll.u32 %s2942_s6, 4  ;;  %s2569_s8 = int_to_ptr.vmem [resolvable:$true] %s2568_s8 }
  0x70   :  { %1375 = vmatprep.subr.bf16.mxu0 %v750_v4  ;;  %v746_v14 = vunpack.c.h.s8.bf16 %v420_v10  ;;  %v778_v15 = vunpack.c.h.s8.bf16 %v436_v11  ;;  %v435_v17 = vld [vmem:[#allocation5 + $0xa0] sm:$0xff]  ;;  %v167_v19 = vunpack.c.l.s4 %v2937_v18  ;;  %v745_v21 = vunpack.c.h.s8.bf16 %v419_v16  ;;  %v434_v28 = vld [vmem:[#allocation5 + $0x98] sm:$0xff]  ;;  %v417_v33 = vld [vmem:[#allocation5 + $0x10] sm:$0xff]  ;;  %s2892_s3 = scalar_lea.vmem %s2569_s8, 32  ;;  %p2897_p4 = scmp.lt.s32.totalorder %s2569_s8, %s2569_s8 }
  0x71   :  { %1416 = vmatprep.subr.bf16.mxu1 %v782_v6  ;;  %1376 = vmatpush1.bf16.msra.mxu0 %v749_v8  ;;  %v777_v22 = vunpack.c.h.s8.bf16 %v435_v17  ;;  %v744_v23 = vunpack.c.l.s8.bf16 %v420_v10  ;;  %v776_v24 = vunpack.c.l.s8.bf16 %v436_v11  ;;  %v3020_v26 = vshrl.u32 %v169_v20, 7  ;;  %v433_v34 = vld [vmem:[#allocation5 + $0x90] sm:$0xff]  ;;  %v416_v43 = vld [vmem:[#allocation5 + $0x8] sm:$0xff]  ;;  %v415_v51 = vld [vmem:[#allocation5] sm:$0xff]  ;;  %p2893_p3 = scmp.ne.s32.totalorder %s2569_s8, %s2892_s3  ;;  %p2898_p5 = scmp.lt.s32.totalorder %s2892_s3, %s2892_s3 }
  0x72   :  { %1417 = vmatpush1.bf16.msra.mxu1 %v781_v9  ;;  %1377 = vmatprep.subr.bf16.mxu0 %v748_v3  ;;  %v168_v25 = vunpack.c.0.s8 %v167_v19  ;;  %v743_v29 = vunpack.c.l.s8.bf16 %v419_v16  ;;  %v775_v30 = vunpack.c.l.s8.bf16 %v435_v17  ;;  %v742_v31 = vunpack.c.h.s8.bf16 %v418_v27  ;;  %v144_v36 = vld [vmem:[#allocation2] sm:$0xff]  ;;  %v431_v52 = vld [vmem:[#allocation5 + $0x80] sm:$0xff]  ;;  %v430_v60 = vld [vmem:[#allocation5 + $0x78] sm:$0xff] }
  0x73   :  { %1418 = vmatprep.subr.bf16.mxu1 %v780_v5  ;;  %v774_v32 = vunpack.c.h.s8.bf16 %v434_v28  ;;  %v741_v37 = vunpack.c.h.s8.bf16 %v417_v33  ;;  %v773_v38 = vunpack.c.h.s8.bf16 %v433_v34  ;;  %v740_v39 = vunpack.c.l.s8.bf16 %v418_v27  ;;  %v432_v44 = vld [vmem:[#allocation5 + $0x88] sm:$0xff]  ;;  %v446_v61 = vld [vmem:[#allocation5 + $0xf8] sm:$0xff]  ;;  %v429_v62 = vld [vmem:[#allocation5 + $0x70] sm:$0xff]  ;;  %p2899_p6 = por %p2898_p5, %p2897_p4 }
  0x74   :  { %v3023_v35 = vsub.s32 %v168_v25, %v3020_v26  ;;  %v772_v40 = vunpack.c.l.s8.bf16 %v434_v28  ;;  %v165_v42 = vcombine.high %v144_v36, %v144_v36  ;;  %v739_v47 = vunpack.c.l.s8.bf16 %v417_v33  ;;  %v445_v63 = vld [vmem:[#allocation5 + $0xf0] sm:$0xff]  ;;  %v428_v8 = vld [vmem:[#allocation5 + $0x68] sm:$0xff]  ;;  %v427_v10 = vld [vmem:[#allocation5 + $0x60] sm:$0xff] }
  0x75   :  { %1378 = vmatpush1.bf16.msra.mxu0 %v747_v12  ;;  %v771_v48 = vunpack.c.l.s8.bf16 %v433_v34  ;;  %v738_v49 = vunpack.c.h.s8.bf16 %v416_v43  ;;  %v770_v50 = vunpack.c.h.s8.bf16 %v432_v44  ;;  %v737_v56 = vunpack.c.h.s8.bf16 %v415_v51  ;;  %v444_v9 = vld [vmem:[#allocation5 + $0xe8] sm:$0xff]  ;;  %v443_v11 = vld [vmem:[#allocation5 + $0xe0] sm:$0xff]  ;;  %v426_v20 = vld [vmem:[#allocation5 + $0x58] sm:$0xff]  ;;  %p2900_p7 = pnand %p2899_p6, %p2893_p3 }
  0x76   :  { %1419 = vmatpush1.bf16.msra.mxu1 %v779_v13  ;;  %1379 = vmatprep.subr.bf16.mxu0 %v746_v14  ;;  %v3026_v41 = vrot.slane %v144_v36, %v3023_v35  ;;  %v3031_v46 = vrot.slane %v165_v42, %v3023_v35  ;;  %v769_v57 = vunpack.c.h.s8.bf16 %v431_v52  ;;  %v736_v58 = vunpack.c.l.s8.bf16 %v416_v43  ;;  %v424_v33 = vld [vmem:[#allocation5 + $0x48] sm:$0xff]  ;;  %v145_v36 = vld [vmem:[#allocation2 + $0x8] sm:$0xff]  ;;  %v423_v42 = vld [vmem:[#allocation5 + $0x40] sm:$0xff] }
  0x77   :  { %1420 = vmatprep.subr.bf16.mxu1 %v778_v15  ;;  %v768_v59 = vunpack.c.l.s8.bf16 %v432_v44  ;;  %v735_v0 = vunpack.c.l.s8.bf16 %v415_v51  ;;  %v767_v1 = vunpack.c.l.s8.bf16 %v431_v52  ;;  %v766_v2 = vunpack.c.h.s8.bf16 %v430_v60  ;;  %v440_v34 = vld [vmem:[#allocation5 + $0xc8] sm:$0xff]  ;;  %v439_v43 = vld [vmem:[#allocation5 + $0xc0] sm:$0xff]  ;;  %v470_v51 = vld [vmem:[#allocation5 + $0x1b8] sm:$0xff] }
  0x78   :  { %v180_v45 = vcombine.high %v3026_v41, %v3026_v41  ;;  %v181_v54 = vcombine.high %v3031_v46, %v3031_v46  ;;  %v798_v3 = vunpack.c.h.s8.bf16 %v446_v61  ;;  %v765_v4 = vunpack.c.h.s8.bf16 %v429_v62 }
  0x79   :  { %1380 = vmatpush1.bf16.msra.mxu0 %v745_v21  ;;  %v797_v5 = vunpack.c.h.s8.bf16 %v445_v63  ;;  %v764_v6 = vunpack.c.l.s8.bf16 %v430_v60  ;;  %v796_v7 = vunpack.c.l.s8.bf16 %v446_v61  ;;  %v763_v12 = vunpack.c.l.s8.bf16 %v429_v62  ;;  %v442_v21 = vld [vmem:[#allocation5 + $0xd8] sm:$0xff] }
  0x7a   :  { %1421 = vmatpush1.bf16.msra.mxu1 %v777_v22  ;;  %1381 = vmatprep.subr.bf16.mxu0 %v744_v23  ;;  %v376_v53 = vpack.c.bf16 %v180_v45, %v180_v45  ;;  %v378_v55 = vpack.c.bf16 %v181_v54, %v181_v54  ;;  %v795_v13 = vunpack.c.l.s8.bf16 %v445_v63  ;;  %v762_v14 = vunpack.c.h.s8.bf16 %v428_v8  ;;  %v425_v22 = vld [vmem:[#allocation5 + $0x50] sm:$0xff] }
  0x7b   :  { %1422 = vmatprep.subr.bf16.mxu1 %v776_v24  ;;  %v794_v15 = vunpack.c.h.s8.bf16 %v444_v9  ;;  %v761_v16 = vunpack.c.h.s8.bf16 %v427_v10  ;;  %v793_v17 = vunpack.c.h.s8.bf16 %v443_v11  ;;  %v760_v18 = vunpack.c.l.s8.bf16 %v428_v8  ;;  %v441_v23 = vld [vmem:[#allocation5 + $0xd0] sm:$0xff] }
  0x7c   :  { %1407 = vmatprep.mubr.bf16.mxu0 %v376_v53  ;;  %1448 = vmatprep.mubr.bf16.mxu1 %v378_v55  ;;  %v792_v19 = vunpack.c.l.s8.bf16 %v444_v9  ;;  %v759_v24 = vunpack.c.l.s8.bf16 %v427_v10  ;;  %v791_v25 = vunpack.c.l.s8.bf16 %v443_v11  ;;  %v758_v27 = vunpack.c.h.s8.bf16 %v426_v20  ;;  %v451_v10 = vld [vmem:[#allocation5 + $0x120] sm:$0xff] }
  0x7d   :  { %1382 = vmatpush1.bf16.msra.mxu0 %v743_v29  ;;  %v790_v28 = vunpack.c.h.s8.bf16 %v442_v21  ;;  %v757_v29 = vunpack.c.h.s8.bf16 %v425_v22  ;;  %v182_v44 = vcombine.high %v145_v36, %v145_v36  ;;  %v753_v45 = vunpack.c.h.s8.bf16 %v423_v42  ;;  %v467_v11 = vld [vmem:[#allocation5 + $0x1a0] sm:$0xff] }
  0x7e   :  { %1423 = vmatpush1.bf16.msra.mxu1 %v775_v30  ;;  %1383 = vmatprep.subr.bf16.mxu0 %v742_v31  ;;  %v789_v30 = vunpack.c.h.s8.bf16 %v441_v23  ;;  %v756_v31 = vunpack.c.l.s8.bf16 %v426_v20  ;;  %v3036_v52 = vrot.slane %v145_v36, %v3023_v35  ;;  %v751_v54 = vunpack.c.l.s8.bf16 %v423_v42  ;;  %v447_v36 = vld [vmem:[#allocation5 + $0x100] sm:$0xff] }
  0x7f   :  { %1424 = vmatprep.subr.bf16.mxu1 %v774_v32  ;;  %v788_v32 = vunpack.c.l.s8.bf16 %v442_v21  ;;  %v3039_v53 = vrot.slane %v182_v44, %v3023_v35  ;;  %v783_v55 = vunpack.c.l.s8.bf16 %v439_v43  ;;  %v375_v62 = vpack.c.bf16 %v3026_v41, %v3026_v41  ;;  %v478_v44 = vld [vmem:[#allocation5 + $0x1f8] sm:$0xff] }
  0x80   :  { %v197_v60 = vcombine.high %v3036_v52, %v3036_v52  ;;  %v377_v63 = vpack.c.bf16 %v3031_v46, %v3031_v46  ;;  %vm2941_vm0 = vmmov 0  }
  0x81   :  { %1384 = vmatpush1.bf16.msra.mxu0 %v741_v37  ;;  %v755_v37 = vunpack.c.l.s8.bf16 %v425_v22  ;;  %v198_v61 = vcombine.high %v3039_v53, %v3039_v53  ;;  %v449_v22 = vld [vmem:[#allocation5 + $0x110] sm:$0xff] }
  0x82   :  { %1425 = vmatpush1.bf16.msra.mxu1 %v773_v38  ;;  %1385 = vmatprep.subr.bf16.mxu0 %v740_v39  ;;  %v787_v38 = vunpack.c.l.s8.bf16 %v441_v23  ;;  %v754_v39 = vunpack.c.h.s8.bf16 %v424_v33  ;;  %v465_v23 = vld [vmem:[#allocation5 + $0x190] sm:$0xff] }
  0x83   :  { %1426 = vmatprep.subr.bf16.mxu1 %v772_v40  ;;  %v786_v40 = vunpack.c.h.s8.bf16 %v440_v34 }
  0x85   :  { %1386 = vmatpush1.bf16.msra.mxu0 %v739_v47  ;;  %v785_v47 = vunpack.c.h.s8.bf16 %v439_v43  ;;  %v462_v43 = vld [vmem:[#allocation5 + $0x178] sm:$0xff] }
  0x86   :  { %1427 = vmatpush1.bf16.msra.mxu1 %v771_v48  ;;  %1387 = vmatprep.subr.bf16.mxu0 %v738_v49  ;;  %v752_v48 = vunpack.c.l.s8.bf16 %v424_v33  ;;  %v784_v49 = vunpack.c.l.s8.bf16 %v440_v34 }
  0x87   :  { %1428 = vmatprep.subr.bf16.mxu1 %v770_v50  ;;  %v454_v50 = vld [vmem:[#allocation5 + $0x138] sm:$0xff] }
  0x89   :  { %1388 = vmatpush1.bf16.msra.mxu0 %v737_v56  ;;  %v814_v56 = vunpack.c.h.s8.bf16 %v454_v50 }
  0x8a   :  { %1429 = vmatpush1.bf16.msra.mxu1 %v769_v57  ;;  %1389 = vmatprep.subr.bf16.mxu0 %v736_v58  ;;  %v846_v57 = vunpack.c.h.s8.bf16 %v470_v51  ;;  %v453_v58 = vld [vmem:[#allocation5 + $0x130] sm:$0xff] }
  0x8b   :  { %1430 = vmatprep.subr.bf16.mxu1 %v768_v59  ;;  %v469_v59 = vld [vmem:[#allocation5 + $0x1b0] sm:$0xff]  ;;  %v811_v41 = vunpack.c.l.s8.bf16 %v453_v58 }
  0x8c   :  { %v843_v8 = vunpack.c.l.s8.bf16 %v469_v59 }
  0x8d   :  { %1390 = vmatpush1.bf16.msra.mxu0 %v735_v0  ;;  %v813_v0 = vunpack.c.h.s8.bf16 %v453_v58  ;;  %v460_v58 = vld [vmem:[#allocation5 + $0x168] sm:$0xff] }
  0x8e   :  { %1431 = vmatpush1.bf16.msra.mxu1 %v767_v1  ;;  %1391 = vmatprep.subr.bf16.mxu0 %v766_v2  ;;  %v845_v1 = vunpack.c.h.s8.bf16 %v469_v59  ;;  %v812_v2 = vunpack.c.l.s8.bf16 %v454_v50  ;;  %v461_v50 = vld [vmem:[#allocation5 + $0x170] sm:$0xff]  ;;  %v476_v59 = vld [vmem:[#allocation5 + $0x1e8] sm:$0xff] }
  0x8f   :  { %1432 = vmatprep.subr.bf16.mxu1 %v798_v3  ;;  %v844_v3 = vunpack.c.l.s8.bf16 %v470_v51  ;;  %v477_v51 = vld [vmem:[#allocation5 + $0x1f0] sm:$0xff] }
  0x91   :  { %1392 = vmatpush2.bf16.msra.mxu0 %v765_v4  ;;  %v452_v4 = vld [vmem:[#allocation5 + $0x128] sm:$0xff] }
  0x92   :  { %1433 = vmatpush2.bf16.msra.mxu1 %v797_v5  ;;  %1393 = vmatprep.subr.bf16.mxu0 %v764_v6  ;;  %v468_v5 = vld [vmem:[#allocation5 + $0x1a8] sm:$0xff]  ;;  %v380_v6 = vpack.c.bf16 %v197_v60, %v197_v60  ;;  %v810_v46 = vunpack.c.h.s8.bf16 %v452_v4  ;;  %v827_v60 = vunpack.c.l.s8.bf16 %v461_v50 }
  0x93   :  { %1434 = vmatprep.subr.bf16.mxu1 %v796_v7  ;;  %v382_v7 = vpack.c.bf16 %v198_v61, %v198_v61  ;;  %v842_v9 = vunpack.c.h.s8.bf16 %v468_v5  ;;  %v859_v61 = vunpack.c.l.s8.bf16 %v477_v51 }
  0x95   :  { %1394 = vmatpush2.bf16.msra.mxu0 %v763_v12  ;;  %v809_v12 = vunpack.c.h.s8.bf16 %v451_v10 }
  0x96   :  { %1435 = vmatpush2.bf16.msra.mxu1 %v795_v13  ;;  %1395 = vmatprep.subr.bf16.mxu0 %v762_v14  ;;  %v841_v13 = vunpack.c.h.s8.bf16 %v467_v11  ;;  %v808_v14 = vunpack.c.l.s8.bf16 %v452_v4  ;;  %v824_v4 = vunpack.c.l.s8.bf16 %v460_v58 }
  0x97   :  { %1436 = vmatprep.subr.bf16.mxu1 %v794_v15  ;;  %v840_v15 = vunpack.c.l.s8.bf16 %v468_v5  ;;  %v856_v5 = vunpack.c.l.s8.bf16 %v476_v59 }
  0x99   :  { %1396 = vmatpush2.bf16.msra.mxu0 %v761_v16  ;;  %v450_v16 = vld [vmem:[#allocation5 + $0x118] sm:$0xff] }
  0x9a   :  { %1437 = vmatpush2.bf16.msra.mxu1 %v793_v17  ;;  %1397 = vmatprep.subr.bf16.mxu0 %v760_v18  ;;  %v466_v17 = vld [vmem:[#allocation5 + $0x198] sm:$0xff]  ;;  %v807_v18 = vunpack.c.l.s8.bf16 %v451_v10  ;;  %v806_v20 = vunpack.c.h.s8.bf16 %v450_v16  ;;  %v457_v10 = vld [vmem:[#allocation5 + $0x150] sm:$0xff] }
  0x9b   :  { %1438 = vmatprep.subr.bf16.mxu1 %v792_v19  ;;  %v839_v19 = vunpack.c.l.s8.bf16 %v467_v11  ;;  %v838_v21 = vunpack.c.h.s8.bf16 %v466_v17  ;;  %v473_v11 = vld [vmem:[#allocation5 + $0x1d0] sm:$0xff] }
  0x9d   :  { %1398 = vmatpush2.bf16.msra.mxu0 %v759_v24  ;;  %v805_v24 = vunpack.c.h.s8.bf16 %v449_v22 }
  0x9e   :  { %1439 = vmatpush2.bf16.msra.mxu1 %v791_v25  ;;  %1399 = vmatprep.subr.bf16.mxu0 %v758_v27  ;;  %v837_v25 = vunpack.c.h.s8.bf16 %v465_v23  ;;  %v804_v27 = vunpack.c.l.s8.bf16 %v450_v16  ;;  %v456_v16 = vld [vmem:[#allocation5 + $0x148] sm:$0xff] }
  0x9f   :  { %1440 = vmatprep.subr.bf16.mxu1 %v790_v28  ;;  %v836_v28 = vunpack.c.l.s8.bf16 %v466_v17  ;;  %v472_v17 = vld [vmem:[#allocation5 + $0x1c8] sm:$0xff] }
  0xa1   :  { %1400 = vmatpush2.bf16.msra.mxu0 %v757_v29  ;;  %v448_v29 = vld [vmem:[#allocation5 + $0x108] sm:$0xff] }
  0xa2   :  { %1441 = vmatpush2.bf16.msra.mxu1 %v789_v30  ;;  %1401 = vmatprep.subr.bf16.mxu0 %v756_v31  ;;  %v464_v30 = vld [vmem:[#allocation5 + $0x188] sm:$0xff]  ;;  %v803_v31 = vunpack.c.l.s8.bf16 %v449_v22  ;;  %v802_v33 = vunpack.c.h.s8.bf16 %v448_v29  ;;  %v850_v22 = vunpack.c.h.s8.bf16 %v472_v17 }
  0xa3   :  { %1442 = vmatprep.subr.bf16.mxu1 %v788_v32  ;;  %v835_v32 = vunpack.c.l.s8.bf16 %v465_v23  ;;  %v834_v34 = vunpack.c.h.s8.bf16 %v464_v30  ;;  %v832_v42 = vunpack.c.l.s8.bf16 %v464_v30  ;;  %v455_v23 = vld [vmem:[#allocation5 + $0x140] sm:$0xff]  ;;  %v848_v30 = vunpack.c.l.s8.bf16 %v472_v17 }
  0xa5   :  { %1402 = vmatpush2.bf16.msra.mxu0 %v755_v37  ;;  %v463_v37 = vld [vmem:[#allocation5 + $0x180] sm:$0xff] }
  0xa6   :  { %1443 = vmatpush2.bf16.msra.mxu1 %v787_v38  ;;  %1403 = vmatprep.subr.bf16.mxu0 %v754_v39  ;;  %v801_v38 = vunpack.c.h.s8.bf16 %v447_v36  ;;  %v833_v39 = vunpack.c.h.s8.bf16 %v463_v37 }
  0xa7   :  { %1444 = vmatprep.subr.bf16.mxu1 %v786_v40  ;;  %v800_v40 = vunpack.c.l.s8.bf16 %v448_v29  ;;  %v816_v29 = vunpack.c.l.s8.bf16 %v456_v16 }
  0xa9   :  { %1404 = vmatpush2.bf16.msra.mxu0 %v753_v45  ;;  %v799_v45 = vunpack.c.l.s8.bf16 %v447_v36  ;;  %v815_v36 = vunpack.c.l.s8.bf16 %v455_v23 }
  0xaa   :  { %1445 = vmatpush2.bf16.msra.mxu1 %v785_v47  ;;  %1405 = vmatprep.subr.bf16.mxu0 %v752_v48  ;;  %v831_v47 = vunpack.c.l.s8.bf16 %v463_v37  ;;  %v830_v48 = vunpack.c.h.s8.bf16 %v462_v43 }
  0xab   :  { %1446 = vmatprep.subr.bf16.mxu1 %v784_v49  ;;  %v862_v49 = vunpack.c.h.s8.bf16 %v478_v44 }
  0xad   :  { %1406 = vmatpush2.bf16.msra.mxu0 %v751_v54  ;;  %v829_v54 = vunpack.c.h.s8.bf16 %v461_v50 }
  0xae   :  { %1447 = vmatpush2.bf16.msra.mxu1 %v783_v55  ;;  %1457 = vmatprep.subr.bf16.mxu0 %v814_v56  ;;  %v861_v55 = vunpack.c.h.s8.bf16 %v477_v51  ;;  %v828_v56 = vunpack.c.l.s8.bf16 %v462_v43 }
  0xaf   :  { %1498 = vmatprep.subr.bf16.mxu1 %v846_v57  ;;  %v860_v57 = vunpack.c.l.s8.bf16 %v478_v44 }
  0xb0   :  { %1408 = vmatmul.mubr.bf16.vlgmr.msra.gmra.mxu0 %v375_v62  ;;  %v826_v62 = vunpack.c.h.s8.bf16 %v460_v58 }
  0xb1   :  { %1449 = vmatmul.mubr.bf16.vlgmr.msra.gmra.mxu1 %v377_v63  ;;  %1458 = vmatpush1.bf16.msra.mxu0 %v813_v0  ;;  %v858_v63 = vunpack.c.h.s8.bf16 %v476_v59  ;;  %v459_v0 = vld [vmem:[#allocation5 + $0x160] sm:$0xff] }
  0xb2   :  { %1499 = vmatpush1.bf16.msra.mxu1 %v845_v1  ;;  %1459 = vmatprep.subr.bf16.mxu0 %v812_v2  ;;  %v475_v1 = vld [vmem:[#allocation5 + $0x1e0] sm:$0xff]  ;;  %v825_v2 = vunpack.c.h.s8.bf16 %v459_v0 }
  0xb3   :  { %1500 = vmatprep.subr.bf16.mxu1 %v844_v3  ;;  %1489 = vmatprep.mubr.bf16.mxu0 %v380_v6  ;;  %v857_v3 = vunpack.c.h.s8.bf16 %v475_v1  ;;  %v458_v6 = vld [vmem:[#allocation5 + $0x158] sm:$0xff] }
  0xb4   :  { %1530 = vmatprep.mubr.bf16.mxu1 %v382_v7  ;;  %v474_v7 = vld [vmem:[#allocation5 + $0x1d8] sm:$0xff] }
  0xb5   :  { %1460 = vmatpush1.bf16.msra.mxu0 %v811_v41  ;;  %v823_v41 = vunpack.c.l.s8.bf16 %v459_v0 }
  0xb6   :  { %1501 = vmatpush1.bf16.msra.mxu1 %v843_v8  ;;  %1461 = vmatprep.subr.bf16.mxu0 %v810_v46  ;;  %v855_v8 = vunpack.c.l.s8.bf16 %v475_v1  ;;  %v822_v46 = vunpack.c.h.s8.bf16 %v458_v6 }
  0xb7   :  { %1502 = vmatprep.subr.bf16.mxu1 %v842_v9  ;;  %v854_v9 = vunpack.c.h.s8.bf16 %v474_v7 }
  0xb9   :  { %1462 = vmatpush1.bf16.msra.mxu0 %v809_v12  ;;  %v821_v12 = vunpack.c.h.s8.bf16 %v457_v10 }
  0xba   :  { %1503 = vmatpush1.bf16.msra.mxu1 %v841_v13  ;;  %1463 = vmatprep.subr.bf16.mxu0 %v808_v14  ;;  %v853_v13 = vunpack.c.h.s8.bf16 %v473_v11  ;;  %v820_v14 = vunpack.c.l.s8.bf16 %v458_v6 }
  0xbb   :  { %1504 = vmatprep.subr.bf16.mxu1 %v840_v15  ;;  %v852_v15 = vunpack.c.l.s8.bf16 %v474_v7 }
  0xbd   :  { %1464 = vmatpush1.bf16.msra.mxu0 %v807_v18  ;;  %v146_v18 = vld [vmem:[#allocation2 + $0x10] sm:$0xff] }
  0xbe   :  { %1505 = vmatpush1.bf16.msra.mxu1 %v839_v19  ;;  %1465 = vmatprep.subr.bf16.mxu0 %v806_v20  ;;  %v819_v19 = vunpack.c.l.s8.bf16 %v457_v10  ;;  %v851_v20 = vunpack.c.l.s8.bf16 %v473_v11 }
  0xbf   :  { %1506 = vmatprep.subr.bf16.mxu1 %v838_v21  ;;  %v818_v21 = vunpack.c.h.s8.bf16 %v456_v16 }
  0xc1   :  { %1466 = vmatpush1.bf16.msra.mxu0 %v805_v24  ;;  %v471_v24 = vld [vmem:[#allocation5 + $0x1c0] sm:$0xff] }
  0xc2   :  { %1507 = vmatpush1.bf16.msra.mxu1 %v837_v25  ;;  %1467 = vmatprep.subr.bf16.mxu0 %v804_v27  ;;  %v199_v25 = vcombine.high %v146_v18, %v146_v18  ;;  %v817_v27 = vunpack.c.h.s8.bf16 %v455_v23  ;;  %v847_v37 = vunpack.c.l.s8.bf16 %v471_v24 }
  0xc3   :  { %1508 = vmatprep.subr.bf16.mxu1 %v836_v28  ;;  %v849_v28 = vunpack.c.h.s8.bf16 %v471_v24  ;;  %v494_v24 = vld [vmem:[#allocation5 + $0x278] sm:$0xff] }
  0xc5   :  { %1468 = vmatpush1.bf16.msra.mxu0 %v803_v31  ;;  %v486_v31 = vld [vmem:[#allocation5 + $0x238] sm:$0xff] }
  0xc6   :  { %1509 = vmatpush1.bf16.msra.mxu1 %v835_v32  ;;  %1469 = vmatprep.subr.bf16.mxu0 %v802_v33  ;;  %v502_v32 = vld [vmem:[#allocation5 + $0x2b8] sm:$0xff]  ;;  %v3050_v33 = vrot.slane %v146_v18, %v3023_v35  ;;  %v876_v50 = vunpack.c.l.s8.bf16 %v486_v31  ;;  %v479_v18 = vld [vmem:[#allocation5 + $0x200] sm:$0xff] }
  0xc7   :  { %1510 = vmatprep.subr.bf16.mxu1 %v834_v34  ;;  %v3053_v34 = vrot.slane %v199_v25, %v3023_v35  ;;  %v908_v51 = vunpack.c.l.s8.bf16 %v502_v32  ;;  %v510_v25 = vld [vmem:[#allocation5 + $0x2f8] sm:$0xff] }
  0xc8   :  { %v214_v43 = vcombine.high %v3050_v33, %v3050_v33 }
  0xc9   :  { %1470 = vmatpush1.bf16.msra.mxu0 %v801_v38  ;;  %v878_v38 = vunpack.c.h.s8.bf16 %v486_v31  ;;  %v215_v44 = vcombine.high %v3053_v34, %v3053_v34  ;;  %v493_v31 = vld [vmem:[#allocation5 + $0x270] sm:$0xff] }
  0xca   :  { %1511 = vmatpush1.bf16.msra.mxu1 %v833_v39  ;;  %1471 = vmatprep.subr.bf16.mxu0 %v800_v40  ;;  %v910_v39 = vunpack.c.h.s8.bf16 %v502_v32  ;;  %v485_v40 = vld [vmem:[#allocation5 + $0x230] sm:$0xff] }
  0xcb   :  { %1512 = vmatprep.subr.bf16.mxu1 %v832_v42  ;;  %v501_v42 = vld [vmem:[#allocation5 + $0x2b0] sm:$0xff] }
  0xcc   :  { %v907_v58 = vunpack.c.l.s8.bf16 %v501_v42  ;;  %v509_v32 = vld [vmem:[#allocation5 + $0x2f0] sm:$0xff] }
  0xcd   :  { %1472 = vmatpush1.bf16.msra.mxu0 %v799_v45  ;;  %v379_v45 = vpack.c.bf16 %v3036_v52, %v3036_v52  ;;  %v875_v52 = vunpack.c.l.s8.bf16 %v485_v40 }
  0xce   :  { %1513 = vmatpush1.bf16.msra.mxu1 %v831_v47  ;;  %1473 = vmatprep.subr.bf16.mxu0 %v830_v48  ;;  %v381_v47 = vpack.c.bf16 %v3039_v53, %v3039_v53  ;;  %v877_v48 = vunpack.c.h.s8.bf16 %v485_v40  ;;  %v492_v40 = vld [vmem:[#allocation5 + $0x268] sm:$0xff] }
  0xcf   :  { %1514 = vmatprep.subr.bf16.mxu1 %v862_v49  ;;  %v909_v49 = vunpack.c.h.s8.bf16 %v501_v42  ;;  %v508_v42 = vld [vmem:[#allocation5 + $0x2e8] sm:$0xff] }
  0xd1   :  { %1474 = vmatpush2.bf16.msra.mxu0 %v829_v54  ;;  %v484_v54 = vld [vmem:[#allocation5 + $0x228] sm:$0xff] }
  0xd2   :  { %1515 = vmatpush2.bf16.msra.mxu1 %v861_v55  ;;  %1475 = vmatprep.subr.bf16.mxu0 %v828_v56  ;;  %v500_v55 = vld [vmem:[#allocation5 + $0x2a8] sm:$0xff]  ;;  %v384_v56 = vpack.c.bf16 %v214_v43, %v214_v43  ;;  %v874_v53 = vunpack.c.h.s8.bf16 %v484_v54  ;;  %v872_v0 = vunpack.c.l.s8.bf16 %v484_v54  ;;  %v891_v43 = vunpack.c.l.s8.bf16 %v493_v31 }
  0xd3   :  { %1516 = vmatprep.subr.bf16.mxu1 %v860_v57  ;;  %v386_v57 = vpack.c.bf16 %v215_v44, %v215_v44  ;;  %v906_v59 = vunpack.c.h.s8.bf16 %v500_v55  ;;  %v904_v1 = vunpack.c.l.s8.bf16 %v500_v55  ;;  %v923_v44 = vunpack.c.l.s8.bf16 %v509_v32 }
  0xd4   :  { %v888_v54 = vunpack.c.l.s8.bf16 %v492_v40  ;;  %v920_v55 = vunpack.c.l.s8.bf16 %v508_v42 }
  0xd5   :  { %1476 = vmatpush2.bf16.msra.mxu0 %v827_v60  ;;  %v483_v60 = vld [vmem:[#allocation5 + $0x220] sm:$0xff] }
  0xd6   :  { %1517 = vmatpush2.bf16.msra.mxu1 %v859_v61  ;;  %1477 = vmatprep.subr.bf16.mxu0 %v826_v62  ;;  %v499_v61 = vld [vmem:[#allocation5 + $0x2a0] sm:$0xff]  ;;  %v873_v62 = vunpack.c.h.s8.bf16 %v483_v60 }
  0xd7   :  { %1518 = vmatprep.subr.bf16.mxu1 %v858_v63  ;;  %v905_v63 = vunpack.c.h.s8.bf16 %v499_v61 }
  0xd9   :  { %1478 = vmatpush2.bf16.msra.mxu0 %v825_v2  ;;  %v482_v2 = vld [vmem:[#allocation5 + $0x218] sm:$0xff] }
  0xda   :  { %1519 = vmatpush2.bf16.msra.mxu1 %v857_v3  ;;  %1479 = vmatprep.subr.bf16.mxu0 %v824_v4  ;;  %v498_v3 = vld [vmem:[#allocation5 + $0x298] sm:$0xff]  ;;  %v871_v4 = vunpack.c.l.s8.bf16 %v483_v60  ;;  %v870_v6 = vunpack.c.h.s8.bf16 %v482_v2  ;;  %v868_v10 = vunpack.c.l.s8.bf16 %v482_v2  ;;  %v489_v60 = vld [vmem:[#allocation5 + $0x250] sm:$0xff]  ;;  %v488_v2 = vld [vmem:[#allocation5 + $0x248] sm:$0xff] }
  0xdb   :  { %1520 = vmatprep.subr.bf16.mxu1 %v856_v5  ;;  %v903_v5 = vunpack.c.l.s8.bf16 %v499_v61  ;;  %v902_v7 = vunpack.c.h.s8.bf16 %v498_v3  ;;  %v900_v11 = vunpack.c.l.s8.bf16 %v498_v3  ;;  %v505_v61 = vld [vmem:[#allocation5 + $0x2d0] sm:$0xff]  ;;  %v504_v3 = vld [vmem:[#allocation5 + $0x2c8] sm:$0xff] }
  0xdd   :  { %1480 = vmatpush2.bf16.msra.mxu0 %v823_v41  ;;  %v481_v41 = vld [vmem:[#allocation5 + $0x210] sm:$0xff] }
  0xde   :  { %1521 = vmatpush2.bf16.msra.mxu1 %v855_v8  ;;  %1481 = vmatprep.subr.bf16.mxu0 %v822_v46  ;;  %v497_v8 = vld [vmem:[#allocation5 + $0x290] sm:$0xff]  ;;  %v869_v46 = vunpack.c.h.s8.bf16 %v481_v41 }
  0xdf   :  { %1522 = vmatprep.subr.bf16.mxu1 %v854_v9  ;;  %v901_v9 = vunpack.c.h.s8.bf16 %v497_v8 }
  0xe1   :  { %1482 = vmatpush2.bf16.msra.mxu0 %v821_v12  ;;  %v480_v12 = vld [vmem:[#allocation5 + $0x208] sm:$0xff] }
  0xe2   :  { %1523 = vmatpush2.bf16.msra.mxu1 %v853_v13  ;;  %1483 = vmatprep.subr.bf16.mxu0 %v820_v14  ;;  %v496_v13 = vld [vmem:[#allocation5 + $0x288] sm:$0xff]  ;;  %v867_v14 = vunpack.c.l.s8.bf16 %v481_v41  ;;  %v866_v16 = vunpack.c.h.s8.bf16 %v480_v12  ;;  %v914_v41 = vunpack.c.h.s8.bf16 %v504_v3 }
  0xe3   :  { %1524 = vmatprep.subr.bf16.mxu1 %v852_v15  ;;  %v899_v15 = vunpack.c.l.s8.bf16 %v497_v8  ;;  %v898_v17 = vunpack.c.h.s8.bf16 %v496_v13  ;;  %v896_v23 = vunpack.c.l.s8.bf16 %v496_v13  ;;  %v487_v8 = vld [vmem:[#allocation5 + $0x240] sm:$0xff]  ;;  %v912_v13 = vunpack.c.l.s8.bf16 %v504_v3 }
  0xe5   :  { %1484 = vmatpush2.bf16.msra.mxu0 %v819_v19  ;;  %v495_v19 = vld [vmem:[#allocation5 + $0x280] sm:$0xff] }
  0xe6   :  { %1525 = vmatpush2.bf16.msra.mxu1 %v851_v20  ;;  %1485 = vmatprep.subr.bf16.mxu0 %v818_v21  ;;  %v865_v20 = vunpack.c.h.s8.bf16 %v479_v18  ;;  %v897_v21 = vunpack.c.h.s8.bf16 %v495_v19 }
  0xe7   :  { %1526 = vmatprep.subr.bf16.mxu1 %v850_v22  ;;  %v864_v22 = vunpack.c.l.s8.bf16 %v480_v12  ;;  %v880_v12 = vunpack.c.l.s8.bf16 %v488_v2 }
  0xe9   :  { %1486 = vmatpush2.bf16.msra.mxu0 %v817_v27  ;;  %v863_v27 = vunpack.c.l.s8.bf16 %v479_v18  ;;  %v879_v18 = vunpack.c.l.s8.bf16 %v487_v8 }
  0xea   :  { %1527 = vmatpush2.bf16.msra.mxu1 %v849_v28  ;;  %1487 = vmatprep.subr.bf16.mxu0 %v816_v29  ;;  %v895_v28 = vunpack.c.l.s8.bf16 %v495_v19  ;;  %v894_v29 = vunpack.c.h.s8.bf16 %v494_v24 }
  0xeb   :  { %1528 = vmatprep.subr.bf16.mxu1 %v848_v30  ;;  %v926_v30 = vunpack.c.h.s8.bf16 %v510_v25 }
  0xed   :  { %1488 = vmatpush2.bf16.msra.mxu0 %v815_v36  ;;  %v893_v36 = vunpack.c.h.s8.bf16 %v493_v31 }
  0xee   :  { %1529 = vmatpush2.bf16.msra.mxu1 %v847_v37  ;;  %1539 = vmatprep.subr.bf16.mxu0 %v878_v38  ;;  %v925_v37 = vunpack.c.h.s8.bf16 %v509_v32  ;;  %v892_v38 = vunpack.c.l.s8.bf16 %v494_v24 }
  0xef   :  { %1580 = vmatprep.subr.bf16.mxu1 %v910_v39  ;;  %v924_v39 = vunpack.c.l.s8.bf16 %v510_v25 }
  0xf0   :  { %1490 = vmatmul.mubr.bf16.vlgmr.msra.gmra.mxu0 %v379_v45  ;;  %v890_v45 = vunpack.c.h.s8.bf16 %v492_v40 }
  0xf1   :  { %1531 = vmatmul.mubr.bf16.vlgmr.msra.gmra.mxu1 %v381_v47  ;;  %1540 = vmatpush1.bf16.msra.mxu0 %v877_v48  ;;  %v922_v47 = vunpack.c.h.s8.bf16 %v508_v42  ;;  %v491_v48 = vld [vmem:[#allocation5 + $0x260] sm:$0xff] }
  0xf2   :  { %1581 = vmatpush1.bf16.msra.mxu1 %v909_v49  ;;  %1541 = vmatprep.subr.bf16.mxu0 %v876_v50  ;;  %v507_v49 = vld [vmem:[#allocation5 + $0x2e0] sm:$0xff]  ;;  %v889_v50 = vunpack.c.h.s8.bf16 %v491_v48 }
  0xf3   :  { %1582 = vmatprep.subr.bf16.mxu1 %v908_v51  ;;  %1571 = vmatprep.mubr.bf16.mxu0 %v384_v56  ;;  %v921_v51 = vunpack.c.h.s8.bf16 %v507_v49  ;;  %v490_v56 = vld [vmem:[#allocation5 + $0x258] sm:$0xff] }
  0xf4   :  { %1612 = vmatprep.mubr.bf16.mxu1 %v386_v57  ;;  %v506_v57 = vld [vmem:[#allocation5 + $0x2d8] sm:$0xff] }
  0xf5   :  { %1542 = vmatpush1.bf16.msra.mxu0 %v875_v52  ;;  %v887_v52 = vunpack.c.l.s8.bf16 %v491_v48 }
  0xf6   :  { %1583 = vmatpush1.bf16.msra.mxu1 %v907_v58  ;;  %1543 = vmatprep.subr.bf16.mxu0 %v874_v53  ;;  %v919_v58 = vunpack.c.l.s8.bf16 %v507_v49  ;;  %v886_v53 = vunpack.c.h.s8.bf16 %v490_v56 }
  0xf7   :  { %1584 = vmatprep.subr.bf16.mxu1 %v906_v59  ;;  %v918_v59 = vunpack.c.h.s8.bf16 %v506_v57 }
  0xf9   :  { %1544 = vmatpush1.bf16.msra.mxu0 %v873_v62  ;;  %v885_v62 = vunpack.c.h.s8.bf16 %v489_v60 }
  0xfa   :  { %1585 = vmatpush1.bf16.msra.mxu1 %v905_v63  ;;  %1545 = vmatprep.subr.bf16.mxu0 %v872_v0  ;;  %v917_v63 = vunpack.c.h.s8.bf16 %v505_v61  ;;  %v884_v0 = vunpack.c.l.s8.bf16 %v490_v56 }
  0xfb   :  { %1586 = vmatprep.subr.bf16.mxu1 %v904_v1  ;;  %v916_v1 = vunpack.c.l.s8.bf16 %v506_v57 }
  0xfd   :  { %1546 = vmatpush1.bf16.msra.mxu0 %v871_v4  ;;  %v147_v4 = vld [vmem:[#allocation2 + $0x18] sm:$0xff] }
  0xfe   :  { %1587 = vmatpush1.bf16.msra.mxu1 %v903_v5  ;;  %1547 = vmatprep.subr.bf16.mxu0 %v870_v6  ;;  %v883_v5 = vunpack.c.l.s8.bf16 %v489_v60  ;;  %v915_v6 = vunpack.c.l.s8.bf16 %v505_v61 }
  0xff   :  { %1588 = vmatprep.subr.bf16.mxu1 %v902_v7  ;;  %v882_v7 = vunpack.c.h.s8.bf16 %v488_v2 }
 0x101   :  { %1548 = vmatpush1.bf16.msra.mxu0 %v869_v46  ;;  %v503_v46 = vld [vmem:[#allocation5 + $0x2c0] sm:$0xff] }
 0x102   :  { %1589 = vmatpush1.bf16.msra.mxu1 %v901_v9  ;;  %1549 = vmatprep.subr.bf16.mxu0 %v868_v10  ;;  %v216_v9 = vcombine.high %v147_v4, %v147_v4  ;;  %v881_v10 = vunpack.c.h.s8.bf16 %v487_v8  ;;  %v911_v19 = vunpack.c.l.s8.bf16 %v503_v46 }
 0x103   :  { %1590 = vmatprep.subr.bf16.mxu1 %v900_v11  ;;  %v913_v11 = vunpack.c.h.s8.bf16 %v503_v46  ;;  %v526_v46 = vld [vmem:[#allocation5 + $0x378] sm:$0xff] }
 0x105   :  { %1550 = vmatpush1.bf16.msra.mxu0 %v867_v14  ;;  %v518_v14 = vld [vmem:[#allocation5 + $0x338] sm:$0xff] }
 0x106   :  { %1591 = vmatpush1.bf16.msra.mxu1 %v899_v15  ;;  %1551 = vmatprep.subr.bf16.mxu0 %v866_v16  ;;  %v534_v15 = vld [vmem:[#allocation5 + $0x3b8] sm:$0xff]  ;;  %v3064_v16 = vrot.slane %v147_v4, %v3023_v35  ;;  %v940_v31 = vunpack.c.l.s8.bf16 %v518_v14  ;;  %v511_v4 = vld [vmem:[#allocation5 + $0x300] sm:$0xff] }
 0x107   :  { %1592 = vmatprep.subr.bf16.mxu1 %v898_v17  ;;  %v3067_v17 = vrot.slane %v216_v9, %v3023_v35  ;;  %v972_v32 = vunpack.c.l.s8.bf16 %v534_v15  ;;  %v542_v9 = vld [vmem:[#allocation5 + $0x3f8] sm:$0xff] }
 0x108   :  { %v231_v24 = vcombine.high %v3064_v16, %v3064_v16 }
 0x109   :  { %1552 = vmatpush1.bf16.msra.mxu0 %v865_v20  ;;  %v942_v20 = vunpack.c.h.s8.bf16 %v518_v14  ;;  %v232_v25 = vcombine.high %v3067_v17, %v3067_v17  ;;  %v525_v14 = vld [vmem:[#allocation5 + $0x370] sm:$0xff] }
 0x10a   :  { %1593 = vmatpush1.bf16.msra.mxu1 %v897_v21  ;;  %1553 = vmatprep.subr.bf16.mxu0 %v864_v22  ;;  %v974_v21 = vunpack.c.h.s8.bf16 %v534_v15  ;;  %v517_v22 = vld [vmem:[#allocation5 + $0x330] sm:$0xff] }
 0x10b   :  { %1594 = vmatprep.subr.bf16.mxu1 %v896_v23  ;;  %v533_v23 = vld [vmem:[#allocation5 + $0x3b0] sm:$0xff] }
 0x10c   :  { %v971_v40 = vunpack.c.l.s8.bf16 %v533_v23  ;;  %v541_v15 = vld [vmem:[#allocation5 + $0x3f0] sm:$0xff] }
 0x10d   :  { %1554 = vmatpush1.bf16.msra.mxu0 %v863_v27  ;;  %v383_v27 = vpack.c.bf16 %v3050_v33, %v3050_v33  ;;  %v939_v33 = vunpack.c.l.s8.bf16 %v517_v22 }
 0x10e   :  { %1595 = vmatpush1.bf16.msra.mxu1 %v895_v28  ;;  %1555 = vmatprep.subr.bf16.mxu0 %v894_v29  ;;  %v385_v28 = vpack.c.bf16 %v3053_v34, %v3053_v34  ;;  %v941_v29 = vunpack.c.h.s8.bf16 %v517_v22  ;;  %v524_v22 = vld [vmem:[#allocation5 + $0x368] sm:$0xff] }
 0x10f   :  { %1596 = vmatprep.subr.bf16.mxu1 %v926_v30  ;;  %v973_v30 = vunpack.c.h.s8.bf16 %v533_v23  ;;  %v540_v23 = vld [vmem:[#allocation5 + $0x3e8] sm:$0xff] }
 0x111   :  { %1556 = vmatpush2.bf16.msra.mxu0 %v893_v36  ;;  %v516_v36 = vld [vmem:[#allocation5 + $0x328] sm:$0xff] }
 0x112   :  { %1597 = vmatpush2.bf16.msra.mxu1 %v925_v37  ;;  %1557 = vmatprep.subr.bf16.mxu0 %v892_v38  ;;  %v532_v37 = vld [vmem:[#allocation5 + $0x3a8] sm:$0xff]  ;;  %v388_v38 = vpack.c.bf16 %v231_v24, %v231_v24  ;;  %v938_v34 = vunpack.c.h.s8.bf16 %v516_v36  ;;  %v936_v48 = vunpack.c.l.s8.bf16 %v516_v36  ;;  %v955_v24 = vunpack.c.l.s8.bf16 %v525_v14 }
 0x113   :  { %1598 = vmatprep.subr.bf16.mxu1 %v924_v39  ;;  %v390_v39 = vpack.c.bf16 %v232_v25, %v232_v25  ;;  %v970_v42 = vunpack.c.h.s8.bf16 %v532_v37  ;;  %v968_v49 = vunpack.c.l.s8.bf16 %v532_v37  ;;  %v987_v25 = vunpack.c.l.s8.bf16 %v541_v15 }
 0x114   :  { %v952_v36 = vunpack.c.l.s8.bf16 %v524_v22  ;;  %v984_v37 = vunpack.c.l.s8.bf16 %v540_v23 }
 0x115   :  { %1558 = vmatpush2.bf16.msra.mxu0 %v891_v43  ;;  %v515_v43 = vld [vmem:[#allocation5 + $0x320] sm:$0xff] }
 0x116   :  { %1599 = vmatpush2.bf16.msra.mxu1 %v923_v44  ;;  %1559 = vmatprep.subr.bf16.mxu0 %v890_v45  ;;  %v531_v44 = vld [vmem:[#allocation5 + $0x3a0] sm:$0xff]  ;;  %v937_v45 = vunpack.c.h.s8.bf16 %v515_v43 }
 0x117   :  { %1600 = vmatprep.subr.bf16.mxu1 %v922_v47  ;;  %v969_v47 = vunpack.c.h.s8.bf16 %v531_v44 }
 0x119   :  { %1560 = vmatpush2.bf16.msra.mxu0 %v889_v50  ;;  %v514_v50 = vld [vmem:[#allocation5 + $0x318] sm:$0xff] }
 0x11a   :  { %1601 = vmatpush2.bf16.msra.mxu1 %v921_v51  ;;  %1561 = vmatprep.subr.bf16.mxu0 %v888_v54  ;;  %v530_v51 = vld [vmem:[#allocation5 + $0x398] sm:$0xff]  ;;  %v935_v54 = vunpack.c.l.s8.bf16 %v515_v43  ;;  %v934_v56 = vunpack.c.h.s8.bf16 %v514_v50  ;;  %v932_v60 = vunpack.c.l.s8.bf16 %v514_v50  ;;  %v521_v43 = vld [vmem:[#allocation5 + $0x350] sm:$0xff]  ;;  %v520_v50 = vld [vmem:[#allocation5 + $0x348] sm:$0xff] }
 0x11b   :  { %1602 = vmatprep.subr.bf16.mxu1 %v920_v55  ;;  %v967_v55 = vunpack.c.l.s8.bf16 %v531_v44  ;;  %v966_v57 = vunpack.c.h.s8.bf16 %v530_v51  ;;  %v964_v61 = vunpack.c.l.s8.bf16 %v530_v51  ;;  %v537_v44 = vld [vmem:[#allocation5 + $0x3d0] sm:$0xff]  ;;  %v536_v51 = vld [vmem:[#allocation5 + $0x3c8] sm:$0xff] }
 0x11d   :  { %1562 = vmatpush2.bf16.msra.mxu0 %v887_v52  ;;  %v513_v52 = vld [vmem:[#allocation5 + $0x310] sm:$0xff] }
 0x11e   :  { %1603 = vmatpush2.bf16.msra.mxu1 %v919_v58  ;;  %1563 = vmatprep.subr.bf16.mxu0 %v886_v53  ;;  %v529_v58 = vld [vmem:[#allocation5 + $0x390] sm:$0xff]  ;;  %v933_v53 = vunpack.c.h.s8.bf16 %v513_v52 }
 0x11f   :  { %1604 = vmatprep.subr.bf16.mxu1 %v918_v59  ;;  %v965_v59 = vunpack.c.h.s8.bf16 %v529_v58 }
 0x121   :  { %1564 = vmatpush2.bf16.msra.mxu0 %v885_v62  ;;  %v512_v62 = vld [vmem:[#allocation5 + $0x308] sm:$0xff] }
 0x122   :  { %1605 = vmatpush2.bf16.msra.mxu1 %v917_v63  ;;  %1565 = vmatprep.subr.bf16.mxu0 %v884_v0  ;;  %v528_v63 = vld [vmem:[#allocation5 + $0x388] sm:$0xff]  ;;  %v931_v0 = vunpack.c.l.s8.bf16 %v513_v52  ;;  %v930_v2 = vunpack.c.h.s8.bf16 %v512_v62  ;;  %v978_v52 = vunpack.c.h.s8.bf16 %v536_v51 }
 0x123   :  { %1606 = vmatprep.subr.bf16.mxu1 %v916_v1  ;;  %v963_v1 = vunpack.c.l.s8.bf16 %v529_v58  ;;  %v962_v3 = vunpack.c.h.s8.bf16 %v528_v63  ;;  %v960_v8 = vunpack.c.l.s8.bf16 %v528_v63  ;;  %v519_v58 = vld [vmem:[#allocation5 + $0x340] sm:$0xff]  ;;  %v976_v63 = vunpack.c.l.s8.bf16 %v536_v51  ;;  %v561_v51 = vld [vmem:[#allocation5 + $0x490] sm:$0xff] }
 0x125   :  { %1566 = vmatpush2.bf16.msra.mxu0 %v883_v5  ;;  %v527_v5 = vld [vmem:[#allocation5 + $0x380] sm:$0xff] }
 0x126   :  { %1607 = vmatpush2.bf16.msra.mxu1 %v915_v6  ;;  %1567 = vmatprep.subr.bf16.mxu0 %v882_v7  ;;  %v929_v6 = vunpack.c.h.s8.bf16 %v511_v4  ;;  %v961_v7 = vunpack.c.h.s8.bf16 %v527_v5 }
 0x127   :  { %1608 = vmatprep.subr.bf16.mxu1 %v914_v41  ;;  %v928_v41 = vunpack.c.l.s8.bf16 %v512_v62  ;;  %v944_v62 = vunpack.c.l.s8.bf16 %v520_v50 }
 0x129   :  { %1568 = vmatpush2.bf16.msra.mxu0 %v881_v10  ;;  %v927_v10 = vunpack.c.l.s8.bf16 %v511_v4  ;;  %v943_v4 = vunpack.c.l.s8.bf16 %v519_v58 }
 0x12a   :  { %1609 = vmatpush2.bf16.msra.mxu1 %v913_v11  ;;  %1569 = vmatprep.subr.bf16.mxu0 %v880_v12  ;;  %v959_v11 = vunpack.c.l.s8.bf16 %v527_v5  ;;  %v958_v12 = vunpack.c.h.s8.bf16 %v526_v46 }
 0x12b   :  { %1610 = vmatprep.subr.bf16.mxu1 %v912_v13  ;;  %v990_v13 = vunpack.c.h.s8.bf16 %v542_v9 }
 0x12d   :  { %1570 = vmatpush2.bf16.msra.mxu0 %v879_v18  ;;  %v957_v18 = vunpack.c.h.s8.bf16 %v525_v14 }
 0x12e   :  { %1611 = vmatpush2.bf16.msra.mxu1 %v911_v19  ;;  %1621 = vmatprep.subr.bf16.mxu0 %v942_v20  ;;  %v989_v19 = vunpack.c.h.s8.bf16 %v541_v15  ;;  %v956_v20 = vunpack.c.l.s8.bf16 %v526_v46 }
 0x12f   :  { %1662 = vmatprep.subr.bf16.mxu1 %v974_v21  ;;  %v988_v21 = vunpack.c.l.s8.bf16 %v542_v9 }
 0x130   :  { %1572 = vmatmul.mubr.bf16.vlgmr.msra.gmra.mxu0 %v383_v27  ;;  %v954_v27 = vunpack.c.h.s8.bf16 %v524_v22 }
 0x131   :  { %1613 = vmatmul.mubr.bf16.vlgmr.msra.gmra.mxu1 %v385_v28  ;;  %1622 = vmatpush1.bf16.msra.mxu0 %v941_v29  ;;  %v986_v28 = vunpack.c.h.s8.bf16 %v540_v23  ;;  %v523_v29 = vld [vmem:[#allocation5 + $0x360] sm:$0xff] }
 0x132   :  { %1663 = vmatpush1.bf16.msra.mxu1 %v973_v30  ;;  %1623 = vmatprep.subr.bf16.mxu0 %v940_v31  ;;  %v539_v30 = vld [vmem:[#allocation5 + $0x3e0] sm:$0xff]  ;;  %v953_v31 = vunpack.c.h.s8.bf16 %v523_v29 }
 0x133   :  { %1664 = vmatprep.subr.bf16.mxu1 %v972_v32  ;;  %1653 = vmatprep.mubr.bf16.mxu0 %v388_v38  ;;  %v985_v32 = vunpack.c.h.s8.bf16 %v539_v30  ;;  %v522_v38 = vld [vmem:[#allocation5 + $0x358] sm:$0xff] }
 0x134   :  { %1694 = vmatprep.mubr.bf16.mxu1 %v390_v39  ;;  %v538_v39 = vld [vmem:[#allocation5 + $0x3d8] sm:$0xff] }
 0x135   :  { %1624 = vmatpush1.bf16.msra.mxu0 %v939_v33  ;;  %v951_v33 = vunpack.c.l.s8.bf16 %v523_v29 }
 0x136   :  { %1665 = vmatpush1.bf16.msra.mxu1 %v971_v40  ;;  %1625 = vmatprep.subr.bf16.mxu0 %v938_v34  ;;  %v983_v40 = vunpack.c.l.s8.bf16 %v539_v30  ;;  %v950_v34 = vunpack.c.h.s8.bf16 %v522_v38  ;;  %v547_v30 = vld [vmem:[#allocation5 + $0x420] sm:$0xff] }
 0x137   :  { %1666 = vmatprep.subr.bf16.mxu1 %v970_v42  ;;  %v982_v42 = vunpack.c.h.s8.bf16 %v538_v39 }
 0x139   :  { %1626 = vmatpush1.bf16.msra.mxu0 %v937_v45  ;;  %v949_v45 = vunpack.c.h.s8.bf16 %v521_v43 }
 0x13a   :  { %1667 = vmatpush1.bf16.msra.mxu1 %v969_v47  ;;  %1627 = vmatprep.subr.bf16.mxu0 %v936_v48  ;;  %v981_v47 = vunpack.c.h.s8.bf16 %v537_v44  ;;  %v948_v48 = vunpack.c.l.s8.bf16 %v522_v38  ;;  %v1001_v38 = vunpack.c.h.s8.bf16 %v547_v30 }
 0x13b   :  { %1668 = vmatprep.subr.bf16.mxu1 %v968_v49  ;;  %v980_v49 = vunpack.c.l.s8.bf16 %v538_v39 }
 0x13d   :  { %1628 = vmatpush1.bf16.msra.mxu0 %v935_v54  ;;  %v148_v54 = vld [vmem:[#allocation2 + $0x20] sm:$0xff] }
 0x13e   :  { %1669 = vmatpush1.bf16.msra.mxu1 %v967_v55  ;;  %1629 = vmatprep.subr.bf16.mxu0 %v934_v56  ;;  %v947_v55 = vunpack.c.l.s8.bf16 %v521_v43  ;;  %v979_v56 = vunpack.c.l.s8.bf16 %v537_v44  ;;  %v546_v43 = vld [vmem:[#allocation5 + $0x418] sm:$0xff] }
 0x13f   :  { %1670 = vmatprep.subr.bf16.mxu1 %v966_v57  ;;  %v946_v57 = vunpack.c.h.s8.bf16 %v520_v50  ;;  %v562_v44 = vld [vmem:[#allocation5 + $0x498] sm:$0xff]  ;;  %v545_v50 = vld [vmem:[#allocation5 + $0x410] sm:$0xff] }
 0x141   :  { %1630 = vmatpush1.bf16.msra.mxu0 %v933_v53  ;;  %v535_v53 = vld [vmem:[#allocation5 + $0x3c0] sm:$0xff] }
 0x142   :  { %1671 = vmatpush1.bf16.msra.mxu1 %v965_v59  ;;  %1631 = vmatprep.subr.bf16.mxu0 %v932_v60  ;;  %v233_v59 = vcombine.high %v148_v54, %v148_v54  ;;  %v945_v60 = vunpack.c.h.s8.bf16 %v519_v58  ;;  %v975_v5 = vunpack.c.l.s8.bf16 %v535_v53  ;;  %v560_v58 = vld [vmem:[#allocation5 + $0x488] sm:$0xff] }
 0x143   :  { %1672 = vmatprep.subr.bf16.mxu1 %v964_v61  ;;  %v977_v61 = vunpack.c.h.s8.bf16 %v535_v53  ;;  %v995_v53 = vunpack.c.l.s8.bf16 %v545_v50 }
 0x145   :  { %1632 = vmatpush1.bf16.msra.mxu0 %v931_v0  ;;  %v550_v0 = vld [vmem:[#allocation5 + $0x438] sm:$0xff] }
 0x146   :  { %1673 = vmatpush1.bf16.msra.mxu1 %v963_v1  ;;  %1633 = vmatprep.subr.bf16.mxu0 %v930_v2  ;;  %v566_v1 = vld [vmem:[#allocation5 + $0x4b8] sm:$0xff]  ;;  %v3078_v2 = vrot.slane %v148_v54, %v3023_v35  ;;  %v1004_v14 = vunpack.c.l.s8.bf16 %v550_v0  ;;  %v997_v54 = vunpack.c.h.s8.bf16 %v545_v50 }
 0x147   :  { %1674 = vmatprep.subr.bf16.mxu1 %v962_v3  ;;  %v3081_v3 = vrot.slane %v233_v59, %v3023_v35  ;;  %v1036_v15 = vunpack.c.l.s8.bf16 %v566_v1  ;;  %v1027_v59 = vunpack.c.l.s8.bf16 %v561_v51 }
 0x148   :  { %v248_v46 = vcombine.high %v3078_v2, %v3078_v2 }
 0x149   :  { %1634 = vmatpush1.bf16.msra.mxu0 %v929_v6  ;;  %v1006_v6 = vunpack.c.h.s8.bf16 %v550_v0  ;;  %v249_v9 = vcombine.high %v3081_v3, %v3081_v3 }
 0x14a   :  { %1675 = vmatpush1.bf16.msra.mxu1 %v961_v7  ;;  %1635 = vmatprep.subr.bf16.mxu0 %v928_v41  ;;  %v1038_v7 = vunpack.c.h.s8.bf16 %v566_v1  ;;  %v549_v41 = vld [vmem:[#allocation5 + $0x430] sm:$0xff] }
 0x14b   :  { %1676 = vmatprep.subr.bf16.mxu1 %v960_v8  ;;  %v565_v8 = vld [vmem:[#allocation5 + $0x4b0] sm:$0xff] }
 0x14d   :  { %1636 = vmatpush1.bf16.msra.mxu0 %v927_v10  ;;  %v387_v10 = vpack.c.bf16 %v3064_v16, %v3064_v16 }
 0x14e   :  { %1677 = vmatpush1.bf16.msra.mxu1 %v959_v11  ;;  %1637 = vmatprep.subr.bf16.mxu0 %v958_v12  ;;  %v389_v11 = vpack.c.bf16 %v3067_v17, %v3067_v17  ;;  %v1005_v12 = vunpack.c.h.s8.bf16 %v549_v41  ;;  %v1003_v17 = vunpack.c.l.s8.bf16 %v549_v41 }
 0x14f   :  { %1678 = vmatprep.subr.bf16.mxu1 %v990_v13  ;;  %v1037_v13 = vunpack.c.h.s8.bf16 %v565_v8 }
 0x151   :  { %1638 = vmatpush2.bf16.msra.mxu0 %v957_v18  ;;  %v548_v18 = vld [vmem:[#allocation5 + $0x428] sm:$0xff] }
 0x152   :  { %1679 = vmatpush2.bf16.msra.mxu1 %v989_v19  ;;  %1639 = vmatprep.subr.bf16.mxu0 %v956_v20  ;;  %v564_v19 = vld [vmem:[#allocation5 + $0x4a8] sm:$0xff]  ;;  %v392_v20 = vpack.c.bf16 %v248_v46, %v248_v46 }
 0x153   :  { %1680 = vmatprep.subr.bf16.mxu1 %v988_v21  ;;  %v394_v21 = vpack.c.bf16 %v249_v9, %v249_v9  ;;  %v1034_v29 = vunpack.c.h.s8.bf16 %v564_v19 }
 0x155   :  { %1640 = vmatpush2.bf16.msra.mxu0 %v955_v24  ;;  %v1035_v24 = vunpack.c.l.s8.bf16 %v565_v8 }
 0x156   :  { %1681 = vmatpush2.bf16.msra.mxu1 %v987_v25  ;;  %1641 = vmatprep.subr.bf16.mxu0 %v954_v27 }
 0x157   :  { %1682 = vmatprep.subr.bf16.mxu1 %v986_v28  ;;  %v1002_v28 = vunpack.c.h.s8.bf16 %v548_v18 }
 0x159   :  { %1642 = vmatpush2.bf16.msra.mxu0 %v953_v31  ;;  %v563_v31 = vld [vmem:[#allocation5 + $0x4a0] sm:$0xff] }
 0x15a   :  { %1683 = vmatpush2.bf16.msra.mxu1 %v985_v32  ;;  %1643 = vmatprep.subr.bf16.mxu0 %v952_v36  ;;  %v1033_v39 = vunpack.c.h.s8.bf16 %v563_v31 }
 0x15b   :  { %1684 = vmatprep.subr.bf16.mxu1 %v984_v37 }
 0x15d   :  { %1644 = vmatpush2.bf16.msra.mxu0 %v951_v33 }
 0x15e   :  { %1685 = vmatpush2.bf16.msra.mxu1 %v983_v40  ;;  %1645 = vmatprep.subr.bf16.mxu0 %v950_v34  ;;  %v1000_v34 = vunpack.c.l.s8.bf16 %v548_v18  ;;  %v556_v18 = vld [vmem:[#allocation5 + $0x468] sm:$0xff] }
 0x15f   :  { %1686 = vmatprep.subr.bf16.mxu1 %v982_v42  ;;  %v1032_v42 = vunpack.c.l.s8.bf16 %v564_v19  ;;  %v572_v19 = vld [vmem:[#allocation5 + $0x4e8] sm:$0xff] }
 0x161   :  { %1646 = vmatpush2.bf16.msra.mxu0 %v949_v45  ;;  %v999_v45 = vunpack.c.l.s8.bf16 %v547_v30  ;;  %v554_v30 = vld [vmem:[#allocation5 + $0x458] sm:$0xff] }
 0x162   :  { %1687 = vmatpush2.bf16.msra.mxu1 %v981_v47  ;;  %1647 = vmatprep.subr.bf16.mxu0 %v948_v48  ;;  %v1031_v47 = vunpack.c.l.s8.bf16 %v563_v31  ;;  %v998_v48 = vunpack.c.h.s8.bf16 %v546_v43  ;;  %v570_v31 = vld [vmem:[#allocation5 + $0x4d8] sm:$0xff] }
 0x163   :  { %1688 = vmatprep.subr.bf16.mxu1 %v980_v49  ;;  %v1030_v49 = vunpack.c.h.s8.bf16 %v562_v44 }
 0x165   :  { %1648 = vmatpush2.bf16.msra.mxu0 %v947_v55  ;;  %v1029_v55 = vunpack.c.h.s8.bf16 %v561_v51 }
 0x166   :  { %1689 = vmatpush2.bf16.msra.mxu1 %v979_v56  ;;  %1649 = vmatprep.subr.bf16.mxu0 %v946_v57  ;;  %v996_v56 = vunpack.c.l.s8.bf16 %v546_v43  ;;  %v1028_v57 = vunpack.c.l.s8.bf16 %v562_v44  ;;  %v1012_v43 = vunpack.c.l.s8.bf16 %v554_v30  ;;  %v1044_v44 = vunpack.c.l.s8.bf16 %v570_v31 }
 0x167   :  { %1690 = vmatprep.subr.bf16.mxu1 %v978_v52  ;;  %v544_v52 = vld [vmem:[#allocation5 + $0x408] sm:$0xff] }
 0x169   :  { %1650 = vmatpush2.bf16.msra.mxu0 %v945_v60  ;;  %v994_v60 = vunpack.c.h.s8.bf16 %v544_v52 }
 0x16a   :  { %1691 = vmatpush2.bf16.msra.mxu1 %v977_v61  ;;  %1651 = vmatprep.subr.bf16.mxu0 %v944_v62  ;;  %v1026_v61 = vunpack.c.h.s8.bf16 %v560_v58  ;;  %v543_v62 = vld [vmem:[#allocation5 + $0x400] sm:$0xff] }
 0x16b   :  { %1692 = vmatprep.subr.bf16.mxu1 %v976_v63  ;;  %v559_v63 = vld [vmem:[#allocation5 + $0x480] sm:$0xff]  ;;  %v993_v0 = vunpack.c.h.s8.bf16 %v543_v62  ;;  %v991_v41 = vunpack.c.l.s8.bf16 %v543_v62 }
 0x16c   :  { %v1025_v1 = vunpack.c.h.s8.bf16 %v559_v63  ;;  %v1023_v8 = vunpack.c.l.s8.bf16 %v559_v63 }
 0x16d   :  { %1652 = vmatpush2.bf16.msra.mxu0 %v943_v4  ;;  %v992_v4 = vunpack.c.l.s8.bf16 %v544_v52 }
 0x16e   :  { %1693 = vmatpush2.bf16.msra.mxu1 %v975_v5  ;;  %1703 = vmatprep.subr.bf16.mxu0 %v1006_v6  ;;  %v1024_v5 = vunpack.c.l.s8.bf16 %v560_v58  ;;  %v558_v6 = vld [vmem:[#allocation5 + $0x478] sm:$0xff] }
 0x16f   :  { %1744 = vmatprep.subr.bf16.mxu1 %v1038_v7  ;;  %v574_v7 = vld [vmem:[#allocation5 + $0x4f8] sm:$0xff]  ;;  %v1022_v46 = vunpack.c.h.s8.bf16 %v558_v6 }
 0x170   :  { %v1409_v22 = vpop.f32.mrf.mxu0  ;;  %1654 = vmatmul.mubr.bf16.vlgmr.msra.gmra.mxu0 %v387_v10  ;;  %v1054_v9 = vunpack.c.h.s8.bf16 %v574_v7  ;;  %v557_v10 = vld [vmem:[#allocation5 + $0x470] sm:$0xff] }
 0x171   :  { %v1450_v23 = vpop.f32.mrf.mxu1  ;;  %1695 = vmatmul.mubr.bf16.vlgmr.msra.gmra.mxu1 %v389_v11  ;;  %1704 = vmatpush1.bf16.msra.mxu0 %v1005_v12  ;;  %v573_v11 = vld [vmem:[#allocation5 + $0x4f0] sm:$0xff]  ;;  %v1021_v12 = vunpack.c.h.s8.bf16 %v557_v10 }
 0x172   :  { %v3091_v16 = vadd.f32 %v1450_v23, %v1409_v22  ;;  %1745 = vmatpush1.bf16.msra.mxu1 %v1037_v13  ;;  %v1411_v25 = vpop.f32.mrf.mxu0  ;;  %1705 = vmatprep.subr.bf16.mxu0 %v1004_v14  ;;  %v1053_v13 = vunpack.c.h.s8.bf16 %v573_v11  ;;  %v1020_v14 = vunpack.c.l.s8.bf16 %v558_v6  ;;  %v1018_v22 = vunpack.c.h.s8.bf16 %v556_v18  ;;  %v581_v6 = vld [vmem:[#allocation5 + $0x530] sm:$0xff] }
 0x173   :  { %v1452_v27 = vpop.f32.mrf.mxu1  ;;  %1746 = vmatprep.subr.bf16.mxu1 %v1036_v15  ;;  %1735 = vmatprep.mubr.bf16.mxu0 %v392_v20  ;;  %v1052_v15 = vunpack.c.l.s8.bf16 %v574_v7  ;;  %v1019_v20 = vunpack.c.l.s8.bf16 %v557_v10  ;;  %v1050_v23 = vunpack.c.h.s8.bf16 %v572_v19  ;;  %v597_v7 = vld [vmem:[#allocation5 + $0x5b0] sm:$0xff]  ;;  %v1069_v10 = vunpack.c.h.s8.bf16 %v581_v6 }
 0x174   :  { %v3093_v32 = vadd.f32 %v1452_v27, %v1411_v25  ;;  %1776 = vmatprep.mubr.bf16.mxu1 %v394_v21  ;;  %v1413_v36 = vpop.f32.mrf.mxu0  ;;  %v1051_v21 = vunpack.c.l.s8.bf16 %v573_v11  ;;  %v1101_v11 = vunpack.c.h.s8.bf16 %v597_v7 }
 0x175   :  { %v1454_v37 = vpop.f32.mrf.mxu1  ;;  %1706 = vmatpush1.bf16.msra.mxu0 %v1003_v17  ;;  %v555_v17 = vld [vmem:[#allocation5 + $0x460] sm:$0xff] }
 0x176   :  { %1747 = vmatpush1.bf16.msra.mxu1 %v1035_v24  ;;  %v1414_v33 = vpop.f32.mrf.mxu0  ;;  %1707 = vmatprep.subr.bf16.mxu0 %v1002_v28  ;;  %v571_v24 = vld [vmem:[#allocation5 + $0x4e0] sm:$0xff]  ;;  %v1017_v25 = vunpack.c.h.s8.bf16 %v555_v17  ;;  %v1016_v28 = vunpack.c.l.s8.bf16 %v556_v18  ;;  %v1015_v36 = vunpack.c.l.s8.bf16 %v555_v17 }
 0x177   :  { %v1455_v40 = vpop.f32.mrf.mxu1  ;;  %1748 = vmatprep.subr.bf16.mxu1 %v1034_v29  ;;  %v1049_v27 = vunpack.c.h.s8.bf16 %v571_v24  ;;  %v1048_v29 = vunpack.c.l.s8.bf16 %v572_v19  ;;  %v1047_v37 = vunpack.c.l.s8.bf16 %v571_v24  ;;  %v553_v33 = vld [vmem:[#allocation5 + $0x450] sm:$0xff] }
 0x178   :  { %v569_v40 = vld [vmem:[#allocation5 + $0x4d0] sm:$0xff] }
 0x179   :  { %1708 = vmatpush1.bf16.msra.mxu0 %v1001_v38  ;;  %v1014_v38 = vunpack.c.h.s8.bf16 %v554_v30  ;;  %v1043_v50 = vunpack.c.l.s8.bf16 %v569_v40 }
 0x17a   :  { %1749 = vmatpush1.bf16.msra.mxu1 %v1033_v39  ;;  %1709 = vmatprep.subr.bf16.mxu0 %v1000_v34  ;;  %v1046_v39 = vunpack.c.h.s8.bf16 %v570_v31  ;;  %v1013_v34 = vunpack.c.h.s8.bf16 %v553_v33 }
 0x17b   :  { %1750 = vmatprep.subr.bf16.mxu1 %v1032_v42  ;;  %v1045_v42 = vunpack.c.h.s8.bf16 %v569_v40 }
 0x17d   :  { %1710 = vmatpush1.bf16.msra.mxu0 %v999_v45  ;;  %v552_v45 = vld [vmem:[#allocation5 + $0x448] sm:$0xff] }
 0x17e   :  { %1751 = vmatpush1.bf16.msra.mxu1 %v1031_v47  ;;  %1711 = vmatprep.subr.bf16.mxu0 %v998_v48  ;;  %v568_v47 = vld [vmem:[#allocation5 + $0x4c8] sm:$0xff]  ;;  %v149_v48 = vld [vmem:[#allocation2 + $0x28] sm:$0xff]  ;;  %v1010_v51 = vunpack.c.h.s8.bf16 %v552_v45 }
 0x17f   :  { %1752 = vmatprep.subr.bf16.mxu1 %v1030_v49  ;;  %v1011_v49 = vunpack.c.l.s8.bf16 %v553_v33  ;;  %v3096_v62 = vrot.slane %v149_v48, %v3023_v35 }
 0x181   :  { %1712 = vmatpush1.bf16.msra.mxu0 %v997_v54  ;;  %v1042_v54 = vunpack.c.h.s8.bf16 %v568_v47 }
 0x182   :  { %1753 = vmatpush1.bf16.msra.mxu1 %v1029_v55  ;;  %1713 = vmatprep.subr.bf16.mxu0 %v996_v56  ;;  %v551_v55 = vld [vmem:[#allocation5 + $0x440] sm:$0xff] }
 0x183   :  { %1754 = vmatprep.subr.bf16.mxu1 %v1028_v57  ;;  %v567_v56 = vld [vmem:[#allocation5 + $0x4c0] sm:$0xff]  ;;  %v250_v57 = vcombine.high %v149_v48, %v149_v48  ;;  %v1009_v52 = vunpack.c.h.s8.bf16 %v551_v55  ;;  %v577_v48 = vld [vmem:[#allocation5 + $0x510] sm:$0xff] }
 0x184   :  { %v1041_v58 = vunpack.c.h.s8.bf16 %v567_v56 }
 0x185   :  { %1714 = vmatpush1.bf16.msra.mxu0 %v995_v53  ;;  %v1008_v53 = vunpack.c.l.s8.bf16 %v552_v45  ;;  %v3099_v63 = vrot.slane %v250_v57, %v3023_v35  ;;  %v592_v57 = vld [vmem:[#allocation5 + $0x588] sm:$0xff] }
 0x186   :  { %1755 = vmatpush1.bf16.msra.mxu1 %v1027_v59  ;;  %1715 = vmatprep.subr.bf16.mxu0 %v994_v60  ;;  %v1040_v59 = vunpack.c.l.s8.bf16 %v568_v47  ;;  %v582_v60 = vld [vmem:[#allocation5 + $0x538] sm:$0xff] }
 0x187   :  { %1756 = vmatprep.subr.bf16.mxu1 %v1026_v61  ;;  %v598_v61 = vld [vmem:[#allocation5 + $0x5b8] sm:$0xff] }
 0x189   :  { %1716 = vmatpush1.bf16.msra.mxu0 %v993_v0  ;;  %v1007_v0 = vunpack.c.l.s8.bf16 %v551_v55 }
 0x18a   :  { %1757 = vmatpush1.bf16.msra.mxu1 %v1025_v1  ;;  %1717 = vmatprep.subr.bf16.mxu0 %v992_v4  ;;  %v1039_v1 = vunpack.c.l.s8.bf16 %v567_v56  ;;  %v1070_v4 = vunpack.c.h.s8.bf16 %v582_v60  ;;  %v576_v56 = vld [vmem:[#allocation5 + $0x508] sm:$0xff] }
 0x18b   :  { %1758 = vmatprep.subr.bf16.mxu1 %v1024_v5  ;;  %v1102_v5 = vunpack.c.h.s8.bf16 %v598_v61 }
 0x18d   :  { %1718 = vmatpush1.bf16.msra.mxu0 %v991_v41  ;;  %v265_v41 = vcombine.high %v3096_v62, %v3096_v62 }
 0x18e   :  { %1759 = vmatpush1.bf16.msra.mxu1 %v1023_v8  ;;  %1719 = vmatprep.subr.bf16.mxu0 %v1022_v46  ;;  %v266_v8 = vcombine.high %v3099_v63, %v3099_v63  ;;  %v391_v46 = vpack.c.bf16 %v3078_v2, %v3078_v2 }
 0x18f   :  { %1760 = vmatprep.subr.bf16.mxu1 %v1054_v9  ;;  %v393_v9 = vpack.c.bf16 %v3081_v3, %v3081_v3  ;;  %v396_v18 = vpack.c.bf16 %v265_v41, %v265_v41  ;;  %v1067_v3 = vunpack.c.l.s8.bf16 %v581_v6  ;;  %v590_v6 = vld [vmem:[#allocation5 + $0x578] sm:$0xff] }
 0x190   :  { %v398_v19 = vpack.c.bf16 %v266_v8, %v266_v8 }
 0x191   :  { %1720 = vmatpush2.bf16.msra.mxu0 %v1021_v12  ;;  %v1068_v12 = vunpack.c.l.s8.bf16 %v582_v60  ;;  %v575_v60 = vld [vmem:[#allocation5 + $0x500] sm:$0xff] }
 0x192   :  { %1761 = vmatpush2.bf16.msra.mxu1 %v1053_v13  ;;  %1721 = vmatprep.subr.bf16.mxu0 %v1020_v14  ;;  %v1100_v13 = vunpack.c.l.s8.bf16 %v598_v61  ;;  %v580_v14 = vld [vmem:[#allocation5 + $0x528] sm:$0xff]  ;;  %v591_v61 = vld [vmem:[#allocation5 + $0x580] sm:$0xff]  ;;  %v1055_v41 = vunpack.c.l.s8.bf16 %v575_v60 }
 0x193   :  { %1762 = vmatprep.subr.bf16.mxu1 %v1052_v15  ;;  %v596_v15 = vld [vmem:[#allocation5 + $0x5a8] sm:$0xff]  ;;  %v1066_v24 = vunpack.c.h.s8.bf16 %v580_v14  ;;  %v1064_v40 = vunpack.c.l.s8.bf16 %v580_v14  ;;  %v1087_v8 = vunpack.c.l.s8.bf16 %v591_v61  ;;  %v1084_v14 = vunpack.c.l.s8.bf16 %v590_v6 }
 0x195   :  { %1722 = vmatpush2.bf16.msra.mxu0 %v1019_v20 }
 0x196   :  { %1763 = vmatpush2.bf16.msra.mxu1 %v1051_v21  ;;  %1723 = vmatprep.subr.bf16.mxu0 %v1018_v22  ;;  %v1099_v22 = vunpack.c.l.s8.bf16 %v597_v7  ;;  %v606_v7 = vld [vmem:[#allocation5 + $0x5f8] sm:$0xff] }
 0x197   :  { %1764 = vmatprep.subr.bf16.mxu1 %v1050_v23 }
 0x199   :  { %1724 = vmatpush2.bf16.msra.mxu0 %v1017_v25  ;;  %v1098_v25 = vunpack.c.h.s8.bf16 %v596_v15 }
 0x19a   :  { %1765 = vmatpush2.bf16.msra.mxu1 %v1049_v27  ;;  %1725 = vmatprep.subr.bf16.mxu0 %v1016_v28  ;;  %v579_v27 = vld [vmem:[#allocation5 + $0x520] sm:$0xff] }
 0x19b   :  { %1766 = vmatprep.subr.bf16.mxu1 %v1048_v29  ;;  %v595_v28 = vld [vmem:[#allocation5 + $0x5a0] sm:$0xff] }
 0x19d   :  { %1726 = vmatpush2.bf16.msra.mxu0 %v1015_v36 }
 0x19e   :  { %1767 = vmatpush2.bf16.msra.mxu1 %v1047_v37  ;;  %1727 = vmatprep.subr.bf16.mxu0 %v1014_v38  ;;  %v1065_v37 = vunpack.c.h.s8.bf16 %v579_v27  ;;  %v1097_v38 = vunpack.c.h.s8.bf16 %v595_v28 }
 0x19f   :  { %1768 = vmatprep.subr.bf16.mxu1 %v1046_v39 }
 0x1a1   :  { %1728 = vmatpush2.bf16.msra.mxu0 %v1013_v34  ;;  %v1096_v34 = vunpack.c.l.s8.bf16 %v596_v15  ;;  %v1116_v15 = vunpack.c.l.s8.bf16 %v606_v7 }
 0x1a2   :  { %1769 = vmatpush2.bf16.msra.mxu1 %v1045_v42  ;;  %1729 = vmatprep.subr.bf16.mxu0 %v1012_v43  ;;  %v578_v42 = vld [vmem:[#allocation5 + $0x518] sm:$0xff] }
 0x1a3   :  { %1770 = vmatprep.subr.bf16.mxu1 %v1044_v44  ;;  %v594_v43 = vld [vmem:[#allocation5 + $0x598] sm:$0xff]  ;;  %v1095_v44 = vunpack.c.l.s8.bf16 %v595_v28  ;;  %v1062_v45 = vunpack.c.h.s8.bf16 %v578_v42 }
 0x1a4   :  { %v1094_v47 = vunpack.c.h.s8.bf16 %v594_v43  ;;  %v1092_v55 = vunpack.c.l.s8.bf16 %v594_v43  ;;  %v586_v28 = vld [vmem:[#allocation5 + $0x558] sm:$0xff] }
 0x1a5   :  { %1730 = vmatpush2.bf16.msra.mxu0 %v1011_v49  ;;  %v593_v49 = vld [vmem:[#allocation5 + $0x590] sm:$0xff] }
 0x1a6   :  { %1771 = vmatpush2.bf16.msra.mxu1 %v1043_v50  ;;  %1731 = vmatprep.subr.bf16.mxu0 %v1010_v51  ;;  %v1061_v50 = vunpack.c.h.s8.bf16 %v577_v48  ;;  %v1093_v51 = vunpack.c.h.s8.bf16 %v593_v49 }
 0x1a7   :  { %1772 = vmatprep.subr.bf16.mxu1 %v1042_v54  ;;  %v1060_v54 = vunpack.c.l.s8.bf16 %v578_v42  ;;  %v1076_v42 = vunpack.c.l.s8.bf16 %v586_v28 }
 0x1a9   :  { %1732 = vmatpush2.bf16.msra.mxu0 %v1009_v52  ;;  %v1059_v52 = vunpack.c.l.s8.bf16 %v577_v48 }
 0x1aa   :  { %1773 = vmatpush2.bf16.msra.mxu1 %v1041_v58  ;;  %1733 = vmatprep.subr.bf16.mxu0 %v1008_v53  ;;  %v1091_v58 = vunpack.c.l.s8.bf16 %v593_v49  ;;  %v1058_v53 = vunpack.c.h.s8.bf16 %v576_v56 }
 0x1ab   :  { %1774 = vmatprep.subr.bf16.mxu1 %v1040_v59  ;;  %v1090_v59 = vunpack.c.h.s8.bf16 %v592_v57 }
 0x1ad   :  { %1734 = vmatpush2.bf16.msra.mxu0 %v1007_v0  ;;  %v1057_v0 = vunpack.c.h.s8.bf16 %v575_v60 }
 0x1ae   :  { %1775 = vmatpush2.bf16.msra.mxu1 %v1039_v1  ;;  %1785 = vmatprep.subr.bf16.mxu0 %v1070_v4  ;;  %v1089_v1 = vunpack.c.h.s8.bf16 %v591_v61  ;;  %v1056_v4 = vunpack.c.l.s8.bf16 %v576_v56 }
 0x1af   :  { %1826 = vmatprep.subr.bf16.mxu1 %v1102_v5  ;;  %v1088_v5 = vunpack.c.l.s8.bf16 %v592_v57 }
 0x1b0   :  { %v1491_v20 = vpop.f32.mrf.mxu0  ;;  %1736 = vmatmul.mubr.bf16.vlgmr.msra.gmra.mxu0 %v391_v46  ;;  %v1086_v46 = vunpack.c.h.s8.bf16 %v590_v6  ;;  %v613_v6 = vld [vmem:[#allocation5 + $0x630] sm:$0xff] }
 0x1b1   :  { %v1532_v21 = vpop.f32.mrf.mxu1  ;;  %1777 = vmatmul.mubr.bf16.vlgmr.msra.gmra.mxu1 %v393_v9  ;;  %v1492_v2 = vadd.f32 %v1491_v20, %v3091_v16  ;;  %1786 = vmatpush1.bf16.msra.mxu0 %v1069_v10  ;;  %v1118_v9 = vunpack.c.h.s8.bf16 %v606_v7  ;;  %v589_v10 = vld [vmem:[#allocation5 + $0x570] sm:$0xff] }
 0x1b2   :  { %1827 = vmatpush1.bf16.msra.mxu1 %v1101_v11  ;;  %v1493_v23 = vpop.f32.mrf.mxu0  ;;  %1787 = vmatprep.subr.bf16.mxu0 %v1068_v12  ;;  %v605_v11 = vld [vmem:[#allocation5 + $0x5f0] sm:$0xff]  ;;  %v1085_v12 = vunpack.c.h.s8.bf16 %v589_v10  ;;  %v1083_v20 = vunpack.c.l.s8.bf16 %v589_v10  ;;  %v1133_v10 = vunpack.c.h.s8.bf16 %v613_v6 }
 0x1b3   :  { %v1534_v17 = vpop.f32.mrf.mxu1  ;;  %1828 = vmatprep.subr.bf16.mxu1 %v1100_v13  ;;  %v3110_v29 = vadd.f32 %v1532_v21, %v1492_v2  ;;  %v1494_v30 = vadd.f32 %v1493_v23, %v3093_v32  ;;  %1817 = vmatprep.mubr.bf16.mxu0 %v396_v18  ;;  %v1063_v32 = vunpack.c.l.s8.bf16 %v579_v27  ;;  %v1117_v13 = vunpack.c.h.s8.bf16 %v605_v11  ;;  %v588_v18 = vld [vmem:[#allocation5 + $0x568] sm:$0xff]  ;;  %v603_v23 = vld [vmem:[#allocation5 + $0x5e0] sm:$0xff]  ;;  %v629_v7 = vld [vmem:[#allocation5 + $0x6b0] sm:$0xff] }
 0x1b4   :  { %1858 = vmatprep.mubr.bf16.mxu1 %v398_v19  ;;  %v1495_v31 = vpop.f32.mrf.mxu0  ;;  %v604_v19 = vld [vmem:[#allocation5 + $0x5e8] sm:$0xff]  ;;  %v1115_v21 = vunpack.c.l.s8.bf16 %v605_v11  ;;  %v1082_v2 = vunpack.c.h.s8.bf16 %v588_v18  ;;  %v1165_v11 = vunpack.c.h.s8.bf16 %v629_v7 }
 0x1b5   :  { %v1536_v16 = vpop.f32.mrf.mxu1  ;;  %v3113_v36 = vadd.f32 %v1534_v17, %v1494_v30  ;;  %1788 = vmatpush1.bf16.msra.mxu0 %v1067_v3  ;;  %v1114_v3 = vunpack.c.h.s8.bf16 %v604_v19  ;;  %v1112_v27 = vunpack.c.l.s8.bf16 %v604_v19  ;;  %v602_v30 = vld [vmem:[#allocation5 + $0x5d8] sm:$0xff] }
 0x1b6   :  { %1829 = vmatpush1.bf16.msra.mxu1 %v1099_v22  ;;  %v1496_v39 = vpop.f32.mrf.mxu0  ;;  %1789 = vmatprep.subr.bf16.mxu0 %v1066_v24  ;;  %v587_v22 = vld [vmem:[#allocation5 + $0x560] sm:$0xff]  ;;  %v1113_v24 = vunpack.c.h.s8.bf16 %v603_v23  ;;  %v1111_v16 = vunpack.c.l.s8.bf16 %v603_v23  ;;  %v1108_v43 = vunpack.c.l.s8.bf16 %v602_v30 }
 0x1b7   :  { %v1537_v33 = vpop.f32.mrf.mxu1  ;;  %1830 = vmatprep.subr.bf16.mxu1 %v1098_v25  ;;  %v1081_v17 = vunpack.c.h.s8.bf16 %v587_v22  ;;  %v1080_v25 = vunpack.c.l.s8.bf16 %v588_v18  ;;  %v1079_v31 = vunpack.c.l.s8.bf16 %v587_v22  ;;  %v585_v39 = vld [vmem:[#allocation5 + $0x550] sm:$0xff] }
 0x1b8   :  { %v601_v33 = vld [vmem:[#allocation5 + $0x5d0] sm:$0xff] }
 0x1b9   :  { %1790 = vmatpush1.bf16.msra.mxu0 %v1065_v37  ;;  %v1078_v37 = vunpack.c.h.s8.bf16 %v586_v28  ;;  %v1107_v48 = vunpack.c.l.s8.bf16 %v601_v33 }
 0x1ba   :  { %1831 = vmatpush1.bf16.msra.mxu1 %v1097_v38  ;;  %1791 = vmatprep.subr.bf16.mxu0 %v1064_v40  ;;  %v1110_v38 = vunpack.c.h.s8.bf16 %v602_v30  ;;  %v1077_v40 = vunpack.c.h.s8.bf16 %v585_v39 }
 0x1bb   :  { %1832 = vmatprep.subr.bf16.mxu1 %v1096_v34  ;;  %v1109_v34 = vunpack.c.h.s8.bf16 %v601_v33 }
 0x1bd   :  { %1792 = vmatpush1.bf16.msra.mxu0 %v1063_v32  ;;  %v584_v32 = vld [vmem:[#allocation5 + $0x548] sm:$0xff] }
 0x1be   :  { %1833 = vmatpush1.bf16.msra.mxu1 %v1095_v44  ;;  %1793 = vmatprep.subr.bf16.mxu0 %v1062_v45  ;;  %v600_v44 = vld [vmem:[#allocation5 + $0x5c8] sm:$0xff]  ;;  %v150_v45 = vld [vmem:[#allocation2 + $0x30] sm:$0xff]  ;;  %v1074_v49 = vunpack.c.h.s8.bf16 %v584_v32 }
 0x1bf   :  { %1834 = vmatprep.subr.bf16.mxu1 %v1094_v47  ;;  %v1075_v47 = vunpack.c.l.s8.bf16 %v585_v39  ;;  %v3116_v60 = vrot.slane %v150_v45, %v3023_v35 }
 0x1c1   :  { %1794 = vmatpush1.bf16.msra.mxu0 %v1061_v50  ;;  %v1106_v50 = vunpack.c.h.s8.bf16 %v600_v44 }
 0x1c2   :  { %1835 = vmatpush1.bf16.msra.mxu1 %v1093_v51  ;;  %1795 = vmatprep.subr.bf16.mxu0 %v1060_v54  ;;  %v583_v51 = vld [vmem:[#allocation5 + $0x540] sm:$0xff] }
 0x1c3   :  { %1836 = vmatprep.subr.bf16.mxu1 %v1092_v55  ;;  %v599_v54 = vld [vmem:[#allocation5 + $0x5c0] sm:$0xff]  ;;  %v267_v55 = vcombine.high %v150_v45, %v150_v45  ;;  %v1073_v56 = vunpack.c.h.s8.bf16 %v583_v51  ;;  %v609_v45 = vld [vmem:[#allocation5 + $0x610] sm:$0xff] }
 0x1c4   :  { %v1105_v57 = vunpack.c.h.s8.bf16 %v599_v54 }
 0x1c5   :  { %1796 = vmatpush1.bf16.msra.mxu0 %v1059_v52  ;;  %v1072_v52 = vunpack.c.l.s8.bf16 %v584_v32  ;;  %v3119_v61 = vrot.slane %v267_v55, %v3023_v35  ;;  %v624_v55 = vld [vmem:[#allocation5 + $0x688] sm:$0xff] }
 0x1c6   :  { %1837 = vmatpush1.bf16.msra.mxu1 %v1091_v58  ;;  %1797 = vmatprep.subr.bf16.mxu0 %v1058_v53  ;;  %v1104_v58 = vunpack.c.l.s8.bf16 %v600_v44  ;;  %v614_v53 = vld [vmem:[#allocation5 + $0x638] sm:$0xff] }
 0x1c7   :  { %1838 = vmatprep.subr.bf16.mxu1 %v1090_v59  ;;  %v630_v59 = vld [vmem:[#allocation5 + $0x6b8] sm:$0xff] }
 0x1c9   :  { %1798 = vmatpush1.bf16.msra.mxu0 %v1057_v0  ;;  %v1071_v0 = vunpack.c.l.s8.bf16 %v583_v51 }
 0x1ca   :  { %1839 = vmatpush1.bf16.msra.mxu1 %v1089_v1  ;;  %1799 = vmatprep.subr.bf16.mxu0 %v1056_v4  ;;  %v1103_v1 = vunpack.c.l.s8.bf16 %v599_v54  ;;  %v1134_v4 = vunpack.c.h.s8.bf16 %v614_v53  ;;  %v608_v54 = vld [vmem:[#allocation5 + $0x608] sm:$0xff] }
 0x1cb   :  { %1840 = vmatprep.subr.bf16.mxu1 %v1088_v5  ;;  %v1166_v5 = vunpack.c.h.s8.bf16 %v630_v59 }
 0x1cd   :  { %1800 = vmatpush1.bf16.msra.mxu0 %v1055_v41  ;;  %v282_v41 = vcombine.high %v3116_v60, %v3116_v60 }
 0x1ce   :  { %1841 = vmatpush1.bf16.msra.mxu1 %v1087_v8  ;;  %1801 = vmatprep.subr.bf16.mxu0 %v1086_v46  ;;  %v283_v8 = vcombine.high %v3119_v61, %v3119_v61  ;;  %v395_v46 = vpack.c.bf16 %v3096_v62, %v3096_v62 }
 0x1cf   :  { %1842 = vmatprep.subr.bf16.mxu1 %v1118_v9  ;;  %v397_v9 = vpack.c.bf16 %v3099_v63, %v3099_v63  ;;  %v400_v18 = vpack.c.bf16 %v282_v41, %v282_v41  ;;  %v1131_v63 = vunpack.c.l.s8.bf16 %v613_v6  ;;  %v622_v6 = vld [vmem:[#allocation5 + $0x678] sm:$0xff] }
 0x1d0   :  { %v402_v19 = vpack.c.bf16 %v283_v8, %v283_v8 }
 0x1d1   :  { %1802 = vmatpush2.bf16.msra.mxu0 %v1085_v12  ;;  %v1132_v12 = vunpack.c.l.s8.bf16 %v614_v53  ;;  %v607_v53 = vld [vmem:[#allocation5 + $0x600] sm:$0xff] }
 0x1d2   :  { %1843 = vmatpush2.bf16.msra.mxu1 %v1117_v13  ;;  %1803 = vmatprep.subr.bf16.mxu0 %v1084_v14  ;;  %v1164_v13 = vunpack.c.l.s8.bf16 %v630_v59  ;;  %v612_v14 = vld [vmem:[#allocation5 + $0x628] sm:$0xff]  ;;  %v623_v59 = vld [vmem:[#allocation5 + $0x680] sm:$0xff]  ;;  %v1119_v41 = vunpack.c.l.s8.bf16 %v607_v53 }
 0x1d3   :  { %1844 = vmatprep.subr.bf16.mxu1 %v1116_v15  ;;  %v628_v15 = vld [vmem:[#allocation5 + $0x6a8] sm:$0xff]  ;;  %v1130_v23 = vunpack.c.h.s8.bf16 %v612_v14  ;;  %v1128_v33 = vunpack.c.l.s8.bf16 %v612_v14  ;;  %v1151_v8 = vunpack.c.l.s8.bf16 %v623_v59  ;;  %v1148_v14 = vunpack.c.l.s8.bf16 %v622_v6 }
 0x1d5   :  { %1804 = vmatpush2.bf16.msra.mxu0 %v1083_v20 }
 0x1d6   :  { %1845 = vmatpush2.bf16.msra.mxu1 %v1115_v21  ;;  %1805 = vmatprep.subr.bf16.mxu0 %v1082_v2  ;;  %v1163_v2 = vunpack.c.l.s8.bf16 %v629_v7  ;;  %v638_v7 = vld [vmem:[#allocation5 + $0x6f8] sm:$0xff] }
 0x1d7   :  { %1846 = vmatprep.subr.bf16.mxu1 %v1114_v3 }
 0x1d9   :  { %1806 = vmatpush2.bf16.msra.mxu0 %v1081_v17  ;;  %v1162_v17 = vunpack.c.h.s8.bf16 %v628_v15 }
 0x1da   :  { %1847 = vmatpush2.bf16.msra.mxu1 %v1113_v24  ;;  %1807 = vmatprep.subr.bf16.mxu0 %v1080_v25  ;;  %v611_v24 = vld [vmem:[#allocation5 + $0x620] sm:$0xff] }
 0x1db   :  { %1848 = vmatprep.subr.bf16.mxu1 %v1112_v27  ;;  %v627_v25 = vld [vmem:[#allocation5 + $0x6a0] sm:$0xff] }
 0x1dd   :  { %1808 = vmatpush2.bf16.msra.mxu0 %v1079_v31 }
 0x1de   :  { %1849 = vmatpush2.bf16.msra.mxu1 %v1111_v16  ;;  %1809 = vmatprep.subr.bf16.mxu0 %v1078_v37  ;;  %v1129_v16 = vunpack.c.h.s8.bf16 %v611_v24  ;;  %v1161_v37 = vunpack.c.h.s8.bf16 %v627_v25 }
 0x1df   :  { %1850 = vmatprep.subr.bf16.mxu1 %v1110_v38 }
 0x1e1   :  { %1810 = vmatpush2.bf16.msra.mxu0 %v1077_v40  ;;  %v1160_v40 = vunpack.c.l.s8.bf16 %v628_v15  ;;  %v1180_v15 = vunpack.c.l.s8.bf16 %v638_v7 }
 0x1e2   :  { %1851 = vmatpush2.bf16.msra.mxu1 %v1109_v34  ;;  %1811 = vmatprep.subr.bf16.mxu0 %v1076_v42  ;;  %v610_v34 = vld [vmem:[#allocation5 + $0x618] sm:$0xff] }
 0x1e3   :  { %1852 = vmatprep.subr.bf16.mxu1 %v1108_v43  ;;  %v626_v42 = vld [vmem:[#allocation5 + $0x698] sm:$0xff]  ;;  %v1159_v43 = vunpack.c.l.s8.bf16 %v627_v25  ;;  %v1126_v32 = vunpack.c.h.s8.bf16 %v610_v34 }
 0x1e4   :  { %v1158_v44 = vunpack.c.h.s8.bf16 %v626_v42  ;;  %v1156_v51 = vunpack.c.l.s8.bf16 %v626_v42  ;;  %v618_v25 = vld [vmem:[#allocation5 + $0x658] sm:$0xff] }
 0x1e5   :  { %1812 = vmatpush2.bf16.msra.mxu0 %v1075_v47  ;;  %v625_v47 = vld [vmem:[#allocation5 + $0x690] sm:$0xff] }
 0x1e6   :  { %1853 = vmatpush2.bf16.msra.mxu1 %v1107_v48  ;;  %1813 = vmatprep.subr.bf16.mxu0 %v1074_v49  ;;  %v1125_v48 = vunpack.c.h.s8.bf16 %v609_v45  ;;  %v1157_v49 = vunpack.c.h.s8.bf16 %v625_v47 }
 0x1e7   :  { %1854 = vmatprep.subr.bf16.mxu1 %v1106_v50  ;;  %v1124_v50 = vunpack.c.l.s8.bf16 %v610_v34  ;;  %v1140_v34 = vunpack.c.l.s8.bf16 %v618_v25 }
 0x1e9   :  { %1814 = vmatpush2.bf16.msra.mxu0 %v1073_v56  ;;  %v1123_v56 = vunpack.c.l.s8.bf16 %v609_v45 }
 0x1ea   :  { %1855 = vmatpush2.bf16.msra.mxu1 %v1105_v57  ;;  %1815 = vmatprep.subr.bf16.mxu0 %v1072_v52  ;;  %v1155_v57 = vunpack.c.l.s8.bf16 %v625_v47  ;;  %v1122_v52 = vunpack.c.h.s8.bf16 %v608_v54 }
 0x1eb   :  { %1856 = vmatprep.subr.bf16.mxu1 %v1104_v58  ;;  %v1154_v58 = vunpack.c.h.s8.bf16 %v624_v55 }
 0x1ed   :  { %1816 = vmatpush2.bf16.msra.mxu0 %v1071_v0  ;;  %v1121_v0 = vunpack.c.h.s8.bf16 %v607_v53 }
 0x1ee   :  { %1857 = vmatpush2.bf16.msra.mxu1 %v1103_v1  ;;  %1867 = vmatprep.subr.bf16.mxu0 %v1134_v4  ;;  %v1153_v1 = vunpack.c.h.s8.bf16 %v623_v59  ;;  %v1120_v4 = vunpack.c.l.s8.bf16 %v608_v54 }
 0x1ef   :  { %1908 = vmatprep.subr.bf16.mxu1 %v1166_v5  ;;  %v1152_v5 = vunpack.c.l.s8.bf16 %v624_v55 }
 0x1f0   :  { %v1573_v20 = vpop.f32.mrf.mxu0  ;;  %1818 = vmatmul.mubr.bf16.vlgmr.msra.gmra.mxu0 %v395_v46  ;;  %v1150_v46 = vunpack.c.h.s8.bf16 %v622_v6  ;;  %v645_v6 = vld [vmem:[#allocation5 + $0x730] sm:$0xff] }
 0x1f1   :  { %v1614_v21 = vpop.f32.mrf.mxu1  ;;  %1859 = vmatmul.mubr.bf16.vlgmr.msra.gmra.mxu1 %v397_v9  ;;  %v1574_v62 = vadd.f32 %v1573_v20, %v3110_v29  ;;  %1868 = vmatpush1.bf16.msra.mxu0 %v1133_v10  ;;  %v1182_v9 = vunpack.c.h.s8.bf16 %v638_v7  ;;  %v621_v10 = vld [vmem:[#allocation5 + $0x670] sm:$0xff] }
 0x1f2   :  { %1909 = vmatpush1.bf16.msra.mxu1 %v1165_v11  ;;  %v1575_v3 = vpop.f32.mrf.mxu0  ;;  %1869 = vmatprep.subr.bf16.mxu0 %v1132_v12  ;;  %v637_v11 = vld [vmem:[#allocation5 + $0x6f0] sm:$0xff]  ;;  %v1149_v12 = vunpack.c.h.s8.bf16 %v621_v10  ;;  %v1147_v20 = vunpack.c.l.s8.bf16 %v621_v10  ;;  %v1197_v10 = vunpack.c.h.s8.bf16 %v645_v6 }
 0x1f3   :  { %v1616_v22 = vpop.f32.mrf.mxu1  ;;  %1910 = vmatprep.subr.bf16.mxu1 %v1164_v13  ;;  %v3130_v27 = vadd.f32 %v1614_v21, %v1574_v62  ;;  %v1576_v28 = vadd.f32 %v1575_v3, %v3113_v36  ;;  %1899 = vmatprep.mubr.bf16.mxu0 %v400_v18  ;;  %v1127_v36 = vunpack.c.l.s8.bf16 %v611_v24  ;;  %v1181_v13 = vunpack.c.h.s8.bf16 %v637_v11  ;;  %v620_v18 = vld [vmem:[#allocation5 + $0x668] sm:$0xff]  ;;  %v635_v3 = vld [vmem:[#allocation5 + $0x6e0] sm:$0xff]  ;;  %v661_v7 = vld [vmem:[#allocation5 + $0x7b0] sm:$0xff] }
 0x1f4   :  { %1940 = vmatprep.mubr.bf16.mxu1 %v402_v19  ;;  %v1577_v30 = vpop.f32.mrf.mxu0  ;;  %v636_v19 = vld [vmem:[#allocation5 + $0x6e8] sm:$0xff]  ;;  %v1179_v21 = vunpack.c.l.s8.bf16 %v637_v11  ;;  %v1146_v62 = vunpack.c.h.s8.bf16 %v620_v18  ;;  %v1229_v11 = vunpack.c.h.s8.bf16 %v661_v7 }
 0x1f5   :  { %v1618_v29 = vpop.f32.mrf.mxu1  ;;  %v3133_v31 = vadd.f32 %v1616_v22, %v1576_v28  ;;  %1870 = vmatpush1.bf16.msra.mxu0 %v1131_v63  ;;  %v1178_v63 = vunpack.c.h.s8.bf16 %v636_v19  ;;  %v1176_v24 = vunpack.c.l.s8.bf16 %v636_v19  ;;  %v634_v28 = vld [vmem:[#allocation5 + $0x6d8] sm:$0xff] }
 0x1f6   :  { %1911 = vmatpush1.bf16.msra.mxu1 %v1163_v2  ;;  %v1578_v38 = vpop.f32.mrf.mxu0  ;;  %1871 = vmatprep.subr.bf16.mxu0 %v1130_v23  ;;  %v619_v2 = vld [vmem:[#allocation5 + $0x660] sm:$0xff]  ;;  %v1177_v23 = vunpack.c.h.s8.bf16 %v635_v3  ;;  %v1175_v29 = vunpack.c.l.s8.bf16 %v635_v3  ;;  %v1172_v42 = vunpack.c.l.s8.bf16 %v634_v28 }
 0x1f7   :  { %v1619_v39 = vpop.f32.mrf.mxu1  ;;  %1912 = vmatprep.subr.bf16.mxu1 %v1162_v17  ;;  %v1145_v22 = vunpack.c.h.s8.bf16 %v619_v2  ;;  %v1144_v17 = vunpack.c.l.s8.bf16 %v620_v18  ;;  %v1143_v30 = vunpack.c.l.s8.bf16 %v619_v2  ;;  %v617_v38 = vld [vmem:[#allocation5 + $0x650] sm:$0xff] }
 0x1f8   :  { %v633_v39 = vld [vmem:[#allocation5 + $0x6d0] sm:$0xff] }
 0x1f9   :  { %1872 = vmatpush1.bf16.msra.mxu0 %v1129_v16  ;;  %v1142_v16 = vunpack.c.h.s8.bf16 %v618_v25  ;;  %v1171_v45 = vunpack.c.l.s8.bf16 %v633_v39 }
 0x1fa   :  { %1913 = vmatpush1.bf16.msra.mxu1 %v1161_v37  ;;  %1873 = vmatprep.subr.bf16.mxu0 %v1128_v33  ;;  %v1174_v37 = vunpack.c.h.s8.bf16 %v634_v28  ;;  %v1141_v33 = vunpack.c.h.s8.bf16 %v617_v38 }
 0x1fb   :  { %1914 = vmatprep.subr.bf16.mxu1 %v1160_v40  ;;  %v1173_v40 = vunpack.c.h.s8.bf16 %v633_v39 }
 0x1fd   :  { %1874 = vmatpush1.bf16.msra.mxu0 %v1127_v36  ;;  %v616_v36 = vld [vmem:[#allocation5 + $0x648] sm:$0xff] }
 0x1fe   :  { %1915 = vmatpush1.bf16.msra.mxu1 %v1159_v43  ;;  %1875 = vmatprep.subr.bf16.mxu0 %v1126_v32  ;;  %v632_v43 = vld [vmem:[#allocation5 + $0x6c8] sm:$0xff]  ;;  %v1138_v47 = vunpack.c.h.s8.bf16 %v616_v36 }
 0x1ff   :  { %1916 = vmatprep.subr.bf16.mxu1 %v1158_v44  ;;  %v151_v32 = vld [vmem:[#allocation2 + $0x38] sm:$0xff]  ;;  %v1139_v44 = vunpack.c.l.s8.bf16 %v617_v38 }
 0x200   :  { %v3136_v53 = vrot.slane %v151_v32, %v3023_v35 }
 0x201   :  { %1876 = vmatpush1.bf16.msra.mxu0 %v1125_v48  ;;  %v1170_v48 = vunpack.c.h.s8.bf16 %v632_v43 }
 0x202   :  { %1917 = vmatpush1.bf16.msra.mxu1 %v1157_v49  ;;  %1877 = vmatprep.subr.bf16.mxu0 %v1124_v50  ;;  %v615_v49 = vld [vmem:[#allocation5 + $0x640] sm:$0xff] }
 0x203   :  { %1918 = vmatprep.subr.bf16.mxu1 %v1156_v51  ;;  %v631_v50 = vld [vmem:[#allocation5 + $0x6c0] sm:$0xff]  ;;  %v284_v51 = vcombine.high %v151_v32, %v151_v32  ;;  %v1137_v54 = vunpack.c.h.s8.bf16 %v615_v49  ;;  %v641_v32 = vld [vmem:[#allocation5 + $0x710] sm:$0xff] }
 0x204   :  { %v1169_v55 = vunpack.c.h.s8.bf16 %v631_v50 }
 0x205   :  { %1878 = vmatpush1.bf16.msra.mxu0 %v1123_v56  ;;  %v1136_v56 = vunpack.c.l.s8.bf16 %v616_v36  ;;  %v3139_v59 = vrot.slane %v284_v51, %v3023_v35  ;;  %v656_v51 = vld [vmem:[#allocation5 + $0x788] sm:$0xff] }
 0x206   :  { %1919 = vmatpush1.bf16.msra.mxu1 %v1155_v57  ;;  %1879 = vmatprep.subr.bf16.mxu0 %v1122_v52  ;;  %v1168_v57 = vunpack.c.l.s8.bf16 %v632_v43  ;;  %v646_v52 = vld [vmem:[#allocation5 + $0x738] sm:$0xff] }
 0x207   :  { %1920 = vmatprep.subr.bf16.mxu1 %v1154_v58  ;;  %v662_v58 = vld [vmem:[#allocation5 + $0x7b8] sm:$0xff] }
 0x209   :  { %1880 = vmatpush1.bf16.msra.mxu0 %v1121_v0  ;;  %v1135_v0 = vunpack.c.l.s8.bf16 %v615_v49 }
 0x20a   :  { %1921 = vmatpush1.bf16.msra.mxu1 %v1153_v1  ;;  %1881 = vmatprep.subr.bf16.mxu0 %v1120_v4  ;;  %v1167_v1 = vunpack.c.l.s8.bf16 %v631_v50  ;;  %v1198_v4 = vunpack.c.h.s8.bf16 %v646_v52  ;;  %v640_v50 = vld [vmem:[#allocation5 + $0x708] sm:$0xff] }
 0x20b   :  { %1922 = vmatprep.subr.bf16.mxu1 %v1152_v5  ;;  %v1230_v5 = vunpack.c.h.s8.bf16 %v662_v58 }
 0x20d   :  { %1882 = vmatpush1.bf16.msra.mxu0 %v1119_v41  ;;  %v299_v41 = vcombine.high %v3136_v53, %v3136_v53 }
 0x20e   :  { %1923 = vmatpush1.bf16.msra.mxu1 %v1151_v8  ;;  %1883 = vmatprep.subr.bf16.mxu0 %v1150_v46  ;;  %v300_v8 = vcombine.high %v3139_v59, %v3139_v59  ;;  %v399_v46 = vpack.c.bf16 %v3116_v60, %v3116_v60 }
 0x20f   :  { %1924 = vmatprep.subr.bf16.mxu1 %v1182_v9  ;;  %v401_v9 = vpack.c.bf16 %v3119_v61, %v3119_v61  ;;  %v404_v18 = vpack.c.bf16 %v299_v41, %v299_v41  ;;  %v1195_v61 = vunpack.c.l.s8.bf16 %v645_v6  ;;  %v654_v6 = vld [vmem:[#allocation5 + $0x778] sm:$0xff] }
 0x210   :  { %v406_v19 = vpack.c.bf16 %v300_v8, %v300_v8 }
 0x211   :  { %1884 = vmatpush2.bf16.msra.mxu0 %v1149_v12  ;;  %v1196_v12 = vunpack.c.l.s8.bf16 %v646_v52  ;;  %v639_v52 = vld [vmem:[#allocation5 + $0x700] sm:$0xff] }
 0x212   :  { %1925 = vmatpush2.bf16.msra.mxu1 %v1181_v13  ;;  %1885 = vmatprep.subr.bf16.mxu0 %v1148_v14  ;;  %v1228_v13 = vunpack.c.l.s8.bf16 %v662_v58  ;;  %v644_v14 = vld [vmem:[#allocation5 + $0x728] sm:$0xff]  ;;  %v655_v58 = vld [vmem:[#allocation5 + $0x780] sm:$0xff]  ;;  %v1183_v41 = vunpack.c.l.s8.bf16 %v639_v52 }
 0x213   :  { %1926 = vmatprep.subr.bf16.mxu1 %v1180_v15  ;;  %v660_v15 = vld [vmem:[#allocation5 + $0x7a8] sm:$0xff]  ;;  %v1194_v3 = vunpack.c.h.s8.bf16 %v644_v14  ;;  %v1192_v39 = vunpack.c.l.s8.bf16 %v644_v14  ;;  %v1215_v8 = vunpack.c.l.s8.bf16 %v655_v58  ;;  %v1212_v14 = vunpack.c.l.s8.bf16 %v654_v6 }
 0x215   :  { %1886 = vmatpush2.bf16.msra.mxu0 %v1147_v20 }
 0x216   :  { %1927 = vmatpush2.bf16.msra.mxu1 %v1179_v21  ;;  %1887 = vmatprep.subr.bf16.mxu0 %v1146_v62  ;;  %v1227_v62 = vunpack.c.l.s8.bf16 %v661_v7  ;;  %v670_v7 = vld [vmem:[#allocation5 + $0x7f8] sm:$0xff] }
 0x217   :  { %1928 = vmatprep.subr.bf16.mxu1 %v1178_v63 }
 0x219   :  { %1888 = vmatpush2.bf16.msra.mxu0 %v1145_v22  ;;  %v1226_v22 = vunpack.c.h.s8.bf16 %v660_v15 }
 0x21a   :  { %1929 = vmatpush2.bf16.msra.mxu1 %v1177_v23  ;;  %1889 = vmatprep.subr.bf16.mxu0 %v1144_v17  ;;  %v643_v23 = vld [vmem:[#allocation5 + $0x720] sm:$0xff] }
 0x21b   :  { %1930 = vmatprep.subr.bf16.mxu1 %v1176_v24  ;;  %v659_v17 = vld [vmem:[#allocation5 + $0x7a0] sm:$0xff] }
 0x21d   :  { %1890 = vmatpush2.bf16.msra.mxu0 %v1143_v30 }
 0x21e   :  { %1931 = vmatpush2.bf16.msra.mxu1 %v1175_v29  ;;  %1891 = vmatprep.subr.bf16.mxu0 %v1142_v16  ;;  %v1193_v29 = vunpack.c.h.s8.bf16 %v643_v23  ;;  %v1225_v16 = vunpack.c.h.s8.bf16 %v659_v17 }
 0x21f   :  { %1932 = vmatprep.subr.bf16.mxu1 %v1174_v37 }
 0x221   :  { %1892 = vmatpush2.bf16.msra.mxu0 %v1141_v33  ;;  %v1224_v33 = vunpack.c.l.s8.bf16 %v660_v15  ;;  %v1244_v15 = vunpack.c.l.s8.bf16 %v670_v7 }
 0x222   :  { %1933 = vmatpush2.bf16.msra.mxu1 %v1173_v40  ;;  %1893 = vmatprep.subr.bf16.mxu0 %v1140_v34  ;;  %v642_v40 = vld [vmem:[#allocation5 + $0x718] sm:$0xff] }
 0x223   :  { %1934 = vmatprep.subr.bf16.mxu1 %v1172_v42  ;;  %v658_v34 = vld [vmem:[#allocation5 + $0x798] sm:$0xff]  ;;  %v1223_v42 = vunpack.c.l.s8.bf16 %v659_v17  ;;  %v1190_v36 = vunpack.c.h.s8.bf16 %v642_v40 }
 0x224   :  { %v1222_v43 = vunpack.c.h.s8.bf16 %v658_v34  ;;  %v1220_v49 = vunpack.c.l.s8.bf16 %v658_v34  ;;  %v650_v17 = vld [vmem:[#allocation5 + $0x758] sm:$0xff] }
 0x225   :  { %1894 = vmatpush2.bf16.msra.mxu0 %v1139_v44  ;;  %v657_v44 = vld [vmem:[#allocation5 + $0x790] sm:$0xff] }
 0x226   :  { %1935 = vmatpush2.bf16.msra.mxu1 %v1171_v45  ;;  %1895 = vmatprep.subr.bf16.mxu0 %v1138_v47  ;;  %v1189_v45 = vunpack.c.h.s8.bf16 %v641_v32  ;;  %v1221_v47 = vunpack.c.h.s8.bf16 %v657_v44 }
 0x227   :  { %1936 = vmatprep.subr.bf16.mxu1 %v1170_v48  ;;  %v1188_v48 = vunpack.c.l.s8.bf16 %v642_v40  ;;  %v1204_v40 = vunpack.c.l.s8.bf16 %v650_v17 }
 0x229   :  { %1896 = vmatpush2.bf16.msra.mxu0 %v1137_v54  ;;  %v1187_v54 = vunpack.c.l.s8.bf16 %v641_v32 }
 0x22a   :  { %1937 = vmatpush2.bf16.msra.mxu1 %v1169_v55  ;;  %1897 = vmatprep.subr.bf16.mxu0 %v1136_v56  ;;  %v1219_v55 = vunpack.c.l.s8.bf16 %v657_v44  ;;  %v1186_v56 = vunpack.c.h.s8.bf16 %v640_v50 }
 0x22b   :  { %1938 = vmatprep.subr.bf16.mxu1 %v1168_v57  ;;  %v1218_v57 = vunpack.c.h.s8.bf16 %v656_v51 }
 0x22d   :  { %1898 = vmatpush2.bf16.msra.mxu0 %v1135_v0  ;;  %v1185_v0 = vunpack.c.h.s8.bf16 %v639_v52 }
 0x22e   :  { %1939 = vmatpush2.bf16.msra.mxu1 %v1167_v1  ;;  %1949 = vmatprep.subr.bf16.mxu0 %v1198_v4  ;;  %v1217_v1 = vunpack.c.h.s8.bf16 %v655_v58  ;;  %v1184_v4 = vunpack.c.l.s8.bf16 %v640_v50 }
 0x22f   :  { %1990 = vmatprep.subr.bf16.mxu1 %v1230_v5  ;;  %v1216_v5 = vunpack.c.l.s8.bf16 %v656_v51 }
 0x230   :  { %v1655_v20 = vpop.f32.mrf.mxu0  ;;  %1900 = vmatmul.mubr.bf16.vlgmr.msra.gmra.mxu0 %v399_v46  ;;  %v1214_v46 = vunpack.c.h.s8.bf16 %v654_v6  ;;  %v677_v6 = vld [vmem:[#allocation5 + $0x830] sm:$0xff] }
 0x231   :  { %v1696_v21 = vpop.f32.mrf.mxu1  ;;  %1941 = vmatmul.mubr.bf16.vlgmr.msra.gmra.mxu1 %v401_v9  ;;  %v1656_v60 = vadd.f32 %v1655_v20, %v3130_v27  ;;  %1950 = vmatpush1.bf16.msra.mxu0 %v1197_v10  ;;  %v1246_v9 = vunpack.c.h.s8.bf16 %v670_v7  ;;  %v653_v10 = vld [vmem:[#allocation5 + $0x770] sm:$0xff] }
 0x232   :  { %1991 = vmatpush1.bf16.msra.mxu1 %v1229_v11  ;;  %v1657_v63 = vpop.f32.mrf.mxu0  ;;  %1951 = vmatprep.subr.bf16.mxu0 %v1196_v12  ;;  %v669_v11 = vld [vmem:[#allocation5 + $0x7f0] sm:$0xff]  ;;  %v1213_v12 = vunpack.c.h.s8.bf16 %v653_v10  ;;  %v1211_v20 = vunpack.c.l.s8.bf16 %v653_v10  ;;  %v1261_v10 = vunpack.c.h.s8.bf16 %v677_v6 }
 0x233   :  { %v1698_v2 = vpop.f32.mrf.mxu1  ;;  %1992 = vmatprep.subr.bf16.mxu1 %v1228_v13  ;;  %v3150_v24 = vadd.f32 %v1696_v21, %v1656_v60  ;;  %v1658_v25 = vadd.f32 %v1657_v63, %v3133_v31  ;;  %1981 = vmatprep.mubr.bf16.mxu0 %v404_v18  ;;  %v1191_v31 = vunpack.c.l.s8.bf16 %v643_v23  ;;  %v1245_v13 = vunpack.c.h.s8.bf16 %v669_v11  ;;  %v652_v18 = vld [vmem:[#allocation5 + $0x768] sm:$0xff]  ;;  %v667_v63 = vld [vmem:[#allocation5 + $0x7e0] sm:$0xff]  ;;  %v693_v7 = vld [vmem:[#allocation5 + $0x8b0] sm:$0xff] }
 0x234   :  { %2022 = vmatprep.mubr.bf16.mxu1 %v406_v19  ;;  %v1659_v28 = vpop.f32.mrf.mxu0  ;;  %v668_v19 = vld [vmem:[#allocation5 + $0x7e8] sm:$0xff]  ;;  %v1243_v21 = vunpack.c.l.s8.bf16 %v669_v11  ;;  %v1210_v60 = vunpack.c.h.s8.bf16 %v652_v18  ;;  %v1293_v11 = vunpack.c.h.s8.bf16 %v693_v7 }
 0x235   :  { %v1700_v27 = vpop.f32.mrf.mxu1  ;;  %v3153_v30 = vadd.f32 %v1698_v2, %v1658_v25  ;;  %1952 = vmatpush1.bf16.msra.mxu0 %v1195_v61  ;;  %v1242_v61 = vunpack.c.h.s8.bf16 %v668_v19  ;;  %v1240_v23 = vunpack.c.l.s8.bf16 %v668_v19  ;;  %v666_v25 = vld [vmem:[#allocation5 + $0x7d8] sm:$0xff] }
 0x236   :  { %1993 = vmatpush1.bf16.msra.mxu1 %v1227_v62  ;;  %v1660_v37 = vpop.f32.mrf.mxu0  ;;  %1953 = vmatprep.subr.bf16.mxu0 %v1194_v3  ;;  %v651_v62 = vld [vmem:[#allocation5 + $0x760] sm:$0xff]  ;;  %v1241_v3 = vunpack.c.h.s8.bf16 %v667_v63  ;;  %v1239_v27 = vunpack.c.l.s8.bf16 %v667_v63  ;;  %v1236_v34 = vunpack.c.l.s8.bf16 %v666_v25 }
 0x237   :  { %v1701_v38 = vpop.f32.mrf.mxu1  ;;  %1994 = vmatprep.subr.bf16.mxu1 %v1226_v22  ;;  %v1209_v2 = vunpack.c.h.s8.bf16 %v651_v62  ;;  %v1208_v22 = vunpack.c.l.s8.bf16 %v652_v18  ;;  %v1207_v28 = vunpack.c.l.s8.bf16 %v651_v62  ;;  %v649_v37 = vld [vmem:[#allocation5 + $0x750] sm:$0xff] }
 0x238   :  { %v665_v38 = vld [vmem:[#allocation5 + $0x7d0] sm:$0xff] }
 0x239   :  { %1954 = vmatpush1.bf16.msra.mxu0 %v1193_v29  ;;  %v1206_v29 = vunpack.c.h.s8.bf16 %v650_v17  ;;  %v1235_v32 = vunpack.c.l.s8.bf16 %v665_v38 }
 0x23a   :  { %1995 = vmatpush1.bf16.msra.mxu1 %v1225_v16  ;;  %1955 = vmatprep.subr.bf16.mxu0 %v1192_v39  ;;  %v1238_v16 = vunpack.c.h.s8.bf16 %v666_v25  ;;  %v1205_v39 = vunpack.c.h.s8.bf16 %v649_v37 }
 0x23b   :  { %1996 = vmatprep.subr.bf16.mxu1 %v1224_v33  ;;  %v1237_v33 = vunpack.c.h.s8.bf16 %v665_v38 }
 0x23d   :  { %1956 = vmatpush1.bf16.msra.mxu0 %v1191_v31  ;;  %v648_v31 = vld [vmem:[#allocation5 + $0x748] sm:$0xff] }
 0x23e   :  { %1997 = vmatpush1.bf16.msra.mxu1 %v1223_v42  ;;  %1957 = vmatprep.subr.bf16.mxu0 %v1190_v36  ;;  %v664_v42 = vld [vmem:[#allocation5 + $0x7c8] sm:$0xff]  ;;  %v1202_v44 = vunpack.c.h.s8.bf16 %v648_v31 }
 0x23f   :  { %1998 = vmatprep.subr.bf16.mxu1 %v1222_v43  ;;  %v152_v36 = vld [vmem:[#allocation2 + $0x40] sm:$0xff]  ;;  %v1203_v43 = vunpack.c.l.s8.bf16 %v649_v37 }
 0x240   :  { %v3156_v52 = vrot.slane %v152_v36, %v3023_v35 }
 0x241   :  { %1958 = vmatpush1.bf16.msra.mxu0 %v1189_v45  ;;  %v1234_v45 = vunpack.c.h.s8.bf16 %v664_v42 }
 0x242   :  { %1999 = vmatpush1.bf16.msra.mxu1 %v1221_v47  ;;  %1959 = vmatprep.subr.bf16.mxu0 %v1188_v48  ;;  %v647_v47 = vld [vmem:[#allocation5 + $0x740] sm:$0xff] }
 0x243   :  { %2000 = vmatprep.subr.bf16.mxu1 %v1220_v49  ;;  %v663_v48 = vld [vmem:[#allocation5 + $0x7c0] sm:$0xff]  ;;  %v301_v49 = vcombine.high %v152_v36, %v152_v36  ;;  %v1201_v50 = vunpack.c.h.s8.bf16 %v647_v47  ;;  %v673_v36 = vld [vmem:[#allocation5 + $0x810] sm:$0xff] }
 0x244   :  { %v1233_v51 = vunpack.c.h.s8.bf16 %v663_v48 }
 0x245   :  { %1960 = vmatpush1.bf16.msra.mxu0 %v1187_v54  ;;  %v1200_v54 = vunpack.c.l.s8.bf16 %v648_v31  ;;  %v3159_v58 = vrot.slane %v301_v49, %v3023_v35  ;;  %v688_v49 = vld [vmem:[#allocation5 + $0x888] sm:$0xff] }
 0x246   :  { %2001 = vmatpush1.bf16.msra.mxu1 %v1219_v55  ;;  %1961 = vmatprep.subr.bf16.mxu0 %v1186_v56  ;;  %v1232_v55 = vunpack.c.l.s8.bf16 %v664_v42  ;;  %v678_v56 = vld [vmem:[#allocation5 + $0x838] sm:$0xff] }
 0x247   :  { %2002 = vmatprep.subr.bf16.mxu1 %v1218_v57  ;;  %v694_v57 = vld [vmem:[#allocation5 + $0x8b8] sm:$0xff] }
 0x249   :  { %1962 = vmatpush1.bf16.msra.mxu0 %v1185_v0  ;;  %v1199_v0 = vunpack.c.l.s8.bf16 %v647_v47 }
 0x24a   :  { %2003 = vmatpush1.bf16.msra.mxu1 %v1217_v1  ;;  %1963 = vmatprep.subr.bf16.mxu0 %v1184_v4  ;;  %v1231_v1 = vunpack.c.l.s8.bf16 %v663_v48  ;;  %v1262_v4 = vunpack.c.h.s8.bf16 %v678_v56  ;;  %v672_v48 = vld [vmem:[#allocation5 + $0x808] sm:$0xff] }
 0x24b   :  { %2004 = vmatprep.subr.bf16.mxu1 %v1216_v5  ;;  %v1294_v5 = vunpack.c.h.s8.bf16 %v694_v57 }
 0x24d   :  { %1964 = vmatpush1.bf16.msra.mxu0 %v1183_v41  ;;  %v316_v41 = vcombine.high %v3156_v52, %v3156_v52 }
 0x24e   :  { %2005 = vmatpush1.bf16.msra.mxu1 %v1215_v8  ;;  %1965 = vmatprep.subr.bf16.mxu0 %v1214_v46  ;;  %v317_v8 = vcombine.high %v3159_v58, %v3159_v58  ;;  %v403_v46 = vpack.c.bf16 %v3136_v53, %v3136_v53 }
 0x24f   :  { %2006 = vmatprep.subr.bf16.mxu1 %v1246_v9  ;;  %v405_v9 = vpack.c.bf16 %v3139_v59, %v3139_v59  ;;  %v408_v18 = vpack.c.bf16 %v316_v41, %v316_v41  ;;  %v1259_v59 = vunpack.c.l.s8.bf16 %v677_v6  ;;  %v686_v6 = vld [vmem:[#allocation5 + $0x878] sm:$0xff] }
 0x250   :  { %v410_v19 = vpack.c.bf16 %v317_v8, %v317_v8 }
 0x251   :  { %1966 = vmatpush2.bf16.msra.mxu0 %v1213_v12  ;;  %v1260_v12 = vunpack.c.l.s8.bf16 %v678_v56  ;;  %v671_v56 = vld [vmem:[#allocation5 + $0x800] sm:$0xff] }
 0x252   :  { %2007 = vmatpush2.bf16.msra.mxu1 %v1245_v13  ;;  %1967 = vmatprep.subr.bf16.mxu0 %v1212_v14  ;;  %v1292_v13 = vunpack.c.l.s8.bf16 %v694_v57  ;;  %v676_v14 = vld [vmem:[#allocation5 + $0x828] sm:$0xff]  ;;  %v687_v57 = vld [vmem:[#allocation5 + $0x880] sm:$0xff]  ;;  %v1247_v41 = vunpack.c.l.s8.bf16 %v671_v56 }
 0x253   :  { %2008 = vmatprep.subr.bf16.mxu1 %v1244_v15  ;;  %v692_v15 = vld [vmem:[#allocation5 + $0x8a8] sm:$0xff]  ;;  %v1258_v63 = vunpack.c.h.s8.bf16 %v676_v14  ;;  %v1256_v38 = vunpack.c.l.s8.bf16 %v676_v14  ;;  %v1279_v8 = vunpack.c.l.s8.bf16 %v687_v57  ;;  %v1276_v14 = vunpack.c.l.s8.bf16 %v686_v6 }
 0x255   :  { %1968 = vmatpush2.bf16.msra.mxu0 %v1211_v20 }
 0x256   :  { %2009 = vmatpush2.bf16.msra.mxu1 %v1243_v21  ;;  %1969 = vmatprep.subr.bf16.mxu0 %v1210_v60  ;;  %v1291_v60 = vunpack.c.l.s8.bf16 %v693_v7  ;;  %v702_v7 = vld [vmem:[#allocation5 + $0x8f8] sm:$0xff] }
 0x257   :  { %2010 = vmatprep.subr.bf16.mxu1 %v1242_v61 }
 0x259   :  { %1970 = vmatpush2.bf16.msra.mxu0 %v1209_v2  ;;  %v1290_v2 = vunpack.c.h.s8.bf16 %v692_v15 }
 0x25a   :  { %2011 = vmatpush2.bf16.msra.mxu1 %v1241_v3  ;;  %1971 = vmatprep.subr.bf16.mxu0 %v1208_v22  ;;  %v675_v3 = vld [vmem:[#allocation5 + $0x820] sm:$0xff] }
 0x25b   :  { %2012 = vmatprep.subr.bf16.mxu1 %v1240_v23  ;;  %v691_v22 = vld [vmem:[#allocation5 + $0x8a0] sm:$0xff] }
 0x25d   :  { %1972 = vmatpush2.bf16.msra.mxu0 %v1207_v28 }
 0x25e   :  { %2013 = vmatpush2.bf16.msra.mxu1 %v1239_v27  ;;  %1973 = vmatprep.subr.bf16.mxu0 %v1206_v29  ;;  %v1257_v27 = vunpack.c.h.s8.bf16 %v675_v3  ;;  %v1289_v29 = vunpack.c.h.s8.bf16 %v691_v22 }
 0x25f   :  { %2014 = vmatprep.subr.bf16.mxu1 %v1238_v16 }
 0x261   :  { %1974 = vmatpush2.bf16.msra.mxu0 %v1205_v39  ;;  %v1288_v39 = vunpack.c.l.s8.bf16 %v692_v15  ;;  %v1308_v15 = vunpack.c.l.s8.bf16 %v702_v7 }
 0x262   :  { %2015 = vmatpush2.bf16.msra.mxu1 %v1237_v33  ;;  %1975 = vmatprep.subr.bf16.mxu0 %v1204_v40  ;;  %v674_v33 = vld [vmem:[#allocation5 + $0x818] sm:$0xff] }
 0x263   :  { %2016 = vmatprep.subr.bf16.mxu1 %v1236_v34  ;;  %v690_v40 = vld [vmem:[#allocation5 + $0x898] sm:$0xff]  ;;  %v1287_v34 = vunpack.c.l.s8.bf16 %v691_v22  ;;  %v1254_v31 = vunpack.c.h.s8.bf16 %v674_v33 }
 0x264   :  { %v1286_v42 = vunpack.c.h.s8.bf16 %v690_v40  ;;  %v1284_v47 = vunpack.c.l.s8.bf16 %v690_v40  ;;  %v682_v22 = vld [vmem:[#allocation5 + $0x858] sm:$0xff] }
 0x265   :  { %1976 = vmatpush2.bf16.msra.mxu0 %v1203_v43  ;;  %v689_v43 = vld [vmem:[#allocation5 + $0x890] sm:$0xff] }
 0x266   :  { %2017 = vmatpush2.bf16.msra.mxu1 %v1235_v32  ;;  %1977 = vmatprep.subr.bf16.mxu0 %v1202_v44  ;;  %v1253_v32 = vunpack.c.h.s8.bf16 %v673_v36  ;;  %v1285_v44 = vunpack.c.h.s8.bf16 %v689_v43 }
 0x267   :  { %2018 = vmatprep.subr.bf16.mxu1 %v1234_v45  ;;  %v1252_v45 = vunpack.c.l.s8.bf16 %v674_v33  ;;  %v1268_v33 = vunpack.c.l.s8.bf16 %v682_v22 }
 0x269   :  { %1978 = vmatpush2.bf16.msra.mxu0 %v1201_v50  ;;  %v1251_v50 = vunpack.c.l.s8.bf16 %v673_v36 }
 0x26a   :  { %2019 = vmatpush2.bf16.msra.mxu1 %v1233_v51  ;;  %1979 = vmatprep.subr.bf16.mxu0 %v1200_v54  ;;  %v1283_v51 = vunpack.c.l.s8.bf16 %v689_v43  ;;  %v1250_v54 = vunpack.c.h.s8.bf16 %v672_v48 }
 0x26b   :  { %2020 = vmatprep.subr.bf16.mxu1 %v1232_v55  ;;  %v1282_v55 = vunpack.c.h.s8.bf16 %v688_v49 }
 0x26d   :  { %1980 = vmatpush2.bf16.msra.mxu0 %v1199_v0  ;;  %v1249_v0 = vunpack.c.h.s8.bf16 %v671_v56 }
 0x26e   :  { %2021 = vmatpush2.bf16.msra.mxu1 %v1231_v1  ;;  %2031 = vmatprep.subr.bf16.mxu0 %v1262_v4  ;;  %v1281_v1 = vunpack.c.h.s8.bf16 %v687_v57  ;;  %v1248_v4 = vunpack.c.l.s8.bf16 %v672_v48 }
 0x26f   :  { %2072 = vmatprep.subr.bf16.mxu1 %v1294_v5  ;;  %v1280_v5 = vunpack.c.l.s8.bf16 %v688_v49 }
 0x270   :  { %v1737_v20 = vpop.f32.mrf.mxu0  ;;  %1982 = vmatmul.mubr.bf16.vlgmr.msra.gmra.mxu0 %v403_v46  ;;  %v1278_v46 = vunpack.c.h.s8.bf16 %v686_v6  ;;  %v709_v6 = vld [vmem:[#allocation5 + $0x930] sm:$0xff] }
 0x271   :  { %v1778_v21 = vpop.f32.mrf.mxu1  ;;  %2023 = vmatmul.mubr.bf16.vlgmr.msra.gmra.mxu1 %v405_v9  ;;  %v1738_v53 = vadd.f32 %v1737_v20, %v3150_v24  ;;  %2032 = vmatpush1.bf16.msra.mxu0 %v1261_v10  ;;  %v1310_v9 = vunpack.c.h.s8.bf16 %v702_v7  ;;  %v685_v10 = vld [vmem:[#allocation5 + $0x870] sm:$0xff] }
 0x272   :  { %2073 = vmatpush1.bf16.msra.mxu1 %v1293_v11  ;;  %v1739_v61 = vpop.f32.mrf.mxu0  ;;  %2033 = vmatprep.subr.bf16.mxu0 %v1260_v12  ;;  %v701_v11 = vld [vmem:[#allocation5 + $0x8f0] sm:$0xff]  ;;  %v1277_v12 = vunpack.c.h.s8.bf16 %v685_v10  ;;  %v1275_v20 = vunpack.c.l.s8.bf16 %v685_v10  ;;  %v1325_v10 = vunpack.c.h.s8.bf16 %v709_v6 }
 0x273   :  { %v1780_v62 = vpop.f32.mrf.mxu1  ;;  %2074 = vmatprep.subr.bf16.mxu1 %v1292_v13  ;;  %v3170_v23 = vadd.f32 %v1778_v21, %v1738_v53  ;;  %v1740_v17 = vadd.f32 %v1739_v61, %v3153_v30  ;;  %2063 = vmatprep.mubr.bf16.mxu0 %v408_v18  ;;  %v1255_v30 = vunpack.c.l.s8.bf16 %v675_v3  ;;  %v1309_v13 = vunpack.c.h.s8.bf16 %v701_v11  ;;  %v684_v18 = vld [vmem:[#allocation5 + $0x868] sm:$0xff]  ;;  %v699_v61 = vld [vmem:[#allocation5 + $0x8e0] sm:$0xff]  ;;  %v725_v7 = vld [vmem:[#allocation5 + $0x9b0] sm:$0xff] }
 0x274   :  { %2104 = vmatprep.mubr.bf16.mxu1 %v410_v19  ;;  %v1741_v25 = vpop.f32.mrf.mxu0  ;;  %v700_v19 = vld [vmem:[#allocation5 + $0x8e8] sm:$0xff]  ;;  %v1307_v21 = vunpack.c.l.s8.bf16 %v701_v11  ;;  %v1274_v53 = vunpack.c.h.s8.bf16 %v684_v18  ;;  %v1357_v11 = vunpack.c.h.s8.bf16 %v725_v7 }
 0x275   :  { %v1782_v24 = vpop.f32.mrf.mxu1  ;;  %v3173_v28 = vadd.f32 %v1780_v62, %v1740_v17  ;;  %2034 = vmatpush1.bf16.msra.mxu0 %v1259_v59  ;;  %v1306_v59 = vunpack.c.h.s8.bf16 %v700_v19  ;;  %v1304_v3 = vunpack.c.l.s8.bf16 %v700_v19  ;;  %v698_v17 = vld [vmem:[#allocation5 + $0x8d8] sm:$0xff] }
 0x276   :  { %2075 = vmatpush1.bf16.msra.mxu1 %v1291_v60  ;;  %v1742_v16 = vpop.f32.mrf.mxu0  ;;  %2035 = vmatprep.subr.bf16.mxu0 %v1258_v63  ;;  %v683_v60 = vld [vmem:[#allocation5 + $0x860] sm:$0xff]  ;;  %v1305_v63 = vunpack.c.h.s8.bf16 %v699_v61  ;;  %v1303_v24 = vunpack.c.l.s8.bf16 %v699_v61  ;;  %v1300_v40 = vunpack.c.l.s8.bf16 %v698_v17 }
 0x277   :  { %v1783_v37 = vpop.f32.mrf.mxu1  ;;  %2076 = vmatprep.subr.bf16.mxu1 %v1290_v2  ;;  %v1273_v62 = vunpack.c.h.s8.bf16 %v683_v60  ;;  %v1272_v2 = vunpack.c.l.s8.bf16 %v684_v18  ;;  %v1271_v25 = vunpack.c.l.s8.bf16 %v683_v60  ;;  %v681_v16 = vld [vmem:[#allocation5 + $0x850] sm:$0xff] }
 0x278   :  { %v697_v37 = vld [vmem:[#allocation5 + $0x8d0] sm:$0xff] }
 0x279   :  { %2036 = vmatpush1.bf16.msra.mxu0 %v1257_v27  ;;  %v1270_v27 = vunpack.c.h.s8.bf16 %v682_v22  ;;  %v1299_v36 = vunpack.c.l.s8.bf16 %v697_v37 }
 0x27a   :  { %2077 = vmatpush1.bf16.msra.mxu1 %v1289_v29  ;;  %2037 = vmatprep.subr.bf16.mxu0 %v1256_v38  ;;  %v1302_v29 = vunpack.c.h.s8.bf16 %v698_v17  ;;  %v1269_v38 = vunpack.c.h.s8.bf16 %v681_v16 }
 0x27b   :  { %2078 = vmatprep.subr.bf16.mxu1 %v1288_v39  ;;  %v1301_v39 = vunpack.c.h.s8.bf16 %v697_v37 }
 0x27d   :  { %2038 = vmatpush1.bf16.msra.mxu0 %v1255_v30  ;;  %v680_v30 = vld [vmem:[#allocation5 + $0x848] sm:$0xff] }
 0x27e   :  { %2079 = vmatpush1.bf16.msra.mxu1 %v1287_v34  ;;  %2039 = vmatprep.subr.bf16.mxu0 %v1254_v31  ;;  %v696_v34 = vld [vmem:[#allocation5 + $0x8c8] sm:$0xff]  ;;  %v153_v31 = vld [vmem:[#allocation2 + $0x48] sm:$0xff]  ;;  %v1266_v43 = vunpack.c.h.s8.bf16 %v680_v30 }
 0x27f   :  { %2080 = vmatprep.subr.bf16.mxu1 %v1286_v42  ;;  %v1267_v42 = vunpack.c.l.s8.bf16 %v681_v16  ;;  %v3176_v56 = vrot.slane %v153_v31, %v3023_v35 }
 0x281   :  { %2040 = vmatpush1.bf16.msra.mxu0 %v1253_v32  ;;  %v1298_v32 = vunpack.c.h.s8.bf16 %v696_v34 }
 0x282   :  { %2081 = vmatpush1.bf16.msra.mxu1 %v1285_v44  ;;  %2041 = vmatprep.subr.bf16.mxu0 %v1252_v45  ;;  %v679_v44 = vld [vmem:[#allocation5 + $0x840] sm:$0xff] }
 0x283   :  { %2082 = vmatprep.subr.bf16.mxu1 %v1284_v47  ;;  %v695_v45 = vld [vmem:[#allocation5 + $0x8c0] sm:$0xff]  ;;  %v318_v47 = vcombine.high %v153_v31, %v153_v31  ;;  %v1265_v48 = vunpack.c.h.s8.bf16 %v679_v44 }
 0x284   :  { %v1297_v49 = vunpack.c.h.s8.bf16 %v695_v45 }
 0x285   :  { %2042 = vmatpush1.bf16.msra.mxu0 %v1251_v50  ;;  %v1264_v50 = vunpack.c.l.s8.bf16 %v680_v30  ;;  %v3179_v57 = vrot.slane %v318_v47, %v3023_v35 }
 0x286   :  { %2083 = vmatpush1.bf16.msra.mxu1 %v1283_v51  ;;  %2043 = vmatprep.subr.bf16.mxu0 %v1250_v54  ;;  %v1296_v51 = vunpack.c.l.s8.bf16 %v696_v34  ;;  %v710_v54 = vld [vmem:[#allocation5 + $0x938] sm:$0xff] }
 0x287   :  { %2084 = vmatprep.subr.bf16.mxu1 %v1282_v55  ;;  %v726_v55 = vld [vmem:[#allocation5 + $0x9b8] sm:$0xff] }
 0x289   :  { %2044 = vmatpush1.bf16.msra.mxu0 %v1249_v0  ;;  %v1263_v0 = vunpack.c.l.s8.bf16 %v679_v44 }
 0x28a   :  { %2085 = vmatpush1.bf16.msra.mxu1 %v1281_v1  ;;  %2045 = vmatprep.subr.bf16.mxu0 %v1248_v4  ;;  %v1295_v1 = vunpack.c.l.s8.bf16 %v695_v45  ;;  %v1326_v4 = vunpack.c.h.s8.bf16 %v710_v54 }
 0x28b   :  { %2086 = vmatprep.subr.bf16.mxu1 %v1280_v5  ;;  %v1358_v5 = vunpack.c.h.s8.bf16 %v726_v55 }
 0x28d   :  { %2046 = vmatpush1.bf16.msra.mxu0 %v1247_v41  ;;  %v333_v41 = vcombine.high %v3176_v56, %v3176_v56 }
 0x28e   :  { %2087 = vmatpush1.bf16.msra.mxu1 %v1279_v8  ;;  %2047 = vmatprep.subr.bf16.mxu0 %v1278_v46  ;;  %v334_v8 = vcombine.high %v3179_v57, %v3179_v57  ;;  %v407_v46 = vpack.c.bf16 %v3156_v52, %v3156_v52 }
 0x28f   :  { %2088 = vmatprep.subr.bf16.mxu1 %v1310_v9  ;;  %v409_v9 = vpack.c.bf16 %v3159_v58, %v3159_v58  ;;  %v412_v18 = vpack.c.bf16 %v333_v41, %v333_v41  ;;  %v1323_v58 = vunpack.c.l.s8.bf16 %v709_v6  ;;  %v718_v41 = vld [vmem:[#allocation5 + $0x978] sm:$0xff] }
 0x290   :  { %v414_v19 = vpack.c.bf16 %v334_v8, %v334_v8  ;;  %v734_v8 = vld [vmem:[#allocation5 + $0x9f8] sm:$0xff] }
 0x291   :  { %2048 = vmatpush2.bf16.msra.mxu0 %v1277_v12  ;;  %v1324_v12 = vunpack.c.l.s8.bf16 %v710_v54 }
 0x292   :  { %2089 = vmatpush2.bf16.msra.mxu1 %v1309_v13  ;;  %2049 = vmatprep.subr.bf16.mxu0 %v1276_v14  ;;  %v1356_v13 = vunpack.c.l.s8.bf16 %v726_v55  ;;  %v708_v14 = vld [vmem:[#allocation5 + $0x928] sm:$0xff] }
 0x293   :  { %2090 = vmatprep.subr.bf16.mxu1 %v1308_v15  ;;  %v724_v15 = vld [vmem:[#allocation5 + $0x9a8] sm:$0xff]  ;;  %v1322_v61 = vunpack.c.h.s8.bf16 %v708_v14 }
 0x295   :  { %2050 = vmatpush2.bf16.msra.mxu0 %v1275_v20 }
 0x296   :  { %2091 = vmatpush2.bf16.msra.mxu1 %v1307_v21  ;;  %2051 = vmatprep.subr.bf16.mxu0 %v1274_v53  ;;  %v1355_v53 = vunpack.c.l.s8.bf16 %v725_v7 }
 0x297   :  { %2092 = vmatprep.subr.bf16.mxu1 %v1306_v59 }
 0x299   :  { %2052 = vmatpush2.bf16.msra.mxu0 %v1273_v62  ;;  %v1354_v62 = vunpack.c.h.s8.bf16 %v724_v15 }
 0x29a   :  { %2093 = vmatpush2.bf16.msra.mxu1 %v1305_v63  ;;  %2053 = vmatprep.subr.bf16.mxu0 %v1272_v2  ;;  %v707_v63 = vld [vmem:[#allocation5 + $0x920] sm:$0xff] }
 0x29b   :  { %2094 = vmatprep.subr.bf16.mxu1 %v1304_v3  ;;  %v723_v2 = vld [vmem:[#allocation5 + $0x9a0] sm:$0xff]  ;;  %v1319_v30 = vunpack.c.l.s8.bf16 %v707_v63 }
 0x29c   :  { %v1353_v16 = vunpack.c.h.s8.bf16 %v723_v2  ;;  %v1351_v34 = vunpack.c.l.s8.bf16 %v723_v2 }
 0x29d   :  { %2054 = vmatpush2.bf16.msra.mxu0 %v1271_v25  ;;  %v2938_v25 = vmov 0  }
 0x29e   :  { %2095 = vmatpush2.bf16.msra.mxu1 %v1303_v24  ;;  %2055 = vmatprep.subr.bf16.mxu0 %v1270_v27  ;;  %v154_v24 = vld [vmem:[#allocation2 + $0x50] sm:$0x3] }
 0x29f   :  { %2096 = vmatprep.subr.bf16.mxu1 %v1302_v29  ;;  %2677 = vset.pattern.permute.xlu0 %v2938_v25  ;;  %v1321_v29 = vunpack.c.h.s8.bf16 %v707_v63 }
 0x2a0   :  { %2212 = vperm.xlu0 %2677, %v154_v24  }
 0x2a1   :  { %2056 = vmatpush2.bf16.msra.mxu0 %v1269_v38 }
 0x2a2   :  { %2097 = vmatpush2.bf16.msra.mxu1 %v1301_v39  ;;  %2057 = vmatprep.subr.bf16.mxu0 %v1268_v33  ;;  %v1320_v39 = vunpack.c.l.s8.bf16 %v708_v14  ;;  %v1352_v33 = vunpack.c.l.s8.bf16 %v724_v15 }
 0x2a3   :  { %2098 = vmatprep.subr.bf16.mxu1 %v1300_v40  ;;  %v722_v40 = vld [vmem:[#allocation5 + $0x998] sm:$0xff] }
 0x2a4   :  { %v1348_v47 = vunpack.c.l.s8.bf16 %v722_v40 }
 0x2a5   :  { %2058 = vmatpush2.bf16.msra.mxu0 %v1267_v42  ;;  %v1350_v42 = vunpack.c.h.s8.bf16 %v722_v40 }
 0x2a6   :  { %2099 = vmatpush2.bf16.msra.mxu1 %v1299_v36  ;;  %2059 = vmatprep.subr.bf16.mxu0 %v1266_v43  ;;  %v705_v36 = vld [vmem:[#allocation5 + $0x910] sm:$0xff] }
 0x2a7   :  { %2100 = vmatprep.subr.bf16.mxu1 %v1298_v32  ;;  %v721_v43 = vld [vmem:[#allocation5 + $0x990] sm:$0xff]  ;;  %v1317_v32 = vunpack.c.h.s8.bf16 %v705_v36 }
 0x2a8   :  { %v1349_v44 = vunpack.c.h.s8.bf16 %v721_v43 }
 0x2a9   :  { %2060 = vmatpush2.bf16.msra.mxu0 %v1265_v48  ;;  %v704_v48 = vld [vmem:[#allocation5 + $0x908] sm:$0xff] }
 0x2aa   :  { %2101 = vmatpush2.bf16.msra.mxu1 %v1297_v49  ;;  %2061 = vmatprep.subr.bf16.mxu0 %v1264_v50  ;;  %v720_v49 = vld [vmem:[#allocation5 + $0x988] sm:$0xff]  ;;  %v1315_v50 = vunpack.c.l.s8.bf16 %v705_v36  ;;  %v1314_v54 = vunpack.c.h.s8.bf16 %v704_v48  ;;  %v1312_v6 = vunpack.c.l.s8.bf16 %v704_v48 }
 0x2ab   :  { %2102 = vmatprep.subr.bf16.mxu1 %v1296_v51  ;;  %v1347_v51 = vunpack.c.l.s8.bf16 %v721_v43  ;;  %v1346_v55 = vunpack.c.h.s8.bf16 %v720_v49  ;;  %v1344_v7 = vunpack.c.l.s8.bf16 %v720_v49 }
 0x2ad   :  { %2062 = vmatpush2.bf16.msra.mxu0 %v1263_v0  ;;  %v703_v0 = vld [vmem:[#allocation5 + $0x900] sm:$0xff] }
 0x2ae   :  { %2103 = vmatpush2.bf16.msra.mxu1 %v1295_v1  ;;  %2113 = vmatprep.subr.bf16.mxu0 %v1326_v4  ;;  %v719_v1 = vld [vmem:[#allocation5 + $0x980] sm:$0xff]  ;;  %v1313_v4 = vunpack.c.h.s8.bf16 %v703_v0 }
 0x2af   :  { %2154 = vmatprep.subr.bf16.mxu1 %v1358_v5  ;;  %v1345_v5 = vunpack.c.h.s8.bf16 %v719_v1 }
 0x2b0   :  { %v1819_v20 = vpop.f32.mrf.mxu0  ;;  %2064 = vmatmul.mubr.bf16.vlgmr.msra.gmra.mxu0 %v407_v46  ;;  %v1311_v46 = vunpack.c.l.s8.bf16 %v703_v0 }
 0x2b1   :  { %v1860_v21 = vpop.f32.mrf.mxu1  ;;  %2105 = vmatmul.mubr.bf16.vlgmr.msra.gmra.mxu1 %v409_v9  ;;  %v1820_v52 = vadd.f32 %v1819_v20, %v3170_v23  ;;  %2114 = vmatpush1.bf16.msra.mxu0 %v1325_v10  ;;  %v1343_v9 = vunpack.c.l.s8.bf16 %v719_v1  ;;  %v1342_v10 = vunpack.c.h.s8.bf16 %v718_v41  ;;  %v716_v20 = vld [vmem:[#allocation5 + $0x968] sm:$0xff] }
 0x2b2   :  { %2155 = vmatpush1.bf16.msra.mxu1 %v1357_v11  ;;  %v1821_v59 = vpop.f32.mrf.mxu0  ;;  %2115 = vmatprep.subr.bf16.mxu0 %v1324_v12  ;;  %v1374_v11 = vunpack.c.h.s8.bf16 %v734_v8  ;;  %v717_v12 = vld [vmem:[#allocation5 + $0x970] sm:$0xff]  ;;  %v1336_v2 = vunpack.c.l.s8.bf16 %v716_v20 }
 0x2b3   :  { %v1862_v60 = vpop.f32.mrf.mxu1  ;;  %2156 = vmatprep.subr.bf16.mxu1 %v1356_v13  ;;  %v3190_v3 = vadd.f32 %v1860_v21, %v1820_v52  ;;  %v1822_v22 = vadd.f32 %v1821_v59, %v3173_v28  ;;  %2145 = vmatprep.mubr.bf16.mxu0 %v412_v18  ;;  %v706_v28 = vld [vmem:[#allocation5 + $0x918] sm:$0xff]  ;;  %v733_v13 = vld [vmem:[#allocation5 + $0x9f0] sm:$0xff]  ;;  %v1341_v14 = vunpack.c.h.s8.bf16 %v717_v12  ;;  %v1340_v18 = vunpack.c.l.s8.bf16 %v718_v41  ;;  %v732_v21 = vld [vmem:[#allocation5 + $0x9e8] sm:$0xff] }
 0x2b4   :  { %2186 = vmatprep.mubr.bf16.mxu1 %v414_v19  ;;  %v1823_v17 = vpop.f32.mrf.mxu0  ;;  %v1318_v31 = vunpack.c.h.s8.bf16 %v706_v28  ;;  %v1316_v45 = vunpack.c.l.s8.bf16 %v706_v28  ;;  %v1373_v15 = vunpack.c.h.s8.bf16 %v733_v13  ;;  %v1372_v19 = vunpack.c.l.s8.bf16 %v734_v8 }
 0x2b5   :  { %v1864_v23 = vpop.f32.mrf.mxu1  ;;  %v3193_v27 = vadd.f32 %v1862_v60, %v1822_v22  ;;  %2116 = vmatpush1.bf16.msra.mxu0 %v1323_v58  ;;  %v1339_v52 = vunpack.c.l.s8.bf16 %v717_v12  ;;  %v1371_v58 = vunpack.c.l.s8.bf16 %v733_v13  ;;  %v1370_v59 = vunpack.c.h.s8.bf16 %v732_v21  ;;  %v715_v60 = vld [vmem:[#allocation5 + $0x960] sm:$0xff]  ;;  %v714_v17 = vld [vmem:[#allocation5 + $0x958] sm:$0xff] }
 0x2b6   :  { %2157 = vmatpush1.bf16.msra.mxu1 %v1355_v53  ;;  %v1824_v37 = vpop.f32.mrf.mxu0  ;;  %2117 = vmatprep.subr.bf16.mxu0 %v1322_v61  ;;  %v1338_v53 = vunpack.c.h.s8.bf16 %v716_v20  ;;  %v731_v61 = vld [vmem:[#allocation5 + $0x9e0] sm:$0xff]  ;;  %v1368_v22 = vunpack.c.l.s8.bf16 %v732_v21  ;;  %v730_v23 = vld [vmem:[#allocation5 + $0x9d8] sm:$0xff]  ;;  %v1335_v25 = vunpack.c.l.s8.bf16 %v715_v60  ;;  %v1332_v28 = vunpack.c.l.s8.bf16 %v714_v17 }
 0x2b7   :  { %v1865_v38 = vpop.f32.mrf.mxu1  ;;  %2158 = vmatprep.subr.bf16.mxu1 %v1354_v62  ;;  %v1337_v62 = vunpack.c.h.s8.bf16 %v715_v60  ;;  %v1369_v63 = vunpack.c.h.s8.bf16 %v731_v61  ;;  %v1367_v24 = vunpack.c.l.s8.bf16 %v731_v61  ;;  %v713_v37 = vld [vmem:[#allocation5 + $0x950] sm:$0xff]  ;;  %v1364_v40 = vunpack.c.l.s8.bf16 %v730_v23  ;;  %v2696_v20 = vld [vmem:[#allocation11 + $0x58] sm:$0xff]  }
 0x2b8   :  { %v729_v38 = vld [vmem:[#allocation5 + $0x9d0] sm:$0xff] }
 0x2b9   :  { %2118 = vmatpush1.bf16.msra.mxu0 %v1321_v29  ;;  %v1334_v29 = vunpack.c.h.s8.bf16 %v714_v17  ;;  %v2690_v12 = vld [vmem:[#allocation11 + $0x70] sm:$0xff]  }
 0x2ba   :  { %2159 = vmatpush1.bf16.msra.mxu1 %v1353_v16  ;;  %2119 = vmatprep.subr.bf16.mxu0 %v1320_v39  ;;  %v1366_v16 = vunpack.c.h.s8.bf16 %v730_v23  ;;  %v1333_v39 = vunpack.c.h.s8.bf16 %v713_v37  ;;  %v2691_v13 = vld [vmem:[#allocation11 + $0x30] sm:$0xff]  }
 0x2bb   :  { %2160 = vmatprep.subr.bf16.mxu1 %v1352_v33  ;;  %v1365_v33 = vunpack.c.h.s8.bf16 %v729_v38 }
 0x2bd   :  { %2120 = vmatpush1.bf16.msra.mxu0 %v1319_v30  ;;  %v712_v30 = vld [vmem:[#allocation5 + $0x948] sm:$0xff] }
 0x2be   :  { %2161 = vmatpush1.bf16.msra.mxu1 %v1351_v34  ;;  %2121 = vmatprep.subr.bf16.mxu0 %v1318_v31  ;;  %v728_v34 = vld [vmem:[#allocation5 + $0x9c8] sm:$0xff]  ;;  %v1331_v31 = vunpack.c.l.s8.bf16 %v713_v37  ;;  %v1330_v36 = vunpack.c.h.s8.bf16 %v712_v30  ;;  %v1328_v48 = vunpack.c.l.s8.bf16 %v712_v30  ;;  %v2704_v37 = vld [vmem:[#allocation14 + $0x38] sm:$0xff]  }
 0x2bf   :  { %2162 = vmatprep.subr.bf16.mxu1 %v1350_v42  ;;  %v1363_v42 = vunpack.c.l.s8.bf16 %v729_v38  ;;  %v1362_v43 = vunpack.c.h.s8.bf16 %v728_v34  ;;  %v1360_v49 = vunpack.c.l.s8.bf16 %v728_v34  ;;  %v2939_v38 = vmov 0.0  }
 0x2c1   :  { %2122 = vmatpush1.bf16.msra.mxu0 %v1317_v32  ;;  %v711_v32 = vld [vmem:[#allocation5 + $0x940] sm:$0xff] }
 0x2c2   :  { %2163 = vmatpush1.bf16.msra.mxu1 %v1349_v44  ;;  %2123 = vmatprep.subr.bf16.mxu0 %v1316_v45  ;;  %v727_v44 = vld [vmem:[#allocation5 + $0x9c0] sm:$0xff]  ;;  %v1329_v45 = vunpack.c.h.s8.bf16 %v711_v32 }
 0x2c3   :  { %2164 = vmatprep.subr.bf16.mxu1 %v1348_v47  ;;  %v1361_v47 = vunpack.c.h.s8.bf16 %v727_v44 }
 0x2c5   :  { %2124 = vmatpush1.bf16.msra.mxu0 %v1315_v50  ;;  %v1327_v50 = vunpack.c.l.s8.bf16 %v711_v32 }
 0x2c6   :  { %2165 = vmatpush1.bf16.msra.mxu1 %v1347_v51  ;;  %2125 = vmatprep.subr.bf16.mxu0 %v1314_v54  ;;  %v1359_v51 = vunpack.c.l.s8.bf16 %v727_v44  ;;  %v411_v54 = vpack.c.bf16 %v3176_v56, %v3176_v56 }
 0x2c7   :  { %2166 = vmatprep.subr.bf16.mxu1 %v1346_v55  ;;  %v413_v55 = vpack.c.bf16 %v3179_v57, %v3179_v57  ;;  %v2689_v57 = vld [vmem:[#allocation11 + $0x38] sm:$0xff]  }
 0x2c9   :  { %2126 = vmatpush1.bf16.msra.mxu0 %v1313_v4 }
 0x2ca   :  { %2167 = vmatpush1.bf16.msra.mxu1 %v1345_v5  ;;  %2127 = vmatprep.subr.bf16.mxu0 %v1312_v6 }
 0x2cb   :  { %2168 = vmatprep.subr.bf16.mxu1 %v1344_v7 }
 0x2cd   :  { %2128 = vmatpush1.bf16.msra.mxu0 %v1311_v46 }
 0x2ce   :  { %2169 = vmatpush1.bf16.msra.mxu1 %v1343_v9  ;;  %2129 = vmatprep.subr.bf16.mxu0 %v1342_v10 }
 0x2cf   :  { %2170 = vmatprep.subr.bf16.mxu1 %v1374_v11  ;;  %v2688_v11 = vld [vmem:[#allocation11 + $0x78] sm:$0xff]  }
 0x2d1   :  { %2130 = vmatpush2.bf16.msra.mxu0 %v1341_v14  ;;  %v2692_v14 = vld [vmem:[#allocation11 + $0x68] sm:$0xff]  }
 0x2d2   :  { %2171 = vmatpush2.bf16.msra.mxu1 %v1373_v15  ;;  %2131 = vmatprep.subr.bf16.mxu0 %v1340_v18  ;;  %v2694_v15 = vld [vmem:[#allocation11 + $0x60] sm:$0xff]  }
 0x2d3   :  { %2172 = vmatprep.subr.bf16.mxu1 %v1372_v19  ;;  %v2695_v18 = vld [vmem:[#allocation11 + $0x20] sm:$0xff]  }
 0x2d5   :  { %2132 = vmatpush2.bf16.msra.mxu0 %v1339_v52  ;;  %v2697_v52 = vld [vmem:[#allocation11 + $0x18] sm:$0xff]  }
 0x2d6   :  { %2173 = vmatpush2.bf16.msra.mxu1 %v1371_v58  ;;  %2133 = vmatprep.subr.bf16.mxu0 %v1338_v53 }
 0x2d7   :  { %2174 = vmatprep.subr.bf16.mxu1 %v1370_v59 }
 0x2d9   :  { %2134 = vmatpush2.bf16.msra.mxu0 %v1337_v62 }
 0x2da   :  { %2175 = vmatpush2.bf16.msra.mxu1 %v1369_v63  ;;  %2135 = vmatprep.subr.bf16.mxu0 %v1336_v2  ;;  %v2698_v63 = vld [vmem:[#allocation11 + $0x50] sm:$0xff]  }
 0x2db   :  { %2176 = vmatprep.subr.bf16.mxu1 %v1368_v22  ;;  %v2699_v22 = vld [vmem:[#allocation11 + $0x10] sm:$0xff]  }
 0x2dd   :  { %2136 = vmatpush2.bf16.msra.mxu0 %v1335_v25  ;;  %v2700_v25 = vld [vmem:[#allocation11 + $0x48] sm:$0xff]  }
 0x2de   :  { %2177 = vmatpush2.bf16.msra.mxu1 %v1367_v24  ;;  %2137 = vmatprep.subr.bf16.mxu0 %v1334_v29  ;;  %v2701_v24 = vld [vmem:[#allocation11 + $0x8] sm:$0xff]   ;;  %v2702_v29 = vld [vmem:[#allocation11 + $0x40] sm:$0xff]  }
 0x2df   :  { %2178 = vmatprep.subr.bf16.mxu1 %v1366_v16  ;;  %v2703_v16 = vld [vmem:[#allocation11] sm:$0xff]  }
 0x2e1   :  { %2138 = vmatpush2.bf16.msra.mxu0 %v1333_v39  ;;  %v2705_v39 = vld [vmem:[#allocation14 + $0x30] sm:$0xff]  }
 0x2e2   :  { %2179 = vmatpush2.bf16.msra.mxu1 %v1365_v33  ;;  %2139 = vmatprep.subr.bf16.mxu0 %v1332_v28  ;;  %v2706_v33 = vld [vmem:[#allocation14 + $0x28] sm:$0xff]   ;;  %v2707_v28 = vld [vmem:[#allocation14 + $0x20] sm:$0xff]  }
 0x2e3   :  { %2180 = vmatprep.subr.bf16.mxu1 %v1364_v40  ;;  %v2708_v40 = vld [vmem:[#allocation14 + $0x18] sm:$0xff]  }
 0x2e5   :  { %2140 = vmatpush2.bf16.msra.mxu0 %v1331_v31 }
 0x2e6   :  { %2181 = vmatpush2.bf16.msra.mxu1 %v1363_v42  ;;  %2141 = vmatprep.subr.bf16.mxu0 %v1330_v36 }
 0x2e7   :  { %2182 = vmatprep.subr.bf16.mxu1 %v1362_v43 }
 0x2e9   :  { %2142 = vmatpush2.bf16.msra.mxu0 %v1329_v45 }
 0x2ea   :  { %2183 = vmatpush2.bf16.msra.mxu1 %v1361_v47  ;;  %2143 = vmatprep.subr.bf16.mxu0 %v1328_v48  ;;  %v2199_v48 = vsub.s32 0, %v3020_v26 }
 0x2eb   :  { %2184 = vmatprep.subr.bf16.mxu1 %v1360_v49  ;;  %v2203_v49 = vsub.s32 1, %v3020_v26 }
 0x2ed   :  { %2144 = vmatpush2.bf16.msra.mxu0 %v1327_v50  ;;  %v2940_v50 = vmov 269488144  }
 0x2ee   :  { %2185 = vmatpush2.bf16.msra.mxu1 %v1359_v51  ;;  %2607 = vmatprep.subr.bf16.mxu0 %v2688_v11  ;;  %v2216_v51 = vunpack.c.l.s4 %v2940_v50 }
 0x2ef   :  { %2638 = vmatprep.subr.bf16.mxu1 %v2939_v38 }
 0x2f0   :  { %v1901_v0 = vpop.f32.mrf.mxu0  ;;  %2146 = vmatmul.mubr.bf16.vlgmr.msra.gmra.mxu0 %v411_v54  ;;  %v2209_v54 = vld [vmem:[#allocation8] sm:$0x3] }
 0x2f1   :  { %v1942_v1 = vpop.f32.mrf.mxu1  ;;  %2187 = vmatmul.mubr.bf16.vlgmr.msra.gmra.mxu1 %v413_v55  ;;  %v1902_v4 = vadd.f32 %v1901_v0, %v3190_v3  ;;  %2608 = vmatpush3.bf16.msra.mxu0 %v2689_v57  ;;  %v2693_v3 = vld [vmem:[#allocation11 + $0x28] sm:$0xff]   ;;  %v2217_v55 = vunpack.c.0.s8 %v2216_v51  ;;  %v2226_v0 = vrot.slane %v2209_v54, %v2199_v48 }
 0x2f2   :  { %v1903_v5 = vpop.f32.mrf.mxu0  ;;  %2609 = vmatprep.subr.bf16.mxu0 %v2690_v12  ;;  %2639 = vmatpush3.bf16.msra.mxu1 %v2704_v37  ;;  %v2711_v37 = vld [vmem:[#allocation14] sm:$0xff]  }
 0x2f3   :  { %v1944_v6 = vpop.f32.mrf.mxu1  ;;  %v1943_v7 = vadd.f32 %v1942_v1, %v1902_v4  ;;  %v1904_v41 = vadd.f32 %v1903_v5, %v3193_v27  ;;  %2640 = vmatprep.subr.bf16.mxu1 %v2939_v38  ;;  %v2230_v1 = vrot.slane %v2209_v54, %v2203_v49  ;;  %v2220_v4 = vsub.s32 %v2217_v55, %v3020_v26 }
 0x2f4   :  { %v1905_v8 = vpop.f32.mrf.mxu0  ;;  %2654 = vmatprep.mubr.msk.bf16.mxu1 %vm2941_vm0, %v2939_v38 }
 0x2f5   :  { %v1946_v46 = vpop.f32.mrf.mxu1  ;;  %v1945_v9 = vadd.f32 %v1944_v6, %v1904_v41  ;;  %2610 = vmatpush3.bf16.msra.mxu0 %v2691_v13  ;;  %v2231_v5 = vcombine.low %v2226_v0, %v2230_v1 }
 0x2f6   :  { %v1906_v56 = vpop.f32.mrf.mxu0  ;;  %2611 = vmatprep.subr.bf16.mxu0 %v2692_v14  ;;  %2641 = vmatpush3.bf16.msra.mxu1 %v2705_v39  ;;  %v2254_v14 = vld [vmem:[#allocation10] sm:$0x3] }
 0x2f7   :  { %v1947_v10 = vpop.f32.mrf.mxu1  ;;  %2642 = vmatprep.subr.bf16.mxu1 %v2939_v38 }
 0x2f9   :  { %2612 = vmatpush3.bf16.msra.mxu0 %v2693_v3 }
 0x2fa   :  { %2613 = vmatprep.subr.bf16.mxu0 %v2694_v15  ;;  %2643 = vmatpush3.bf16.msra.mxu1 %v2706_v33  ;;  %v2581_v33 = vld [vmem:[#allocation13] ss:$0 sm:$0xff] }
 0x2fb   :  { %2644 = vmatprep.subr.bf16.mxu1 %v2939_v38 }
 0x2fd   :  { %2614 = vmatpush3.bf16.msra.mxu0 %v2695_v18 }
 0x2fe   :  { %2615 = vmatprep.subr.bf16.mxu0 %v2696_v20  ;;  %2645 = vmatpush3.bf16.msra.mxu1 %v2707_v28 }
 0x2ff   :  { %2646 = vmatprep.subr.bf16.mxu1 %v2939_v38 }
 0x301   :  { %2616 = vmatpush3.bf16.msra.mxu0 %v2697_v52  ;;  %v2259_v52 = vrot.slane %v2254_v14, %v2199_v48 }
 0x302   :  { %2617 = vmatprep.subr.bf16.mxu0 %v2698_v63  ;;  %2647 = vmatpush3.bf16.msra.mxu1 %v2708_v40  ;;  %v2263_v63 = vrot.slane %v2254_v14, %v2203_v49 }
 0x303   :  { %2648 = vmatprep.subr.bf16.mxu1 %v2939_v38 }
 0x305   :  { %2618 = vmatpush3.bf16.msra.mxu0 %v2699_v22 }
 0x306   :  { %2619 = vmatprep.subr.bf16.mxu0 %v2700_v25 }
 0x309   :  { %2620 = vmatpush3.bf16.msra.mxu0 %v2701_v24 }
 0x30a   :  { %2621 = vmatprep.subr.bf16.mxu0 %v2702_v29  ;;  %v2709_v29 = vld [vmem:[#allocation14 + $0x10] sm:$0xff]  }
 0x30b   :  { %2649 = vmatpush3.bf16.msra.mxu1 %v2709_v29 }
 0x30c   :  { %2650 = vmatprep.subr.bf16.mxu1 %v2939_v38 }
 0x30d   :  { %2622 = vmatpush3.bf16.msra.mxu0 %v2703_v16  ;;  %v2710_v16 = vld [vmem:[#allocation14 + $0x8] sm:$0xff]  }
 0x30f   :  { %2651 = vmatpush3.bf16.msra.mxu1 %v2710_v16 }
 0x310   :  { %2652 = vmatprep.subr.bf16.mxu1 %v2939_v38 }
 0x313   :  { %2653 = vmatpush3.bf16.msra.mxu1 %v2711_v37 }
 0x31b   :  { %v2213_v6 = vpop.permute.xlu0 %2212 }
 0x31c   :  { %v2221_v41 = vrot.slane %v2213_v6, %v2220_v4 }
 0x330   :  { %v1983_v27 = vpop.f32.mrf.mxu0 }
 0x331   :  { %v2024_v19 = vpop.f32.mrf.mxu1  ;;  %v1984_v21 = vadd.f32 %v1983_v27, %v1943_v7  ;;  %v2238_v7 = vrot.slane %v2231_v5, %v3023_v35 }
 0x332   :  { %v1985_v58 = vpop.f32.mrf.mxu0 }
 0x333   :  { %v2026_v53 = vpop.f32.mrf.mxu1  ;;  %v2025_v59 = vadd.f32 %v2024_v19, %v1984_v21  ;;  %v1986_v60 = vadd.f32 %v1985_v58, %v1945_v9  ;;  %v2240_v46 = vmul.f32 %v2238_v7, %v2221_v41  ;;  %v2195_v9 = vld [vmem:[#allocation7] sm:$0x3] }
 0x334   :  { %v1987_v61 = vpop.f32.mrf.mxu0  ;;  %v2200_v13 = vrot.slane %v2195_v9, %v2199_v48  ;;  %v2204_v27 = vrot.slane %v2195_v9, %v2203_v49 }
 0x335   :  { %v2028_v62 = vpop.f32.mrf.mxu1  ;;  %v2027_v2 = vadd.f32 %v2026_v53, %v1986_v60  ;;  %v2248_v57 = vrot.slane %v2240_v46, %v3023_v35 }
 0x336   :  { %v1988_v17 = vpop.f32.mrf.mxu0 }
 0x337   :  { %v2029_v23 = vpop.f32.mrf.mxu1  ;;  %v2249_v53 = vcombine.high %v2248_v57, %v2248_v57 }
 0x370   :  { %v2065_v30 = vpop.f32.mrf.mxu0 }
 0x371   :  { %v2106_v34 = vpop.f32.mrf.mxu1  ;;  %v2066_v31 = vadd.f32 %v2065_v30, %v2025_v59 }
 0x372   :  { %v2067_v42 = vpop.f32.mrf.mxu0 }
 0x373   :  { %v2108_v36 = vpop.f32.mrf.mxu1  ;;  %v2107_v43 = vadd.f32 %v2106_v34, %v2066_v31  ;;  %v2068_v8 = vadd.f32 %v2067_v42, %v2027_v2 }
 0x374   :  { %v2069_v32 = vpop.f32.mrf.mxu0 }
 0x375   :  { %v2110_v44 = vpop.f32.mrf.mxu1  ;;  %v2109_v11 = vadd.f32 %v2108_v36, %v2068_v8 }
 0x376   :  { %v2070_v45 = vpop.f32.mrf.mxu0 }
 0x377   :  { %v2111_v47 = vpop.f32.mrf.mxu1 }
 0x3b0   :  { %v2147_v56 = vpop.f32.mrf.mxu0 }
 0x3b1   :  { %v2188_v10 = vpop.f32.mrf.mxu1  ;;  %v2148_v12 = vadd.f32 %v2147_v56, %v2107_v43  ;;  %v2598_v43 = vld [vmem:[#allocation16] ss:$0 sm:$0xff] }
 0x3b2   :  { %v2149_v3 = vpop.f32.mrf.mxu0 }
 0x3b3   :  { %v2190_v15 = vpop.f32.mrf.mxu1  ;;  %v2189_v18 = vadd.f32 %v2188_v10, %v2148_v12  ;;  %v2150_v26 = vadd.f32 %v2149_v3, %v2109_v11 }
 0x3b4   :  { %v2151_v19 = vpop.f32.mrf.mxu0 }
 0x3b5   :  { %v2192_v20 = vpop.f32.mrf.mxu1  ;;  %v2207_v21 = vmul.f32 %v2200_v13, %v2189_v18  ;;  %v2191_v58 = vadd.f32 %v2190_v15, %v2150_v26 }
 0x3b6   :  { %v2152_v59 = vpop.f32.mrf.mxu0 }
 0x3b7   :  { %v2193_v60 = vpop.f32.mrf.mxu1  ;;  %v2252_v61 = vadd.f32 %v2248_v57, %v2207_v21  ;;  %v2208_v62 = vmul.f32 %v2204_v27, %v2191_v58 }
 0x3b9   :  { %v2266_v35 = vadd.f32 %v2259_v52, %v2252_v61  ;;  %v2253_v2 = vadd.f32 %v2249_v53, %v2208_v62 }
 0x3bb   :  { %v2267_v22 = vadd.f32 %v2263_v63, %v2253_v2  ;;  %v2268_v17 = vmax.f32 %v2266_v35, 0.0 }
 0x3bd   :  { %v2269_v23 = vmax.f32 %v2267_v22, 0.0  ;;  %v2270_v24 = vpack.c.bf16 %v2268_v17, %v2268_v17 }
 0x3bf   :  { %v2271_v25 = vpack.c.bf16 %v2269_v23, %v2269_v23 }
 0x3c1   :  { %2439 = vmatprep.mubr.bf16.mxu0 %v2271_v25 }
 0x3c2   :  { %2440 = vmatmul.mubr.bf16.vlgmr.msra.gmra.mxu0 %v2270_v24 }
 0x482   :  { %v2623_v39 = vpop.f32.mrf.mxu0 }
 0x484   :  { %v2624_v28 = vpop.f32.mrf.mxu0 }
 0x485   :  { %v2625_v40 = vadd.f32 %v2624_v28, %v2623_v39 }
 0x486   :  { %v2626_v30 = vpop.f32.mrf.mxu0 }
 0x487   :  { %v2442_v34 = vadd.f32 %v2625_v40, %v2581_v33 }
 0x488   :  { %v2627_v31 = vpop.f32.mrf.mxu0 }
 0x489   :  { %v2447_v42 = vmax.f32 %v2442_v34, 0.0 }
 0x48b   :  { %v2448_v36 = vpack.c.bf16 %v2447_v42, %v2447_v42 }
 0x48d   :  { %2655 = vmatmul.mubr.bf16.vlgmr.msra.gmra.mxu1 %v2448_v36 }
 0x54d   :  { %v2554_v32 = vpop.f32.mrf.mxu1 }
 0x54e   :  { %v2555_v44 = vadd.f32 %v2598_v43, %v2554_v32 }
 0x54f   :  { %v2656_v45 = vpop.f32.mrf.mxu1 }
 0x550   :  { %v2560_v47 = vmax.f32 %v2555_v44, 0.0 }
 0x551   :  { %v2557_v48 = vpop.f32.mrf.mxu1 }
 0x552   :  { %2561 = vst [vmem:[#allocation17] sm:$0x3] %v2560_v47 }
 0x553   :  { %v2657_v38 = vpop.f32.mrf.mxu1 }
 0x554   :  { %2903 = shalt.err (!%p2900_p7)
}
 0x555   :  { %2571 = dma.vmem_to_hbm [thread:$0]  %s2569_s8, 32, %s3227_s9, [#allocation4]  }
 0x556   :  { %2922 = dma.done.wait [#allocation4], 32  }
 0x557   :  { %2923 = vsyncadd [#allocation4], 4294967264 }
 0x558   :  { %2575 = vsyncpa [#allocation3], 1 }
 0x559   :  { %2576 = vsyncpa [#allocation6], 1 }
 0x55a   :  { %2577 = vsyncpa [#allocation9], 1 }
 0x55b   :  { %2578 = vsyncpa [#allocation12], 1 }
 0x55c   :  { %2579 = vsyncpa [#allocation15], 1 }
 0x55d   :  { %2580 = vsyncpa [#allocation4], 1 }

</bundles_post_ra>
